<compile_context>
chip_gen: v6e
topology: v6e:2x2x1
jax: 0.10.0
libtpu: 0.0.40
codegen_flags: <defaults>
</compile_context>

<pallas_src>
import jax
import jax.numpy as jnp
from jax import lax
from jax.experimental import pallas as pl
from jax.experimental.pallas import tpu as pltpu

MAX_LENGTH = 10
SOS_TOKEN = 0
GATE_STRIPE = 128   # one full 128-lane stripe per GRU gate (>= n_hidden)


def decoder_kernel(e_ref, whh_t_ref, bhh_ref, wlin_t_ref, blin_ref, h0_ref,
                   out_ref, hout_ref):
    """Whole greedy decode (MAX_LENGTH steps) in one kernel invocation."""
    Bp, Hp = h0_ref.shape               # (8, 128)
    Vp = e_ref.shape[0]                  # padded vocab (multiple of 128)
    G = Hp                               # per-gate lane stripe (== GATE_STRIPE)

    iota_v = lax.broadcasted_iota(jnp.int32, (Bp, Vp), 1)           # [Bp, Vp]
    onehot0 = (iota_v == SOS_TOKEN).astype(jnp.float32)             # SOS one-hot

    def step(t, carry):
        h, onehot = carry                                            # [Bp,Hp], [Bp,Vp]

        # gi = relu(emb[tok]) @ w_ih.T + b_ih, folded into the E table;
        # the one-hot matmul is an exact row selection.
        gi = jnp.dot(onehot, e_ref[...], preferred_element_type=jnp.float32)
        gh = (jnp.dot(h, whh_t_ref[...], preferred_element_type=jnp.float32)
              + bhh_ref[...])

        # GRU cell (PyTorch gate order r, z, n); each gate is a vreg-aligned
        # 128-lane stripe.  Padded lanes stay exactly zero across steps.
        r = jax.nn.sigmoid(gi[:, 0:G] + gh[:, 0:G])
        z = jax.nn.sigmoid(gi[:, G:2 * G] + gh[:, G:2 * G])
        n = jnp.tanh(gi[:, 2 * G:3 * G] + r * gh[:, 2 * G:3 * G])
        h = (1.0 - z) * n + z * h

        # Output projection: raw logits (log_softmax hoisted to the wrapper).
        logits = (jnp.dot(h, wlin_t_ref[...], preferred_element_type=jnp.float32)
                  + blin_ref[...])
        out_ref[t] = logits              # one dense unmasked (8,128) tile store

        # Greedy next token as a one-hot row (first-index argmax tie-break).
        # Padded vocab lanes carry a -1e30 bias, so they can never win.
        m = jnp.max(logits, axis=-1, keepdims=True)
        idx = jnp.min(jnp.where(logits == m, iota_v, Vp), axis=-1, keepdims=True)
        onehot = (iota_v == idx).astype(jnp.float32)
        return h, onehot

    h_final, _ = lax.fori_loop(0, MAX_LENGTH, step,
                               (h0_ref[...], onehot0), unroll=True)
    hout_ref[...] = h_final


def decoder_forward(params, encoder_outputs, encoder_hidden):
    """Mirrors Decoder.forward(encoder_outputs, encoder_hidden, target_tensor=None)."""
    # TODO(synk): teacher-forcing (target_tensor) path not implemented; greedy only.
    B = encoder_outputs.shape[0]
    V, H = params["emb"].shape
    G = GATE_STRIPE
    assert H <= G, "n_hidden must fit in one 128-lane gate stripe"
    Bp = max(8, ((B + 7) // 8) * 8)                  # sublane-dense batch
    Hp = G                                           # padded hidden width
    Vp = ((V + 127) // 128) * 128                    # lane-dense padded vocab
    h0 = encoder_hidden[0].astype(jnp.float32)       # [B, H]

    # One-time precompute: fold embedding + ReLU + GRU input matmul + b_ih,
    # and lay each GRU gate out in its own 128-lane stripe.
    E = jnp.maximum(params["emb"], 0.0) @ params["w_ih"].T + params["b_ih"][None, :]
    whh_t = params["w_hh"].T                                          # [H, 3H]

    E_pad = jnp.zeros((Vp, 3 * G), jnp.float32)
    whh_t_pad = jnp.zeros((Hp, 3 * G), jnp.float32)
    bhh_s = jnp.zeros((3 * G,), jnp.float32)
    for g in range(3):
        E_pad = E_pad.at[:V, g * G:g * G + H].set(E[:, g * H:(g + 1) * H])
        whh_t_pad = whh_t_pad.at[:H, g * G:g * G + H].set(whh_t[:, g * H:(g + 1) * H])
        bhh_s = bhh_s.at[g * G:g * G + H].set(params["b_hh"][g * H:(g + 1) * H])
    bhh_b = jnp.broadcast_to(bhh_s[None, :], (Bp, 3 * G))             # [Bp, 3G]

    wlin_t_pad = jnp.zeros((Hp, Vp), jnp.float32).at[:H, :V].set(params["w_lin"].T)
    blin_pad = jnp.full((Vp,), -1e30, jnp.float32).at[:V].set(params["b_lin"])
    blin_b = jnp.broadcast_to(blin_pad[None, :], (Bp, Vp))            # [Bp, Vp]

    h0_pad = jnp.zeros((Bp, Hp), jnp.float32).at[:B, :H].set(h0)      # [Bp, Hp]

    vmem = pl.BlockSpec(memory_space=pltpu.MemorySpace.VMEM)
    out_tbv, h_out = pl.pallas_call(
        decoder_kernel,
        out_shape=(jax.ShapeDtypeStruct((MAX_LENGTH, Bp, Vp), jnp.float32),
                   jax.ShapeDtypeStruct((Bp, Hp), jnp.float32)),
        in_specs=[vmem] * 6,
        out_specs=(vmem, vmem),
    )(E_pad, whh_t_pad, bhh_b, wlin_t_pad, blin_b, h0_pad)

    # Slice padded batch/vocab/hidden off before any reduction.
    logits = jnp.transpose(out_tbv[:, :B, :V], (1, 0, 2))             # [B, T, V]
    decoder_outputs = jax.nn.log_softmax(logits, axis=-1)             # hoisted out of kernel
    decoder_hidden = h_out[None, :B, :H]                              # [1, B, H]
    return decoder_outputs, decoder_hidden, None


def decoder_reference(params, encoder_outputs, encoder_hidden):
    """Pure-JAX reference replicating the PyTorch module (greedy path)."""
    B = encoder_outputs.shape[0]
    H = params["emb"].shape[1]
    h = encoder_hidden[0].astype(jnp.float32)
    tok = jnp.full((B,), SOS_TOKEN, dtype=jnp.int32)
    outs = []
    for _ in range(MAX_LENGTH):
        x = jax.nn.relu(params["emb"][tok])
        gi = x @ params["w_ih"].T + params["b_ih"]
        gh = h @ params["w_hh"].T + params["b_hh"]
        r = jax.nn.sigmoid(gi[:, :H] + gh[:, :H])
        z = jax.nn.sigmoid(gi[:, H:2 * H] + gh[:, H:2 * H])
        n = jnp.tanh(gi[:, 2 * H:] + r * gh[:, 2 * H:])
        h = (1.0 - z) * n + z * h
        logits = h @ params["w_lin"].T + params["b_lin"]
        outs.append(logits)
        tok = jnp.argmax(logits, axis=-1)
    logits = jnp.stack(outs, axis=1)
    return jax.nn.log_softmax(logits, axis=-1), h[None], None


def init_params(key, n_hidden, n_output):
    ks = jax.random.split(key, 7)
    bound = 1.0 / jnp.sqrt(jnp.float32(n_hidden))
    u = lambda k, shape: jax.random.uniform(k, shape, jnp.float32, -bound, bound)
    return {
        "emb": jax.random.normal(ks[0], (n_output, n_hidden), jnp.float32),
        "w_ih": u(ks[1], (3 * n_hidden, n_hidden)),
        "w_hh": u(ks[2], (3 * n_hidden, n_hidden)),
        "b_ih": u(ks[3], (3 * n_hidden,)),
        "b_hh": u(ks[4], (3 * n_hidden,)),
        "w_lin": u(ks[5], (n_output, n_hidden)),
        "b_lin": u(ks[6], (n_output,)),
    }


if __name__ == "__main__":
    B, H, V = 4, 32, 16     # batch, n_hidden, n_output

    key = jax.random.PRNGKey(0)
    kp, ke, kh = jax.random.split(key, 3)
    params = init_params(kp, H, V)
    encoder_outputs = jax.random.normal(ke, (B, MAX_LENGTH, H), jnp.float32)
    encoder_hidden = jax.random.normal(kh, (1, B, H), jnp.float32)

    out, hid, _ = decoder_forward(params, encoder_outputs, encoder_hidden)
    out = jax.block_until_ready(out)
    hid = jax.block_until_ready(hid)

    ref_out, ref_hid, _ = decoder_reference(params, encoder_outputs, encoder_hidden)
    assert out.shape == (B, MAX_LENGTH, V) and hid.shape == (1, B, H)
    assert jnp.allclose(out, ref_out, atol=1e-5, rtol=1e-5)
    assert jnp.allclose(hid, ref_hid, atol=1e-5, rtol=1e-5)

    print("KERNEL_OK")
</pallas_src>

<mosaic_0001>
module attributes {stable_mosaic.version = 11 : i64} {
  func.func @decoder_kernel(%arg0: memref<128x384xf32, #tpu.memory_space<vmem>>, %arg1: memref<128x384xf32, #tpu.memory_space<vmem>>, %arg2: memref<8x384xf32, #tpu.memory_space<vmem>>, %arg3: memref<128x128xf32, #tpu.memory_space<vmem>>, %arg4: memref<8x128xf32, #tpu.memory_space<vmem>>, %arg5: memref<8x128xf32, #tpu.memory_space<vmem>>, %arg6: memref<10x8x128xf32, #tpu.memory_space<vmem>>, %arg7: memref<8x128xf32, #tpu.memory_space<vmem>>) attributes {dimension_semantics = [], scalar_prefetch = 0 : i64, scratch_operands = 0 : i64, tpu.core_type = #tpu.core_type<tc>} {
    %0 = tpu.iota {dimensions = array<i32: 1>} : vector<8x128xi32>
    %c0_i32 = arith.constant 0 : i32
    %1 = vector.broadcast %c0_i32 : i32 to vector<8x128xi32>
    %2 = arith.cmpi eq, %0, %1 : vector<8x128xi32>
    %3 = arith.extui %2 : vector<8x128xi1> to vector<8x128xi32>
    %4 = arith.sitofp %3 : vector<8x128xi32> to vector<8x128xf32>
    %c0 = arith.constant 0 : index
    %c0_0 = arith.constant 0 : index
    %5 = vector.load %arg5[%c0, %c0_0] : memref<8x128xf32, #tpu.memory_space<vmem>>, vector<8x128xf32>
    %c0_i32_1 = arith.constant 0 : i32
    %c0_2 = arith.constant 0 : index
    %c0_3 = arith.constant 0 : index
    %6 = vector.load %arg0[%c0_2, %c0_3] : memref<128x384xf32, #tpu.memory_space<vmem>>, vector<128x384xf32>
    %cst = arith.constant dense<0.000000e+00> : vector<8x384xf32>
    %7 = tpu.matmul %4, %6, %cst {dimension_numbers = #tpu.dot_dimension_numbers<[1], [0], [0], [1], [0, 0, 1, 1], [], []>} : vector<8x128xf32>, vector<128x384xf32>, vector<8x384xf32> -> vector<8x384xf32>
    %c0_4 = arith.constant 0 : index
    %c0_5 = arith.constant 0 : index
    %8 = vector.load %arg1[%c0_4, %c0_5] : memref<128x384xf32, #tpu.memory_space<vmem>>, vector<128x384xf32>
    %cst_6 = arith.constant dense<0.000000e+00> : vector<8x384xf32>
    %9 = tpu.matmul %5, %8, %cst_6 {dimension_numbers = #tpu.dot_dimension_numbers<[1], [0], [0], [1], [0, 0, 1, 1], [], []>} : vector<8x128xf32>, vector<128x384xf32>, vector<8x384xf32> -> vector<8x384xf32>
    %c0_7 = arith.constant 0 : index
    %c0_8 = arith.constant 0 : index
    %10 = vector.load %arg2[%c0_7, %c0_8] : memref<8x384xf32, #tpu.memory_space<vmem>>, vector<8x384xf32>
    %11 = arith.addf %9, %10 : vector<8x384xf32>
    %12 = vector.extract_strided_slice %7 {offsets = [0, 0], sizes = [8, 128], strides = [1, 1]} : vector<8x384xf32> to vector<8x128xf32>
    %13 = vector.extract_strided_slice %11 {offsets = [0, 0], sizes = [8, 128], strides = [1, 1]} : vector<8x384xf32> to vector<8x128xf32>
    %14 = arith.addf %12, %13 : vector<8x128xf32>
    %15 = arith.negf %14 : vector<8x128xf32>
    %16 = math.exp %15 : vector<8x128xf32>
    %cst_9 = arith.constant 1.000000e+00 : f32
    %17 = vector.broadcast %cst_9 : f32 to vector<8x128xf32>
    %18 = arith.addf %17, %16 : vector<8x128xf32>
    %19 = arith.divf %17, %18 : vector<8x128xf32>
    %20 = vector.extract_strided_slice %7 {offsets = [0, 128], sizes = [8, 128], strides = [1, 1]} : vector<8x384xf32> to vector<8x128xf32>
    %21 = vector.extract_strided_slice %11 {offsets = [0, 128], sizes = [8, 128], strides = [1, 1]} : vector<8x384xf32> to vector<8x128xf32>
    %22 = arith.addf %20, %21 : vector<8x128xf32>
    %23 = arith.negf %22 : vector<8x128xf32>
    %24 = math.exp %23 : vector<8x128xf32>
    %cst_10 = arith.constant 1.000000e+00 : f32
    %25 = vector.broadcast %cst_10 : f32 to vector<8x128xf32>
    %26 = arith.addf %25, %24 : vector<8x128xf32>
    %27 = arith.divf %25, %26 : vector<8x128xf32>
    %28 = vector.extract_strided_slice %7 {offsets = [0, 256], sizes = [8, 128], strides = [1, 1]} : vector<8x384xf32> to vector<8x128xf32>
    %29 = vector.extract_strided_slice %11 {offsets = [0, 256], sizes = [8, 128], strides = [1, 1]} : vector<8x384xf32> to vector<8x128xf32>
    %30 = arith.mulf %19, %29 : vector<8x128xf32>
    %31 = arith.addf %28, %30 : vector<8x128xf32>
    %32 = math.tanh %31 : vector<8x128xf32>
    %cst_11 = arith.constant 1.000000e+00 : f32
    %33 = vector.broadcast %cst_11 : f32 to vector<8x128xf32>
    %34 = arith.subf %33, %27 : vector<8x128xf32>
    %35 = arith.mulf %34, %32 : vector<8x128xf32>
    %36 = arith.mulf %27, %5 : vector<8x128xf32>
    %37 = arith.addf %35, %36 : vector<8x128xf32>
    %c0_12 = arith.constant 0 : index
    %c0_13 = arith.constant 0 : index
    %38 = vector.load %arg3[%c0_12, %c0_13] : memref<128x128xf32, #tpu.memory_space<vmem>>, vector<128x128xf32>
    %cst_14 = arith.constant dense<0.000000e+00> : vector<8x128xf32>
    %39 = tpu.matmul %37, %38, %cst_14 {dimension_numbers = #tpu.dot_dimension_numbers<[1], [0], [0], [1], [0, 0, 1, 1], [], []>} : vector<8x128xf32>, vector<128x128xf32>, vector<8x128xf32> -> vector<8x128xf32>
    %c0_15 = arith.constant 0 : index
    %c0_16 = arith.constant 0 : index
    %40 = vector.load %arg4[%c0_15, %c0_16] : memref<8x128xf32, #tpu.memory_space<vmem>>, vector<8x128xf32>
    %41 = arith.addf %39, %40 : vector<8x128xf32>
    %42 = arith.index_cast %c0_i32_1 : i32 to index
    %c0_17 = arith.constant 0 : index
    %c0_18 = arith.constant 0 : index
    %43 = vector.load %arg6[%42, %c0_17, %c0_18] : memref<10x8x128xf32, #tpu.memory_space<vmem>>, vector<1x8x128xf32>
    %44 = vector.shape_cast %43 : vector<1x8x128xf32> to vector<8x128xf32>
    %45 = vector.shape_cast %41 : vector<8x128xf32> to vector<1x8x128xf32>
    tpu.vector_store %arg6[%42, %c0_17, %c0_18], %45 {strides = array<i32>} : memref<10x8x128xf32, #tpu.memory_space<vmem>>, vector<1x8x128xf32>,
    %cst_19 = arith.constant dense<0xFF800000> : vector<8xf32>
    %46 = vector.multi_reduction <maximumf>, %41, %cst_19 [1] : vector<8x128xf32> to vector<8xf32>
    %47 = vector.shape_cast %46 : vector<8xf32> to vector<8x1xf32>
    %48 = vector.broadcast %47 : vector<8x1xf32> to vector<8x128xf32>
    %49 = arith.cmpf oeq, %41, %48 : vector<8x128xf32>
    %c128_i32 = arith.constant 128 : i32
    %50 = vector.broadcast %c128_i32 : i32 to vector<8x128xi32>
    %51 = arith.select %49, %0, %50 : vector<8x128xi1>, vector<8x128xi32>
    %cst_20 = arith.constant dense<2147483647> : vector<8xi32>
    %52 = vector.multi_reduction <minsi>, %51, %cst_20 [1] : vector<8x128xi32> to vector<8xi32>
    %53 = vector.shape_cast %52 : vector<8xi32> to vector<8x1xi32>
    %54 = vector.broadcast %53 : vector<8x1xi32> to vector<8x128xi32>
    %55 = arith.cmpi eq, %0, %54 : vector<8x128xi32>
    %56 = arith.extui %55 : vector<8x128xi1> to vector<8x128xi32>
    %57 = arith.sitofp %56 : vector<8x128xi32> to vector<8x128xf32>
    %c1_i32 = arith.constant 1 : i32
    %c0_21 = arith.constant 0 : index
    %c0_22 = arith.constant 0 : index
    %58 = vector.load %arg0[%c0_21, %c0_22] : memref<128x384xf32, #tpu.memory_space<vmem>>, vector<128x384xf32>
    %cst_23 = arith.constant dense<0.000000e+00> : vector<8x384xf32>
    %59 = tpu.matmul %57, %58, %cst_23 {dimension_numbers = #tpu.dot_dimension_numbers<[1], [0], [0], [1], [0, 0, 1, 1], [], []>} : vector<8x128xf32>, vector<128x384xf32>, vector<8x384xf32> -> vector<8x384xf32>
    %c0_24 = arith.constant 0 : index
    %c0_25 = arith.constant 0 : index
    %60 = vector.load %arg1[%c0_24, %c0_25] : memref<128x384xf32, #tpu.memory_space<vmem>>, vector<128x384xf32>
    %cst_26 = arith.constant dense<0.000000e+00> : vector<8x384xf32>
    %61 = tpu.matmul %37, %60, %cst_26 {dimension_numbers = #tpu.dot_dimension_numbers<[1], [0], [0], [1], [0, 0, 1, 1], [], []>} : vector<8x128xf32>, vector<128x384xf32>, vector<8x384xf32> -> vector<8x384xf32>
    %c0_27 = arith.constant 0 : index
    %c0_28 = arith.constant 0 : index
    %62 = vector.load %arg2[%c0_27, %c0_28] : memref<8x384xf32, #tpu.memory_space<vmem>>, vector<8x384xf32>
    %63 = arith.addf %61, %62 : vector<8x384xf32>
    %64 = vector.extract_strided_slice %59 {offsets = [0, 0], sizes = [8, 128], strides = [1, 1]} : vector<8x384xf32> to vector<8x128xf32>
    %65 = vector.extract_strided_slice %63 {offsets = [0, 0], sizes = [8, 128], strides = [1, 1]} : vector<8x384xf32> to vector<8x128xf32>
    %66 = arith.addf %64, %65 : vector<8x128xf32>
    %67 = arith.negf %66 : vector<8x128xf32>
    %68 = math.exp %67 : vector<8x128xf32>
    %cst_29 = arith.constant 1.000000e+00 : f32
    %69 = vector.broadcast %cst_29 : f32 to vector<8x128xf32>
    %70 = arith.addf %69, %68 : vector<8x128xf32>
    %71 = arith.divf %69, %70 : vector<8x128xf32>
    %72 = vector.extract_strided_slice %59 {offsets = [0, 128], sizes = [8, 128], strides = [1, 1]} : vector<8x384xf32> to vector<8x128xf32>
    %73 = vector.extract_strided_slice %63 {offsets = [0, 128], sizes = [8, 128], strides = [1, 1]} : vector<8x384xf32> to vector<8x128xf32>
    %74 = arith.addf %72, %73 : vector<8x128xf32>
    %75 = arith.negf %74 : vector<8x128xf32>
    %76 = math.exp %75 : vector<8x128xf32>
    %cst_30 = arith.constant 1.000000e+00 : f32
    %77 = vector.broadcast %cst_30 : f32 to vector<8x128xf32>
    %78 = arith.addf %77, %76 : vector<8x128xf32>
    %79 = arith.divf %77, %78 : vector<8x128xf32>
    %80 = vector.extract_strided_slice %59 {offsets = [0, 256], sizes = [8, 128], strides = [1, 1]} : vector<8x384xf32> to vector<8x128xf32>
    %81 = vector.extract_strided_slice %63 {offsets = [0, 256], sizes = [8, 128], strides = [1, 1]} : vector<8x384xf32> to vector<8x128xf32>
    %82 = arith.mulf %71, %81 : vector<8x128xf32>
    %83 = arith.addf %80, %82 : vector<8x128xf32>
    %84 = math.tanh %83 : vector<8x128xf32>
    %cst_31 = arith.constant 1.000000e+00 : f32
    %85 = vector.broadcast %cst_31 : f32 to vector<8x128xf32>
    %86 = arith.subf %85, %79 : vector<8x128xf32>
    %87 = arith.mulf %86, %84 : vector<8x128xf32>
    %88 = arith.mulf %79, %37 : vector<8x128xf32>
    %89 = arith.addf %87, %88 : vector<8x128xf32>
    %c0_32 = arith.constant 0 : index
    %c0_33 = arith.constant 0 : index
    %90 = vector.load %arg3[%c0_32, %c0_33] : memref<128x128xf32, #tpu.memory_space<vmem>>, vector<128x128xf32>
    %cst_34 = arith.constant dense<0.000000e+00> : vector<8x128xf32>
    %91 = tpu.matmul %89, %90, %cst_34 {dimension_numbers = #tpu.dot_dimension_numbers<[1], [0], [0], [1], [0, 0, 1, 1], [], []>} : vector<8x128xf32>, vector<128x128xf32>, vector<8x128xf32> -> vector<8x128xf32>
    %c0_35 = arith.constant 0 : index
    %c0_36 = arith.constant 0 : index
    %92 = vector.load %arg4[%c0_35, %c0_36] : memref<8x128xf32, #tpu.memory_space<vmem>>, vector<8x128xf32>
    %93 = arith.addf %91, %92 : vector<8x128xf32>
    %94 = arith.index_cast %c1_i32 : i32 to index
    %c0_37 = arith.constant 0 : index
    %c0_38 = arith.constant 0 : index
    %95 = vector.load %arg6[%94, %c0_37, %c0_38] : memref<10x8x128xf32, #tpu.memory_space<vmem>>, vector<1x8x128xf32>
    %96 = vector.shape_cast %95 : vector<1x8x128xf32> to vector<8x128xf32>
    %97 = vector.shape_cast %93 : vector<8x128xf32> to vector<1x8x128xf32>
    tpu.vector_store %arg6[%94, %c0_37, %c0_38], %97 {strides = array<i32>} : memref<10x8x128xf32, #tpu.memory_space<vmem>>, vector<1x8x128xf32>,
    %cst_39 = arith.constant dense<0xFF800000> : vector<8xf32>
    %98 = vector.multi_reduction <maximumf>, %93, %cst_39 [1] : vector<8x128xf32> to vector<8xf32>
    %99 = vector.shape_cast %98 : vector<8xf32> to vector<8x1xf32>
    %100 = vector.broadcast %99 : vector<8x1xf32> to vector<8x128xf32>
    %101 = arith.cmpf oeq, %93, %100 : vector<8x128xf32>
    %c128_i32_40 = arith.constant 128 : i32
    %102 = vector.broadcast %c128_i32_40 : i32 to vector<8x128xi32>
    %103 = arith.select %101, %0, %102 : vector<8x128xi1>, vector<8x128xi32>
    %cst_41 = arith.constant dense<2147483647> : vector<8xi32>
    %104 = vector.multi_reduction <minsi>, %103, %cst_41 [1] : vector<8x128xi32> to vector<8xi32>
    %105 = vector.shape_cast %104 : vector<8xi32> to vector<8x1xi32>
    %106 = vector.broadcast %105 : vector<8x1xi32> to vector<8x128xi32>
    %107 = arith.cmpi eq, %0, %106 : vector<8x128xi32>
    %108 = arith.extui %107 : vector<8x128xi1> to vector<8x128xi32>
    %109 = arith.sitofp %108 : vector<8x128xi32> to vector<8x128xf32>
    %c2_i32 = arith.constant 2 : i32
    %c0_42 = arith.constant 0 : index
    %c0_43 = arith.constant 0 : index
    %110 = vector.load %arg0[%c0_42, %c0_43] : memref<128x384xf32, #tpu.memory_space<vmem>>, vector<128x384xf32>
    %cst_44 = arith.constant dense<0.000000e+00> : vector<8x384xf32>
    %111 = tpu.matmul %109, %110, %cst_44 {dimension_numbers = #tpu.dot_dimension_numbers<[1], [0], [0], [1], [0, 0, 1, 1], [], []>} : vector<8x128xf32>, vector<128x384xf32>, vector<8x384xf32> -> vector<8x384xf32>
    %c0_45 = arith.constant 0 : index
    %c0_46 = arith.constant 0 : index
    %112 = vector.load %arg1[%c0_45, %c0_46] : memref<128x384xf32, #tpu.memory_space<vmem>>, vector<128x384xf32>
    %cst_47 = arith.constant dense<0.000000e+00> : vector<8x384xf32>
    %113 = tpu.matmul %89, %112, %cst_47 {dimension_numbers = #tpu.dot_dimension_numbers<[1], [0], [0], [1], [0, 0, 1, 1], [], []>} : vector<8x128xf32>, vector<128x384xf32>, vector<8x384xf32> -> vector<8x384xf32>
    %c0_48 = arith.constant 0 : index
    %c0_49 = arith.constant 0 : index
    %114 = vector.load %arg2[%c0_48, %c0_49] : memref<8x384xf32, #tpu.memory_space<vmem>>, vector<8x384xf32>
    %115 = arith.addf %113, %114 : vector<8x384xf32>
    %116 = vector.extract_strided_slice %111 {offsets = [0, 0], sizes = [8, 128], strides = [1, 1]} : vector<8x384xf32> to vector<8x128xf32>
    %117 = vector.extract_strided_slice %115 {offsets = [0, 0], sizes = [8, 128], strides = [1, 1]} : vector<8x384xf32> to vector<8x128xf32>
    %118 = arith.addf %116, %117 : vector<8x128xf32>
    %119 = arith.negf %118 : vector<8x128xf32>
    %120 = math.exp %119 : vector<8x128xf32>
    %cst_50 = arith.constant 1.000000e+00 : f32
    %121 = vector.broadcast %cst_50 : f32 to vector<8x128xf32>
    %122 = arith.addf %121, %120 : vector<8x128xf32>
    %123 = arith.divf %121, %122 : vector<8x128xf32>
    %124 = vector.extract_strided_slice %111 {offsets = [0, 128], sizes = [8, 128], strides = [1, 1]} : vector<8x384xf32> to vector<8x128xf32>
    %125 = vector.extract_strided_slice %115 {offsets = [0, 128], sizes = [8, 128], strides = [1, 1]} : vector<8x384xf32> to vector<8x128xf32>
    %126 = arith.addf %124, %125 : vector<8x128xf32>
    %127 = arith.negf %126 : vector<8x128xf32>
    %128 = math.exp %127 : vector<8x128xf32>
    %cst_51 = arith.constant 1.000000e+00 : f32
    %129 = vector.broadcast %cst_51 : f32 to vector<8x128xf32>
    %130 = arith.addf %129, %128 : vector<8x128xf32>
    %131 = arith.divf %129, %130 : vector<8x128xf32>
    %132 = vector.extract_strided_slice %111 {offsets = [0, 256], sizes = [8, 128], strides = [1, 1]} : vector<8x384xf32> to vector<8x128xf32>
    %133 = vector.extract_strided_slice %115 {offsets = [0, 256], sizes = [8, 128], strides = [1, 1]} : vector<8x384xf32> to vector<8x128xf32>
    %134 = arith.mulf %123, %133 : vector<8x128xf32>
    %135 = arith.addf %132, %134 : vector<8x128xf32>
    %136 = math.tanh %135 : vector<8x128xf32>
    %cst_52 = arith.constant 1.000000e+00 : f32
    %137 = vector.broadcast %cst_52 : f32 to vector<8x128xf32>
    %138 = arith.subf %137, %131 : vector<8x128xf32>
    %139 = arith.mulf %138, %136 : vector<8x128xf32>
    %140 = arith.mulf %131, %89 : vector<8x128xf32>
    %141 = arith.addf %139, %140 : vector<8x128xf32>
    %c0_53 = arith.constant 0 : index
    %c0_54 = arith.constant 0 : index
    %142 = vector.load %arg3[%c0_53, %c0_54] : memref<128x128xf32, #tpu.memory_space<vmem>>, vector<128x128xf32>
    %cst_55 = arith.constant dense<0.000000e+00> : vector<8x128xf32>
    %143 = tpu.matmul %141, %142, %cst_55 {dimension_numbers = #tpu.dot_dimension_numbers<[1], [0], [0], [1], [0, 0, 1, 1], [], []>} : vector<8x128xf32>, vector<128x128xf32>, vector<8x128xf32> -> vector<8x128xf32>
    %c0_56 = arith.constant 0 : index
    %c0_57 = arith.constant 0 : index
    %144 = vector.load %arg4[%c0_56, %c0_57] : memref<8x128xf32, #tpu.memory_space<vmem>>, vector<8x128xf32>
    %145 = arith.addf %143, %144 : vector<8x128xf32>
    %146 = arith.index_cast %c2_i32 : i32 to index
    %c0_58 = arith.constant 0 : index
    %c0_59 = arith.constant 0 : index
    %147 = vector.load %arg6[%146, %c0_58, %c0_59] : memref<10x8x128xf32, #tpu.memory_space<vmem>>, vector<1x8x128xf32>
    %148 = vector.shape_cast %147 : vector<1x8x128xf32> to vector<8x128xf32>
    %149 = vector.shape_cast %145 : vector<8x128xf32> to vector<1x8x128xf32>
    tpu.vector_store %arg6[%146, %c0_58, %c0_59], %149 {strides = array<i32>} : memref<10x8x128xf32, #tpu.memory_space<vmem>>, vector<1x8x128xf32>,
    %cst_60 = arith.constant dense<0xFF800000> : vector<8xf32>
    %150 = vector.multi_reduction <maximumf>, %145, %cst_60 [1] : vector<8x128xf32> to vector<8xf32>
    %151 = vector.shape_cast %150 : vector<8xf32> to vector<8x1xf32>
    %152 = vector.broadcast %151 : vector<8x1xf32> to vector<8x128xf32>
    %153 = arith.cmpf oeq, %145, %152 : vector<8x128xf32>
    %c128_i32_61 = arith.constant 128 : i32
    %154 = vector.broadcast %c128_i32_61 : i32 to vector<8x128xi32>
    %155 = arith.select %153, %0, %154 : vector<8x128xi1>, vector<8x128xi32>
    %cst_62 = arith.constant dense<2147483647> : vector<8xi32>
    %156 = vector.multi_reduction <minsi>, %155, %cst_62 [1] : vector<8x128xi32> to vector<8xi32>
    %157 = vector.shape_cast %156 : vector<8xi32> to vector<8x1xi32>
    %158 = vector.broadcast %157 : vector<8x1xi32> to vector<8x128xi32>
    %159 = arith.cmpi eq, %0, %158 : vector<8x128xi32>
    %160 = arith.extui %159 : vector<8x128xi1> to vector<8x128xi32>
    %161 = arith.sitofp %160 : vector<8x128xi32> to vector<8x128xf32>
    %c3_i32 = arith.constant 3 : i32
    %c0_63 = arith.constant 0 : index
    %c0_64 = arith.constant 0 : index
    %162 = vector.load %arg0[%c0_63, %c0_64] : memref<128x384xf32, #tpu.memory_space<vmem>>, vector<128x384xf32>
    %cst_65 = arith.constant dense<0.000000e+00> : vector<8x384xf32>
    %163 = tpu.matmul %161, %162, %cst_65 {dimension_numbers = #tpu.dot_dimension_numbers<[1], [0], [0], [1], [0, 0, 1, 1], [], []>} : vector<8x128xf32>, vector<128x384xf32>, vector<8x384xf32> -> vector<8x384xf32>
    %c0_66 = arith.constant 0 : index
    %c0_67 = arith.constant 0 : index
    %164 = vector.load %arg1[%c0_66, %c0_67] : memref<128x384xf32, #tpu.memory_space<vmem>>, vector<128x384xf32>
    %cst_68 = arith.constant dense<0.000000e+00> : vector<8x384xf32>
    %165 = tpu.matmul %141, %164, %cst_68 {dimension_numbers = #tpu.dot_dimension_numbers<[1], [0], [0], [1], [0, 0, 1, 1], [], []>} : vector<8x128xf32>, vector<128x384xf32>, vector<8x384xf32> -> vector<8x384xf32>
    %c0_69 = arith.constant 0 : index
    %c0_70 = arith.constant 0 : index
    %166 = vector.load %arg2[%c0_69, %c0_70] : memref<8x384xf32, #tpu.memory_space<vmem>>, vector<8x384xf32>
    %167 = arith.addf %165, %166 : vector<8x384xf32>
    %168 = vector.extract_strided_slice %163 {offsets = [0, 0], sizes = [8, 128], strides = [1, 1]} : vector<8x384xf32> to vector<8x128xf32>
    %169 = vector.extract_strided_slice %167 {offsets = [0, 0], sizes = [8, 128], strides = [1, 1]} : vector<8x384xf32> to vector<8x128xf32>
    %170 = arith.addf %168, %169 : vector<8x128xf32>
    %171 = arith.negf %170 : vector<8x128xf32>
    %172 = math.exp %171 : vector<8x128xf32>
    %cst_71 = arith.constant 1.000000e+00 : f32
    %173 = vector.broadcast %cst_71 : f32 to vector<8x128xf32>
    %174 = arith.addf %173, %172 : vector<8x128xf32>
    %175 = arith.divf %173, %174 : vector<8x128xf32>
    %176 = vector.extract_strided_slice %163 {offsets = [0, 128], sizes = [8, 128], strides = [1, 1]} : vector<8x384xf32> to vector<8x128xf32>
    %177 = vector.extract_strided_slice %167 {offsets = [0, 128], sizes = [8, 128], strides = [1, 1]} : vector<8x384xf32> to vector<8x128xf32>
    %178 = arith.addf %176, %177 : vector<8x128xf32>
    %179 = arith.negf %178 : vector<8x128xf32>
    %180 = math.exp %179 : vector<8x128xf32>
    %cst_72 = arith.constant 1.000000e+00 : f32
    %181 = vector.broadcast %cst_72 : f32 to vector<8x128xf32>
    %182 = arith.addf %181, %180 : vector<8x128xf32>
    %183 = arith.divf %181, %182 : vector<8x128xf32>
    %184 = vector.extract_strided_slice %163 {offsets = [0, 256], sizes = [8, 128], strides = [1, 1]} : vector<8x384xf32> to vector<8x128xf32>
    %185 = vector.extract_strided_slice %167 {offsets = [0, 256], sizes = [8, 128], strides = [1, 1]} : vector<8x384xf32> to vector<8x128xf32>
    %186 = arith.mulf %175, %185 : vector<8x128xf32>
    %187 = arith.addf %184, %186 : vector<8x128xf32>
    %188 = math.tanh %187 : vector<8x128xf32>
    %cst_73 = arith.constant 1.000000e+00 : f32
    %189 = vector.broadcast %cst_73 : f32 to vector<8x128xf32>
    %190 = arith.subf %189, %183 : vector<8x128xf32>
    %191 = arith.mulf %190, %188 : vector<8x128xf32>
    %192 = arith.mulf %183, %141 : vector<8x128xf32>
    %193 = arith.addf %191, %192 : vector<8x128xf32>
    %c0_74 = arith.constant 0 : index
    %c0_75 = arith.constant 0 : index
    %194 = vector.load %arg3[%c0_74, %c0_75] : memref<128x128xf32, #tpu.memory_space<vmem>>, vector<128x128xf32>
    %cst_76 = arith.constant dense<0.000000e+00> : vector<8x128xf32>
    %195 = tpu.matmul %193, %194, %cst_76 {dimension_numbers = #tpu.dot_dimension_numbers<[1], [0], [0], [1], [0, 0, 1, 1], [], []>} : vector<8x128xf32>, vector<128x128xf32>, vector<8x128xf32> -> vector<8x128xf32>
    %c0_77 = arith.constant 0 : index
    %c0_78 = arith.constant 0 : index
    %196 = vector.load %arg4[%c0_77, %c0_78] : memref<8x128xf32, #tpu.memory_space<vmem>>, vector<8x128xf32>
    %197 = arith.addf %195, %196 : vector<8x128xf32>
    %198 = arith.index_cast %c3_i32 : i32 to index
    %c0_79 = arith.constant 0 : index
    %c0_80 = arith.constant 0 : index
    %199 = vector.load %arg6[%198, %c0_79, %c0_80] : memref<10x8x128xf32, #tpu.memory_space<vmem>>, vector<1x8x128xf32>
    %200 = vector.shape_cast %199 : vector<1x8x128xf32> to vector<8x128xf32>
    %201 = vector.shape_cast %197 : vector<8x128xf32> to vector<1x8x128xf32>
    tpu.vector_store %arg6[%198, %c0_79, %c0_80], %201 {strides = array<i32>} : memref<10x8x128xf32, #tpu.memory_space<vmem>>, vector<1x8x128xf32>,
    %cst_81 = arith.constant dense<0xFF800000> : vector<8xf32>
    %202 = vector.multi_reduction <maximumf>, %197, %cst_81 [1] : vector<8x128xf32> to vector<8xf32>
    %203 = vector.shape_cast %202 : vector<8xf32> to vector<8x1xf32>
    %204 = vector.broadcast %203 : vector<8x1xf32> to vector<8x128xf32>
    %205 = arith.cmpf oeq, %197, %204 : vector<8x128xf32>
    %c128_i32_82 = arith.constant 128 : i32
    %206 = vector.broadcast %c128_i32_82 : i32 to vector<8x128xi32>
    %207 = arith.select %205, %0, %206 : vector<8x128xi1>, vector<8x128xi32>
    %cst_83 = arith.constant dense<2147483647> : vector<8xi32>
    %208 = vector.multi_reduction <minsi>, %207, %cst_83 [1] : vector<8x128xi32> to vector<8xi32>
    %209 = vector.shape_cast %208 : vector<8xi32> to vector<8x1xi32>
    %210 = vector.broadcast %209 : vector<8x1xi32> to vector<8x128xi32>
    %211 = arith.cmpi eq, %0, %210 : vector<8x128xi32>
    %212 = arith.extui %211 : vector<8x128xi1> to vector<8x128xi32>
    %213 = arith.sitofp %212 : vector<8x128xi32> to vector<8x128xf32>
    %c4_i32 = arith.constant 4 : i32
    %c0_84 = arith.constant 0 : index
    %c0_85 = arith.constant 0 : index
    %214 = vector.load %arg0[%c0_84, %c0_85] : memref<128x384xf32, #tpu.memory_space<vmem>>, vector<128x384xf32>
    %cst_86 = arith.constant dense<0.000000e+00> : vector<8x384xf32>
    %215 = tpu.matmul %213, %214, %cst_86 {dimension_numbers = #tpu.dot_dimension_numbers<[1], [0], [0], [1], [0, 0, 1, 1], [], []>} : vector<8x128xf32>, vector<128x384xf32>, vector<8x384xf32> -> vector<8x384xf32>
    %c0_87 = arith.constant 0 : index
    %c0_88 = arith.constant 0 : index
    %216 = vector.load %arg1[%c0_87, %c0_88] : memref<128x384xf32, #tpu.memory_space<vmem>>, vector<128x384xf32>
    %cst_89 = arith.constant dense<0.000000e+00> : vector<8x384xf32>
    %217 = tpu.matmul %193, %216, %cst_89 {dimension_numbers = #tpu.dot_dimension_numbers<[1], [0], [0], [1], [0, 0, 1, 1], [], []>} : vector<8x128xf32>, vector<128x384xf32>, vector<8x384xf32> -> vector<8x384xf32>
    %c0_90 = arith.constant 0 : index
    %c0_91 = arith.constant 0 : index
    %218 = vector.load %arg2[%c0_90, %c0_91] : memref<8x384xf32, #tpu.memory_space<vmem>>, vector<8x384xf32>
    %219 = arith.addf %217, %218 : vector<8x384xf32>
    %220 = vector.extract_strided_slice %215 {offsets = [0, 0], sizes = [8, 128], strides = [1, 1]} : vector<8x384xf32> to vector<8x128xf32>
    %221 = vector.extract_strided_slice %219 {offsets = [0, 0], sizes = [8, 128], strides = [1, 1]} : vector<8x384xf32> to vector<8x128xf32>
    %222 = arith.addf %220, %221 : vector<8x128xf32>
    %223 = arith.negf %222 : vector<8x128xf32>
    %224 = math.exp %223 : vector<8x128xf32>
    %cst_92 = arith.constant 1.000000e+00 : f32
    %225 = vector.broadcast %cst_92 : f32 to vector<8x128xf32>
    %226 = arith.addf %225, %224 : vector<8x128xf32>
    %227 = arith.divf %225, %226 : vector<8x128xf32>
    %228 = vector.extract_strided_slice %215 {offsets = [0, 128], sizes = [8, 128], strides = [1, 1]} : vector<8x384xf32> to vector<8x128xf32>
    %229 = vector.extract_strided_slice %219 {offsets = [0, 128], sizes = [8, 128], strides = [1, 1]} : vector<8x384xf32> to vector<8x128xf32>
    %230 = arith.addf %228, %229 : vector<8x128xf32>
    %231 = arith.negf %230 : vector<8x128xf32>
    %232 = math.exp %231 : vector<8x128xf32>
    %cst_93 = arith.constant 1.000000e+00 : f32
    %233 = vector.broadcast %cst_93 : f32 to vector<8x128xf32>
    %234 = arith.addf %233, %232 : vector<8x128xf32>
    %235 = arith.divf %233, %234 : vector<8x128xf32>
    %236 = vector.extract_strided_slice %215 {offsets = [0, 256], sizes = [8, 128], strides = [1, 1]} : vector<8x384xf32> to vector<8x128xf32>
    %237 = vector.extract_strided_slice %219 {offsets = [0, 256], sizes = [8, 128], strides = [1, 1]} : vector<8x384xf32> to vector<8x128xf32>
    %238 = arith.mulf %227, %237 : vector<8x128xf32>
    %239 = arith.addf %236, %238 : vector<8x128xf32>
    %240 = math.tanh %239 : vector<8x128xf32>
    %cst_94 = arith.constant 1.000000e+00 : f32
    %241 = vector.broadcast %cst_94 : f32 to vector<8x128xf32>
    %242 = arith.subf %241, %235 : vector<8x128xf32>
    %243 = arith.mulf %242, %240 : vector<8x128xf32>
    %244 = arith.mulf %235, %193 : vector<8x128xf32>
    %245 = arith.addf %243, %244 : vector<8x128xf32>
    %c0_95 = arith.constant 0 : index
    %c0_96 = arith.constant 0 : index
    %246 = vector.load %arg3[%c0_95, %c0_96] : memref<128x128xf32, #tpu.memory_space<vmem>>, vector<128x128xf32>
    %cst_97 = arith.constant dense<0.000000e+00> : vector<8x128xf32>
    %247 = tpu.matmul %245, %246, %cst_97 {dimension_numbers = #tpu.dot_dimension_numbers<[1], [0], [0], [1], [0, 0, 1, 1], [], []>} : vector<8x128xf32>, vector<128x128xf32>, vector<8x128xf32> -> vector<8x128xf32>
    %c0_98 = arith.constant 0 : index
    %c0_99 = arith.constant 0 : index
    %248 = vector.load %arg4[%c0_98, %c0_99] : memref<8x128xf32, #tpu.memory_space<vmem>>, vector<8x128xf32>
    %249 = arith.addf %247, %248 : vector<8x128xf32>
    %250 = arith.index_cast %c4_i32 : i32 to index
    %c0_100 = arith.constant 0 : index
    %c0_101 = arith.constant 0 : index
    %251 = vector.load %arg6[%250, %c0_100, %c0_101] : memref<10x8x128xf32, #tpu.memory_space<vmem>>, vector<1x8x128xf32>
    %252 = vector.shape_cast %251 : vector<1x8x128xf32> to vector<8x128xf32>
    %253 = vector.shape_cast %249 : vector<8x128xf32> to vector<1x8x128xf32>
    tpu.vector_store %arg6[%250, %c0_100, %c0_101], %253 {strides = array<i32>} : memref<10x8x128xf32, #tpu.memory_space<vmem>>, vector<1x8x128xf32>,
    %cst_102 = arith.constant dense<0xFF800000> : vector<8xf32>
    %254 = vector.multi_reduction <maximumf>, %249, %cst_102 [1] : vector<8x128xf32> to vector<8xf32>
    %255 = vector.shape_cast %254 : vector<8xf32> to vector<8x1xf32>
    %256 = vector.broadcast %255 : vector<8x1xf32> to vector<8x128xf32>
    %257 = arith.cmpf oeq, %249, %256 : vector<8x128xf32>
    %c128_i32_103 = arith.constant 128 : i32
    %258 = vector.broadcast %c128_i32_103 : i32 to vector<8x128xi32>
    %259 = arith.select %257, %0, %258 : vector<8x128xi1>, vector<8x128xi32>
    %cst_104 = arith.constant dense<2147483647> : vector<8xi32>
    %260 = vector.multi_reduction <minsi>, %259, %cst_104 [1] : vector<8x128xi32> to vector<8xi32>
    %261 = vector.shape_cast %260 : vector<8xi32> to vector<8x1xi32>
    %262 = vector.broadcast %261 : vector<8x1xi32> to vector<8x128xi32>
    %263 = arith.cmpi eq, %0, %262 : vector<8x128xi32>
    %264 = arith.extui %263 : vector<8x128xi1> to vector<8x128xi32>
    %265 = arith.sitofp %264 : vector<8x128xi32> to vector<8x128xf32>
    %c5_i32 = arith.constant 5 : i32
    %c0_105 = arith.constant 0 : index
    %c0_106 = arith.constant 0 : index
    %266 = vector.load %arg0[%c0_105, %c0_106] : memref<128x384xf32, #tpu.memory_space<vmem>>, vector<128x384xf32>
    %cst_107 = arith.constant dense<0.000000e+00> : vector<8x384xf32>
    %267 = tpu.matmul %265, %266, %cst_107 {dimension_numbers = #tpu.dot_dimension_numbers<[1], [0], [0], [1], [0, 0, 1, 1], [], []>} : vector<8x128xf32>, vector<128x384xf32>, vector<8x384xf32> -> vector<8x384xf32>
    %c0_108 = arith.constant 0 : index
    %c0_109 = arith.constant 0 : index
    %268 = vector.load %arg1[%c0_108, %c0_109] : memref<128x384xf32, #tpu.memory_space<vmem>>, vector<128x384xf32>
    %cst_110 = arith.constant dense<0.000000e+00> : vector<8x384xf32>
    %269 = tpu.matmul %245, %268, %cst_110 {dimension_numbers = #tpu.dot_dimension_numbers<[1], [0], [0], [1], [0, 0, 1, 1], [], []>} : vector<8x128xf32>, vector<128x384xf32>, vector<8x384xf32> -> vector<8x384xf32>
    %c0_111 = arith.constant 0 : index
    %c0_112 = arith.constant 0 : index
    %270 = vector.load %arg2[%c0_111, %c0_112] : memref<8x384xf32, #tpu.memory_space<vmem>>, vector<8x384xf32>
    %271 = arith.addf %269, %270 : vector<8x384xf32>
    %272 = vector.extract_strided_slice %267 {offsets = [0, 0], sizes = [8, 128], strides = [1, 1]} : vector<8x384xf32> to vector<8x128xf32>
    %273 = vector.extract_strided_slice %271 {offsets = [0, 0], sizes = [8, 128], strides = [1, 1]} : vector<8x384xf32> to vector<8x128xf32>
    %274 = arith.addf %272, %273 : vector<8x128xf32>
    %275 = arith.negf %274 : vector<8x128xf32>
    %276 = math.exp %275 : vector<8x128xf32>
    %cst_113 = arith.constant 1.000000e+00 : f32
    %277 = vector.broadcast %cst_113 : f32 to vector<8x128xf32>
    %278 = arith.addf %277, %276 : vector<8x128xf32>
    %279 = arith.divf %277, %278 : vector<8x128xf32>
    %280 = vector.extract_strided_slice %267 {offsets = [0, 128], sizes = [8, 128], strides = [1, 1]} : vector<8x384xf32> to vector<8x128xf32>
    %281 = vector.extract_strided_slice %271 {offsets = [0, 128], sizes = [8, 128], strides = [1, 1]} : vector<8x384xf32> to vector<8x128xf32>
    %282 = arith.addf %280, %281 : vector<8x128xf32>
    %283 = arith.negf %282 : vector<8x128xf32>
    %284 = math.exp %283 : vector<8x128xf32>
    %cst_114 = arith.constant 1.000000e+00 : f32
    %285 = vector.broadcast %cst_114 : f32 to vector<8x128xf32>
    %286 = arith.addf %285, %284 : vector<8x128xf32>
    %287 = arith.divf %285, %286 : vector<8x128xf32>
    %288 = vector.extract_strided_slice %267 {offsets = [0, 256], sizes = [8, 128], strides = [1, 1]} : vector<8x384xf32> to vector<8x128xf32>
    %289 = vector.extract_strided_slice %271 {offsets = [0, 256], sizes = [8, 128], strides = [1, 1]} : vector<8x384xf32> to vector<8x128xf32>
    %290 = arith.mulf %279, %289 : vector<8x128xf32>
    %291 = arith.addf %288, %290 : vector<8x128xf32>
    %292 = math.tanh %291 : vector<8x128xf32>
    %cst_115 = arith.constant 1.000000e+00 : f32
    %293 = vector.broadcast %cst_115 : f32 to vector<8x128xf32>
    %294 = arith.subf %293, %287 : vector<8x128xf32>
    %295 = arith.mulf %294, %292 : vector<8x128xf32>
    %296 = arith.mulf %287, %245 : vector<8x128xf32>
    %297 = arith.addf %295, %296 : vector<8x128xf32>
    %c0_116 = arith.constant 0 : index
    %c0_117 = arith.constant 0 : index
    %298 = vector.load %arg3[%c0_116, %c0_117] : memref<128x128xf32, #tpu.memory_space<vmem>>, vector<128x128xf32>
    %cst_118 = arith.constant dense<0.000000e+00> : vector<8x128xf32>
    %299 = tpu.matmul %297, %298, %cst_118 {dimension_numbers = #tpu.dot_dimension_numbers<[1], [0], [0], [1], [0, 0, 1, 1], [], []>} : vector<8x128xf32>, vector<128x128xf32>, vector<8x128xf32> -> vector<8x128xf32>
    %c0_119 = arith.constant 0 : index
    %c0_120 = arith.constant 0 : index
    %300 = vector.load %arg4[%c0_119, %c0_120] : memref<8x128xf32, #tpu.memory_space<vmem>>, vector<8x128xf32>
    %301 = arith.addf %299, %300 : vector<8x128xf32>
    %302 = arith.index_cast %c5_i32 : i32 to index
    %c0_121 = arith.constant 0 : index
    %c0_122 = arith.constant 0 : index
    %303 = vector.load %arg6[%302, %c0_121, %c0_122] : memref<10x8x128xf32, #tpu.memory_space<vmem>>, vector<1x8x128xf32>
    %304 = vector.shape_cast %303 : vector<1x8x128xf32> to vector<8x128xf32>
    %305 = vector.shape_cast %301 : vector<8x128xf32> to vector<1x8x128xf32>
    tpu.vector_store %arg6[%302, %c0_121, %c0_122], %305 {strides = array<i32>} : memref<10x8x128xf32, #tpu.memory_space<vmem>>, vector<1x8x128xf32>,
    %cst_123 = arith.constant dense<0xFF800000> : vector<8xf32>
    %306 = vector.multi_reduction <maximumf>, %301, %cst_123 [1] : vector<8x128xf32> to vector<8xf32>
    %307 = vector.shape_cast %306 : vector<8xf32> to vector<8x1xf32>
    %308 = vector.broadcast %307 : vector<8x1xf32> to vector<8x128xf32>
    %309 = arith.cmpf oeq, %301, %308 : vector<8x128xf32>
    %c128_i32_124 = arith.constant 128 : i32
    %310 = vector.broadcast %c128_i32_124 : i32 to vector<8x128xi32>
    %311 = arith.select %309, %0, %310 : vector<8x128xi1>, vector<8x128xi32>
    %cst_125 = arith.constant dense<2147483647> : vector<8xi32>
    %312 = vector.multi_reduction <minsi>, %311, %cst_125 [1] : vector<8x128xi32> to vector<8xi32>
    %313 = vector.shape_cast %312 : vector<8xi32> to vector<8x1xi32>
    %314 = vector.broadcast %313 : vector<8x1xi32> to vector<8x128xi32>
    %315 = arith.cmpi eq, %0, %314 : vector<8x128xi32>
    %316 = arith.extui %315 : vector<8x128xi1> to vector<8x128xi32>
    %317 = arith.sitofp %316 : vector<8x128xi32> to vector<8x128xf32>
    %c6_i32 = arith.constant 6 : i32
    %c0_126 = arith.constant 0 : index
    %c0_127 = arith.constant 0 : index
    %318 = vector.load %arg0[%c0_126, %c0_127] : memref<128x384xf32, #tpu.memory_space<vmem>>, vector<128x384xf32>
    %cst_128 = arith.constant dense<0.000000e+00> : vector<8x384xf32>
    %319 = tpu.matmul %317, %318, %cst_128 {dimension_numbers = #tpu.dot_dimension_numbers<[1], [0], [0], [1], [0, 0, 1, 1], [], []>} : vector<8x128xf32>, vector<128x384xf32>, vector<8x384xf32> -> vector<8x384xf32>
    %c0_129 = arith.constant 0 : index
    %c0_130 = arith.constant 0 : index
    %320 = vector.load %arg1[%c0_129, %c0_130] : memref<128x384xf32, #tpu.memory_space<vmem>>, vector<128x384xf32>
    %cst_131 = arith.constant dense<0.000000e+00> : vector<8x384xf32>
    %321 = tpu.matmul %297, %320, %cst_131 {dimension_numbers = #tpu.dot_dimension_numbers<[1], [0], [0], [1], [0, 0, 1, 1], [], []>} : vector<8x128xf32>, vector<128x384xf32>, vector<8x384xf32> -> vector<8x384xf32>
    %c0_132 = arith.constant 0 : index
    %c0_133 = arith.constant 0 : index
    %322 = vector.load %arg2[%c0_132, %c0_133] : memref<8x384xf32, #tpu.memory_space<vmem>>, vector<8x384xf32>
    %323 = arith.addf %321, %322 : vector<8x384xf32>
    %324 = vector.extract_strided_slice %319 {offsets = [0, 0], sizes = [8, 128], strides = [1, 1]} : vector<8x384xf32> to vector<8x128xf32>
    %325 = vector.extract_strided_slice %323 {offsets = [0, 0], sizes = [8, 128], strides = [1, 1]} : vector<8x384xf32> to vector<8x128xf32>
    %326 = arith.addf %324, %325 : vector<8x128xf32>
    %327 = arith.negf %326 : vector<8x128xf32>
    %328 = math.exp %327 : vector<8x128xf32>
    %cst_134 = arith.constant 1.000000e+00 : f32
    %329 = vector.broadcast %cst_134 : f32 to vector<8x128xf32>
    %330 = arith.addf %329, %328 : vector<8x128xf32>
    %331 = arith.divf %329, %330 : vector<8x128xf32>
    %332 = vector.extract_strided_slice %319 {offsets = [0, 128], sizes = [8, 128], strides = [1, 1]} : vector<8x384xf32> to vector<8x128xf32>
    %333 = vector.extract_strided_slice %323 {offsets = [0, 128], sizes = [8, 128], strides = [1, 1]} : vector<8x384xf32> to vector<8x128xf32>
    %334 = arith.addf %332, %333 : vector<8x128xf32>
    %335 = arith.negf %334 : vector<8x128xf32>
    %336 = math.exp %335 : vector<8x128xf32>
    %cst_135 = arith.constant 1.000000e+00 : f32
    %337 = vector.broadcast %cst_135 : f32 to vector<8x128xf32>
    %338 = arith.addf %337, %336 : vector<8x128xf32>
    %339 = arith.divf %337, %338 : vector<8x128xf32>
    %340 = vector.extract_strided_slice %319 {offsets = [0, 256], sizes = [8, 128], strides = [1, 1]} : vector<8x384xf32> to vector<8x128xf32>
    %341 = vector.extract_strided_slice %323 {offsets = [0, 256], sizes = [8, 128], strides = [1, 1]} : vector<8x384xf32> to vector<8x128xf32>
    %342 = arith.mulf %331, %341 : vector<8x128xf32>
    %343 = arith.addf %340, %342 : vector<8x128xf32>
    %344 = math.tanh %343 : vector<8x128xf32>
    %cst_136 = arith.constant 1.000000e+00 : f32
    %345 = vector.broadcast %cst_136 : f32 to vector<8x128xf32>
    %346 = arith.subf %345, %339 : vector<8x128xf32>
    %347 = arith.mulf %346, %344 : vector<8x128xf32>
    %348 = arith.mulf %339, %297 : vector<8x128xf32>
    %349 = arith.addf %347, %348 : vector<8x128xf32>
    %c0_137 = arith.constant 0 : index
    %c0_138 = arith.constant 0 : index
    %350 = vector.load %arg3[%c0_137, %c0_138] : memref<128x128xf32, #tpu.memory_space<vmem>>, vector<128x128xf32>
    %cst_139 = arith.constant dense<0.000000e+00> : vector<8x128xf32>
    %351 = tpu.matmul %349, %350, %cst_139 {dimension_numbers = #tpu.dot_dimension_numbers<[1], [0], [0], [1], [0, 0, 1, 1], [], []>} : vector<8x128xf32>, vector<128x128xf32>, vector<8x128xf32> -> vector<8x128xf32>
    %c0_140 = arith.constant 0 : index
    %c0_141 = arith.constant 0 : index
    %352 = vector.load %arg4[%c0_140, %c0_141] : memref<8x128xf32, #tpu.memory_space<vmem>>, vector<8x128xf32>
    %353 = arith.addf %351, %352 : vector<8x128xf32>
    %354 = arith.index_cast %c6_i32 : i32 to index
    %c0_142 = arith.constant 0 : index
    %c0_143 = arith.constant 0 : index
    %355 = vector.load %arg6[%354, %c0_142, %c0_143] : memref<10x8x128xf32, #tpu.memory_space<vmem>>, vector<1x8x128xf32>
    %356 = vector.shape_cast %355 : vector<1x8x128xf32> to vector<8x128xf32>
    %357 = vector.shape_cast %353 : vector<8x128xf32> to vector<1x8x128xf32>
    tpu.vector_store %arg6[%354, %c0_142, %c0_143], %357 {strides = array<i32>} : memref<10x8x128xf32, #tpu.memory_space<vmem>>, vector<1x8x128xf32>,
    %cst_144 = arith.constant dense<0xFF800000> : vector<8xf32>
    %358 = vector.multi_reduction <maximumf>, %353, %cst_144 [1] : vector<8x128xf32> to vector<8xf32>
    %359 = vector.shape_cast %358 : vector<8xf32> to vector<8x1xf32>
    %360 = vector.broadcast %359 : vector<8x1xf32> to vector<8x128xf32>
    %361 = arith.cmpf oeq, %353, %360 : vector<8x128xf32>
    %c128_i32_145 = arith.constant 128 : i32
    %362 = vector.broadcast %c128_i32_145 : i32 to vector<8x128xi32>
    %363 = arith.select %361, %0, %362 : vector<8x128xi1>, vector<8x128xi32>
    %cst_146 = arith.constant dense<2147483647> : vector<8xi32>
    %364 = vector.multi_reduction <minsi>, %363, %cst_146 [1] : vector<8x128xi32> to vector<8xi32>
    %365 = vector.shape_cast %364 : vector<8xi32> to vector<8x1xi32>
    %366 = vector.broadcast %365 : vector<8x1xi32> to vector<8x128xi32>
    %367 = arith.cmpi eq, %0, %366 : vector<8x128xi32>
    %368 = arith.extui %367 : vector<8x128xi1> to vector<8x128xi32>
    %369 = arith.sitofp %368 : vector<8x128xi32> to vector<8x128xf32>
    %c7_i32 = arith.constant 7 : i32
    %c0_147 = arith.constant 0 : index
    %c0_148 = arith.constant 0 : index
    %370 = vector.load %arg0[%c0_147, %c0_148] : memref<128x384xf32, #tpu.memory_space<vmem>>, vector<128x384xf32>
    %cst_149 = arith.constant dense<0.000000e+00> : vector<8x384xf32>
    %371 = tpu.matmul %369, %370, %cst_149 {dimension_numbers = #tpu.dot_dimension_numbers<[1], [0], [0], [1], [0, 0, 1, 1], [], []>} : vector<8x128xf32>, vector<128x384xf32>, vector<8x384xf32> -> vector<8x384xf32>
    %c0_150 = arith.constant 0 : index
    %c0_151 = arith.constant 0 : index
    %372 = vector.load %arg1[%c0_150, %c0_151] : memref<128x384xf32, #tpu.memory_space<vmem>>, vector<128x384xf32>
    %cst_152 = arith.constant dense<0.000000e+00> : vector<8x384xf32>
    %373 = tpu.matmul %349, %372, %cst_152 {dimension_numbers = #tpu.dot_dimension_numbers<[1], [0], [0], [1], [0, 0, 1, 1], [], []>} : vector<8x128xf32>, vector<128x384xf32>, vector<8x384xf32> -> vector<8x384xf32>
    %c0_153 = arith.constant 0 : index
    %c0_154 = arith.constant 0 : index
    %374 = vector.load %arg2[%c0_153, %c0_154] : memref<8x384xf32, #tpu.memory_space<vmem>>, vector<8x384xf32>
    %375 = arith.addf %373, %374 : vector<8x384xf32>
    %376 = vector.extract_strided_slice %371 {offsets = [0, 0], sizes = [8, 128], strides = [1, 1]} : vector<8x384xf32> to vector<8x128xf32>
    %377 = vector.extract_strided_slice %375 {offsets = [0, 0], sizes = [8, 128], strides = [1, 1]} : vector<8x384xf32> to vector<8x128xf32>
    %378 = arith.addf %376, %377 : vector<8x128xf32>
    %379 = arith.negf %378 : vector<8x128xf32>
    %380 = math.exp %379 : vector<8x128xf32>
    %cst_155 = arith.constant 1.000000e+00 : f32
    %381 = vector.broadcast %cst_155 : f32 to vector<8x128xf32>
    %382 = arith.addf %381, %380 : vector<8x128xf32>
    %383 = arith.divf %381, %382 : vector<8x128xf32>
    %384 = vector.extract_strided_slice %371 {offsets = [0, 128], sizes = [8, 128], strides = [1, 1]} : vector<8x384xf32> to vector<8x128xf32>
    %385 = vector.extract_strided_slice %375 {offsets = [0, 128], sizes = [8, 128], strides = [1, 1]} : vector<8x384xf32> to vector<8x128xf32>
    %386 = arith.addf %384, %385 : vector<8x128xf32>
    %387 = arith.negf %386 : vector<8x128xf32>
    %388 = math.exp %387 : vector<8x128xf32>
    %cst_156 = arith.constant 1.000000e+00 : f32
    %389 = vector.broadcast %cst_156 : f32 to vector<8x128xf32>
    %390 = arith.addf %389, %388 : vector<8x128xf32>
    %391 = arith.divf %389, %390 : vector<8x128xf32>
    %392 = vector.extract_strided_slice %371 {offsets = [0, 256], sizes = [8, 128], strides = [1, 1]} : vector<8x384xf32> to vector<8x128xf32>
    %393 = vector.extract_strided_slice %375 {offsets = [0, 256], sizes = [8, 128], strides = [1, 1]} : vector<8x384xf32> to vector<8x128xf32>
    %394 = arith.mulf %383, %393 : vector<8x128xf32>
    %395 = arith.addf %392, %394 : vector<8x128xf32>
    %396 = math.tanh %395 : vector<8x128xf32>
    %cst_157 = arith.constant 1.000000e+00 : f32
    %397 = vector.broadcast %cst_157 : f32 to vector<8x128xf32>
    %398 = arith.subf %397, %391 : vector<8x128xf32>
    %399 = arith.mulf %398, %396 : vector<8x128xf32>
    %400 = arith.mulf %391, %349 : vector<8x128xf32>
    %401 = arith.addf %399, %400 : vector<8x128xf32>
    %c0_158 = arith.constant 0 : index
    %c0_159 = arith.constant 0 : index
    %402 = vector.load %arg3[%c0_158, %c0_159] : memref<128x128xf32, #tpu.memory_space<vmem>>, vector<128x128xf32>
    %cst_160 = arith.constant dense<0.000000e+00> : vector<8x128xf32>
    %403 = tpu.matmul %401, %402, %cst_160 {dimension_numbers = #tpu.dot_dimension_numbers<[1], [0], [0], [1], [0, 0, 1, 1], [], []>} : vector<8x128xf32>, vector<128x128xf32>, vector<8x128xf32> -> vector<8x128xf32>
    %c0_161 = arith.constant 0 : index
    %c0_162 = arith.constant 0 : index
    %404 = vector.load %arg4[%c0_161, %c0_162] : memref<8x128xf32, #tpu.memory_space<vmem>>, vector<8x128xf32>
    %405 = arith.addf %403, %404 : vector<8x128xf32>
    %406 = arith.index_cast %c7_i32 : i32 to index
    %c0_163 = arith.constant 0 : index
    %c0_164 = arith.constant 0 : index
    %407 = vector.load %arg6[%406, %c0_163, %c0_164] : memref<10x8x128xf32, #tpu.memory_space<vmem>>, vector<1x8x128xf32>
    %408 = vector.shape_cast %407 : vector<1x8x128xf32> to vector<8x128xf32>
    %409 = vector.shape_cast %405 : vector<8x128xf32> to vector<1x8x128xf32>
    tpu.vector_store %arg6[%406, %c0_163, %c0_164], %409 {strides = array<i32>} : memref<10x8x128xf32, #tpu.memory_space<vmem>>, vector<1x8x128xf32>,
    %cst_165 = arith.constant dense<0xFF800000> : vector<8xf32>
    %410 = vector.multi_reduction <maximumf>, %405, %cst_165 [1] : vector<8x128xf32> to vector<8xf32>
    %411 = vector.shape_cast %410 : vector<8xf32> to vector<8x1xf32>
    %412 = vector.broadcast %411 : vector<8x1xf32> to vector<8x128xf32>
    %413 = arith.cmpf oeq, %405, %412 : vector<8x128xf32>
    %c128_i32_166 = arith.constant 128 : i32
    %414 = vector.broadcast %c128_i32_166 : i32 to vector<8x128xi32>
    %415 = arith.select %413, %0, %414 : vector<8x128xi1>, vector<8x128xi32>
    %cst_167 = arith.constant dense<2147483647> : vector<8xi32>
    %416 = vector.multi_reduction <minsi>, %415, %cst_167 [1] : vector<8x128xi32> to vector<8xi32>
    %417 = vector.shape_cast %416 : vector<8xi32> to vector<8x1xi32>
    %418 = vector.broadcast %417 : vector<8x1xi32> to vector<8x128xi32>
    %419 = arith.cmpi eq, %0, %418 : vector<8x128xi32>
    %420 = arith.extui %419 : vector<8x128xi1> to vector<8x128xi32>
    %421 = arith.sitofp %420 : vector<8x128xi32> to vector<8x128xf32>
    %c8_i32 = arith.constant 8 : i32
    %c0_168 = arith.constant 0 : index
    %c0_169 = arith.constant 0 : index
    %422 = vector.load %arg0[%c0_168, %c0_169] : memref<128x384xf32, #tpu.memory_space<vmem>>, vector<128x384xf32>
    %cst_170 = arith.constant dense<0.000000e+00> : vector<8x384xf32>
    %423 = tpu.matmul %421, %422, %cst_170 {dimension_numbers = #tpu.dot_dimension_numbers<[1], [0], [0], [1], [0, 0, 1, 1], [], []>} : vector<8x128xf32>, vector<128x384xf32>, vector<8x384xf32> -> vector<8x384xf32>
    %c0_171 = arith.constant 0 : index
    %c0_172 = arith.constant 0 : index
    %424 = vector.load %arg1[%c0_171, %c0_172] : memref<128x384xf32, #tpu.memory_space<vmem>>, vector<128x384xf32>
    %cst_173 = arith.constant dense<0.000000e+00> : vector<8x384xf32>
    %425 = tpu.matmul %401, %424, %cst_173 {dimension_numbers = #tpu.dot_dimension_numbers<[1], [0], [0], [1], [0, 0, 1, 1], [], []>} : vector<8x128xf32>, vector<128x384xf32>, vector<8x384xf32> -> vector<8x384xf32>
    %c0_174 = arith.constant 0 : index
    %c0_175 = arith.constant 0 : index
    %426 = vector.load %arg2[%c0_174, %c0_175] : memref<8x384xf32, #tpu.memory_space<vmem>>, vector<8x384xf32>
    %427 = arith.addf %425, %426 : vector<8x384xf32>
    %428 = vector.extract_strided_slice %423 {offsets = [0, 0], sizes = [8, 128], strides = [1, 1]} : vector<8x384xf32> to vector<8x128xf32>
    %429 = vector.extract_strided_slice %427 {offsets = [0, 0], sizes = [8, 128], strides = [1, 1]} : vector<8x384xf32> to vector<8x128xf32>
    %430 = arith.addf %428, %429 : vector<8x128xf32>
    %431 = arith.negf %430 : vector<8x128xf32>
    %432 = math.exp %431 : vector<8x128xf32>
    %cst_176 = arith.constant 1.000000e+00 : f32
    %433 = vector.broadcast %cst_176 : f32 to vector<8x128xf32>
    %434 = arith.addf %433, %432 : vector<8x128xf32>
    %435 = arith.divf %433, %434 : vector<8x128xf32>
    %436 = vector.extract_strided_slice %423 {offsets = [0, 128], sizes = [8, 128], strides = [1, 1]} : vector<8x384xf32> to vector<8x128xf32>
    %437 = vector.extract_strided_slice %427 {offsets = [0, 128], sizes = [8, 128], strides = [1, 1]} : vector<8x384xf32> to vector<8x128xf32>
    %438 = arith.addf %436, %437 : vector<8x128xf32>
    %439 = arith.negf %438 : vector<8x128xf32>
    %440 = math.exp %439 : vector<8x128xf32>
    %cst_177 = arith.constant 1.000000e+00 : f32
    %441 = vector.broadcast %cst_177 : f32 to vector<8x128xf32>
    %442 = arith.addf %441, %440 : vector<8x128xf32>
    %443 = arith.divf %441, %442 : vector<8x128xf32>
    %444 = vector.extract_strided_slice %423 {offsets = [0, 256], sizes = [8, 128], strides = [1, 1]} : vector<8x384xf32> to vector<8x128xf32>
    %445 = vector.extract_strided_slice %427 {offsets = [0, 256], sizes = [8, 128], strides = [1, 1]} : vector<8x384xf32> to vector<8x128xf32>
    %446 = arith.mulf %435, %445 : vector<8x128xf32>
    %447 = arith.addf %444, %446 : vector<8x128xf32>
    %448 = math.tanh %447 : vector<8x128xf32>
    %cst_178 = arith.constant 1.000000e+00 : f32
    %449 = vector.broadcast %cst_178 : f32 to vector<8x128xf32>
    %450 = arith.subf %449, %443 : vector<8x128xf32>
    %451 = arith.mulf %450, %448 : vector<8x128xf32>
    %452 = arith.mulf %443, %401 : vector<8x128xf32>
    %453 = arith.addf %451, %452 : vector<8x128xf32>
    %c0_179 = arith.constant 0 : index
    %c0_180 = arith.constant 0 : index
    %454 = vector.load %arg3[%c0_179, %c0_180] : memref<128x128xf32, #tpu.memory_space<vmem>>, vector<128x128xf32>
    %cst_181 = arith.constant dense<0.000000e+00> : vector<8x128xf32>
    %455 = tpu.matmul %453, %454, %cst_181 {dimension_numbers = #tpu.dot_dimension_numbers<[1], [0], [0], [1], [0, 0, 1, 1], [], []>} : vector<8x128xf32>, vector<128x128xf32>, vector<8x128xf32> -> vector<8x128xf32>
    %c0_182 = arith.constant 0 : index
    %c0_183 = arith.constant 0 : index
    %456 = vector.load %arg4[%c0_182, %c0_183] : memref<8x128xf32, #tpu.memory_space<vmem>>, vector<8x128xf32>
    %457 = arith.addf %455, %456 : vector<8x128xf32>
    %458 = arith.index_cast %c8_i32 : i32 to index
    %c0_184 = arith.constant 0 : index
    %c0_185 = arith.constant 0 : index
    %459 = vector.load %arg6[%458, %c0_184, %c0_185] : memref<10x8x128xf32, #tpu.memory_space<vmem>>, vector<1x8x128xf32>
    %460 = vector.shape_cast %459 : vector<1x8x128xf32> to vector<8x128xf32>
    %461 = vector.shape_cast %457 : vector<8x128xf32> to vector<1x8x128xf32>
    tpu.vector_store %arg6[%458, %c0_184, %c0_185], %461 {strides = array<i32>} : memref<10x8x128xf32, #tpu.memory_space<vmem>>, vector<1x8x128xf32>,
    %cst_186 = arith.constant dense<0xFF800000> : vector<8xf32>
    %462 = vector.multi_reduction <maximumf>, %457, %cst_186 [1] : vector<8x128xf32> to vector<8xf32>
    %463 = vector.shape_cast %462 : vector<8xf32> to vector<8x1xf32>
    %464 = vector.broadcast %463 : vector<8x1xf32> to vector<8x128xf32>
    %465 = arith.cmpf oeq, %457, %464 : vector<8x128xf32>
    %c128_i32_187 = arith.constant 128 : i32
    %466 = vector.broadcast %c128_i32_187 : i32 to vector<8x128xi32>
    %467 = arith.select %465, %0, %466 : vector<8x128xi1>, vector<8x128xi32>
    %cst_188 = arith.constant dense<2147483647> : vector<8xi32>
    %468 = vector.multi_reduction <minsi>, %467, %cst_188 [1] : vector<8x128xi32> to vector<8xi32>
    %469 = vector.shape_cast %468 : vector<8xi32> to vector<8x1xi32>
    %470 = vector.broadcast %469 : vector<8x1xi32> to vector<8x128xi32>
    %471 = arith.cmpi eq, %0, %470 : vector<8x128xi32>
    %472 = arith.extui %471 : vector<8x128xi1> to vector<8x128xi32>
    %473 = arith.sitofp %472 : vector<8x128xi32> to vector<8x128xf32>
    %c9_i32 = arith.constant 9 : i32
    %c0_189 = arith.constant 0 : index
    %c0_190 = arith.constant 0 : index
    %474 = vector.load %arg0[%c0_189, %c0_190] : memref<128x384xf32, #tpu.memory_space<vmem>>, vector<128x384xf32>
    %cst_191 = arith.constant dense<0.000000e+00> : vector<8x384xf32>
    %475 = tpu.matmul %473, %474, %cst_191 {dimension_numbers = #tpu.dot_dimension_numbers<[1], [0], [0], [1], [0, 0, 1, 1], [], []>} : vector<8x128xf32>, vector<128x384xf32>, vector<8x384xf32> -> vector<8x384xf32>
    %c0_192 = arith.constant 0 : index
    %c0_193 = arith.constant 0 : index
    %476 = vector.load %arg1[%c0_192, %c0_193] : memref<128x384xf32, #tpu.memory_space<vmem>>, vector<128x384xf32>
    %cst_194 = arith.constant dense<0.000000e+00> : vector<8x384xf32>
    %477 = tpu.matmul %453, %476, %cst_194 {dimension_numbers = #tpu.dot_dimension_numbers<[1], [0], [0], [1], [0, 0, 1, 1], [], []>} : vector<8x128xf32>, vector<128x384xf32>, vector<8x384xf32> -> vector<8x384xf32>
    %c0_195 = arith.constant 0 : index
    %c0_196 = arith.constant 0 : index
    %478 = vector.load %arg2[%c0_195, %c0_196] : memref<8x384xf32, #tpu.memory_space<vmem>>, vector<8x384xf32>
    %479 = arith.addf %477, %478 : vector<8x384xf32>
    %480 = vector.extract_strided_slice %475 {offsets = [0, 0], sizes = [8, 128], strides = [1, 1]} : vector<8x384xf32> to vector<8x128xf32>
    %481 = vector.extract_strided_slice %479 {offsets = [0, 0], sizes = [8, 128], strides = [1, 1]} : vector<8x384xf32> to vector<8x128xf32>
    %482 = arith.addf %480, %481 : vector<8x128xf32>
    %483 = arith.negf %482 : vector<8x128xf32>
    %484 = math.exp %483 : vector<8x128xf32>
    %cst_197 = arith.constant 1.000000e+00 : f32
    %485 = vector.broadcast %cst_197 : f32 to vector<8x128xf32>
    %486 = arith.addf %485, %484 : vector<8x128xf32>
    %487 = arith.divf %485, %486 : vector<8x128xf32>
    %488 = vector.extract_strided_slice %475 {offsets = [0, 128], sizes = [8, 128], strides = [1, 1]} : vector<8x384xf32> to vector<8x128xf32>
    %489 = vector.extract_strided_slice %479 {offsets = [0, 128], sizes = [8, 128], strides = [1, 1]} : vector<8x384xf32> to vector<8x128xf32>
    %490 = arith.addf %488, %489 : vector<8x128xf32>
    %491 = arith.negf %490 : vector<8x128xf32>
    %492 = math.exp %491 : vector<8x128xf32>
    %cst_198 = arith.constant 1.000000e+00 : f32
    %493 = vector.broadcast %cst_198 : f32 to vector<8x128xf32>
    %494 = arith.addf %493, %492 : vector<8x128xf32>
    %495 = arith.divf %493, %494 : vector<8x128xf32>
    %496 = vector.extract_strided_slice %475 {offsets = [0, 256], sizes = [8, 128], strides = [1, 1]} : vector<8x384xf32> to vector<8x128xf32>
    %497 = vector.extract_strided_slice %479 {offsets = [0, 256], sizes = [8, 128], strides = [1, 1]} : vector<8x384xf32> to vector<8x128xf32>
    %498 = arith.mulf %487, %497 : vector<8x128xf32>
    %499 = arith.addf %496, %498 : vector<8x128xf32>
    %500 = math.tanh %499 : vector<8x128xf32>
    %cst_199 = arith.constant 1.000000e+00 : f32
    %501 = vector.broadcast %cst_199 : f32 to vector<8x128xf32>
    %502 = arith.subf %501, %495 : vector<8x128xf32>
    %503 = arith.mulf %502, %500 : vector<8x128xf32>
    %504 = arith.mulf %495, %453 : vector<8x128xf32>
    %505 = arith.addf %503, %504 : vector<8x128xf32>
    %c0_200 = arith.constant 0 : index
    %c0_201 = arith.constant 0 : index
    %506 = vector.load %arg3[%c0_200, %c0_201] : memref<128x128xf32, #tpu.memory_space<vmem>>, vector<128x128xf32>
    %cst_202 = arith.constant dense<0.000000e+00> : vector<8x128xf32>
    %507 = tpu.matmul %505, %506, %cst_202 {dimension_numbers = #tpu.dot_dimension_numbers<[1], [0], [0], [1], [0, 0, 1, 1], [], []>} : vector<8x128xf32>, vector<128x128xf32>, vector<8x128xf32> -> vector<8x128xf32>
    %c0_203 = arith.constant 0 : index
    %c0_204 = arith.constant 0 : index
    %508 = vector.load %arg4[%c0_203, %c0_204] : memref<8x128xf32, #tpu.memory_space<vmem>>, vector<8x128xf32>
    %509 = arith.addf %507, %508 : vector<8x128xf32>
    %510 = arith.index_cast %c9_i32 : i32 to index
    %c0_205 = arith.constant 0 : index
    %c0_206 = arith.constant 0 : index
    %511 = vector.load %arg6[%510, %c0_205, %c0_206] : memref<10x8x128xf32, #tpu.memory_space<vmem>>, vector<1x8x128xf32>
    %512 = vector.shape_cast %511 : vector<1x8x128xf32> to vector<8x128xf32>
    %513 = vector.shape_cast %509 : vector<8x128xf32> to vector<1x8x128xf32>
    tpu.vector_store %arg6[%510, %c0_205, %c0_206], %513 {strides = array<i32>} : memref<10x8x128xf32, #tpu.memory_space<vmem>>, vector<1x8x128xf32>,
    %cst_207 = arith.constant dense<0xFF800000> : vector<8xf32>
    %514 = vector.multi_reduction <maximumf>, %509, %cst_207 [1] : vector<8x128xf32> to vector<8xf32>
    %515 = vector.shape_cast %514 : vector<8xf32> to vector<8x1xf32>
    %516 = vector.broadcast %515 : vector<8x1xf32> to vector<8x128xf32>
    %517 = arith.cmpf oeq, %509, %516 : vector<8x128xf32>
    %c128_i32_208 = arith.constant 128 : i32
    %518 = vector.broadcast %c128_i32_208 : i32 to vector<8x128xi32>
    %519 = arith.select %517, %0, %518 : vector<8x128xi1>, vector<8x128xi32>
    %cst_209 = arith.constant dense<2147483647> : vector<8xi32>
    %520 = vector.multi_reduction <minsi>, %519, %cst_209 [1] : vector<8x128xi32> to vector<8xi32>
    %521 = vector.shape_cast %520 : vector<8xi32> to vector<8x1xi32>
    %522 = vector.broadcast %521 : vector<8x1xi32> to vector<8x128xi32>
    %523 = arith.cmpi eq, %0, %522 : vector<8x128xi32>
    %524 = arith.extui %523 : vector<8x128xi1> to vector<8x128xi32>
    %525 = arith.sitofp %524 : vector<8x128xi32> to vector<8x128xf32>
    %c10_i32 = arith.constant 10 : i32
    %c0_210 = arith.constant 0 : index
    %c0_211 = arith.constant 0 : index
    %526 = vector.load %arg7[%c0_210, %c0_211] : memref<8x128xf32, #tpu.memory_space<vmem>>, vector<8x128xf32>
    tpu.vector_store %arg7[%c0_210, %c0_211], %505 {strides = array<i32>} : memref<8x128xf32, #tpu.memory_space<vmem>>, vector<8x128xf32>,
    return
  }
}

</mosaic_0001>

<bundles_post_ra>
// kernel: tpu_custom_call.1
= control target key start
LH: loop header
LB: loop body
LE: loop exit
PB: predicated region body
PF: predicated region fallthrough
CT: control target
= control target key end

     0   :  { %13 = vsyncpa [#allocation3], 0  ;;  %s10203_s0 = inlined_call_operand.hbm [shape: f32[128,384], index: 0, kind: input, shape index: {}]   ;;  %s10204_s1 = inlined_call_operand.hbm [shape: f32[128,384], index: 1, kind: input, shape index: {}]   ;;  %s10205_s2 = inlined_call_operand.hbm [shape: f32[8,384], index: 2, kind: input, shape index: {}]   ;;  %s10206_s3 = inlined_call_operand.hbm [shape: f32[128,128], index: 3, kind: input, shape index: {}]   ;;  %s10207_s4 = inlined_call_operand.hbm [shape: f32[8,128], index: 4, kind: input, shape index: {}]   ;;  %s10208_s5 = inlined_call_operand.vmem [shape: f32[8,128], index: 5, kind: input, shape index: {}]   ;;  %s10209_s6 = inlined_call_operand.hbm [shape: f32[10,8,128], index: 6, kind: output, shape index: {0}]   ;;  %s10210_s7 = inlined_call_operand.hbm [shape: f32[8,128], index: 7, kind: output, shape index: {1}]  }
   0x1   :  { %14 = vsyncpa [#allocation6], 0 }
   0x2   :  { %15 = vsyncpa [#allocation9], 0 }
   0x3   :  { %16 = vsyncpa [#allocation4], 0 }
   0x4   :  { %17 = vsyncpa [#allocation13], 0  ;;  %s7103_s24 = smov [#allocation5]   ;;  %s7104_s26 = smov [#allocation8]  }
   0x5   :  { %s35_s25 = sshll.u32 %s7103_s24, 4  ;;  %s57_s27 = sshll.u32 %s7104_s26, 4  ;;  %s36_s25 = int_to_ptr.vmem [resolvable:$true] %s35_s25  ;;  %s58_s27 = int_to_ptr.vmem [resolvable:$true] %s57_s27 }
   0x6   :  { %s6961_s28 = scalar_lea.vmem %s36_s25, 6144  ;;  %p6966_p1 = scmp.lt.s32.totalorder %s36_s25, %s36_s25 }
   0x7   :  { %p6962_p0 = scmp.ne.s32.totalorder %s36_s25, %s6961_s28  ;;  %p6967_p2 = scmp.lt.s32.totalorder %s6961_s28, %s6961_s28 }
   0x9   :  { %p6968_p3 = por %p6967_p2, %p6966_p1 }
   0xb   :  { %p6969_p4 = pnand %p6968_p3, %p6962_p0 }
   0xd   :  { %6972 = shalt.err (!%p6969_p4)
}
   0xe   :  { %s7105_s29 = smov 384   ;;  %s7106_s30 = smov 24  }
   0xf   :  { %41 = dma.hbm_to_vmem [thread:$0]  %s10204_s1, 6144, %s36_s25, [#allocation6], %s7105_s29, %s7105_s29, %s7106_s30  }
  0x10   :  { %s6981_s10 = scalar_lea.vmem %s58_s27, 2048  ;;  %p6986_p6 = scmp.lt.s32.totalorder %s58_s27, %s58_s27 }
  0x11   :  { %p6982_p5 = scmp.ne.s32.totalorder %s58_s27, %s6981_s10  ;;  %p6987_p7 = scmp.lt.s32.totalorder %s6981_s10, %s6981_s10 }
  0x13   :  { %p6988_p8 = por %p6987_p7, %p6986_p6 }
  0x15   :  { %p6989_p9 = pnand %p6988_p8, %p6982_p5 }
  0x17   :  { %6992 = shalt.err (!%p6989_p9)
}
  0x18   :  { %s7107_s11 = smov 128   ;;  %s7108_s12 = smov 8  }
  0x19   :  { %63 = dma.hbm_to_vmem [thread:$0]  %s10206_s3, 2048, %s58_s27, [#allocation9], %s7107_s11, %s7107_s11, %s7108_s12  }
  0x1a   :  { %s7109_s15 = smov [#allocation2]   ;;  %s7110_s17 = smov [#allocation7]  }
  0x1b   :  { %s23_s16 = sshll.u32 %s7109_s15, 4  ;;  %s48_s1 = sshll.u32 %s7110_s17, 4  ;;  %s24_s16 = int_to_ptr.vmem [resolvable:$true] %s23_s16  ;;  %s49_s1 = int_to_ptr.vmem [resolvable:$true] %s48_s1 }
  0x1c   :  { %s7001_s18 = scalar_lea.vmem %s24_s16, 6144  ;;  %p7006_p11 = scmp.lt.s32.totalorder %s24_s16, %s24_s16 }
  0x1d   :  { %p7002_p10 = scmp.ne.s32.totalorder %s24_s16, %s7001_s18  ;;  %p7007_p12 = scmp.lt.s32.totalorder %s7001_s18, %s7001_s18 }
  0x1f   :  { %p7008_p13 = por %p7007_p12, %p7006_p11 }
  0x21   :  { %p7009_p0 = pnand %p7008_p13, %p7002_p10 }
  0x23   :  { %7012 = shalt.err (!%p7009_p0)
}
  0x24   :  { %29 = dma.hbm_to_vmem [thread:$0]  %s10203_s0, 6144, %s24_s16, [#allocation3], %s7105_s29, %s7105_s29, %s7106_s30  }
  0x25   :  { %s7021_s21 = scalar_lea.vmem %s49_s1, 384  ;;  %p7026_p2 = scmp.lt.s32.totalorder %s49_s1, %s49_s1 }
  0x26   :  { %p7022_p1 = scmp.ne.s32.totalorder %s49_s1, %s7021_s21  ;;  %p7027_p3 = scmp.lt.s32.totalorder %s7021_s21, %s7021_s21 }
  0x28   :  { %p7028_p4 = por %p7027_p3, %p7026_p2 }
  0x2a   :  { %p7029_p5 = pnand %p7028_p4, %p7022_p1 }
  0x2c   :  { %7032 = shalt.err (!%p7029_p5)
}
  0x2d   :  { %51 = dma.hbm_to_vmem [thread:$0]  %s10205_s2, 384, %s49_s1, [#allocation6]  }
  0x2e   :  { %s7111_s23 = smov [#allocation10]  }
  0x2f   :  { %s70_s24 = sshll.u32 %s7111_s23, 4  ;;  %s71_s24 = int_to_ptr.vmem [resolvable:$true] %s70_s24 }
  0x30   :  { %s7041_s25 = scalar_lea.vmem %s71_s24, 128  ;;  %p7046_p7 = scmp.lt.s32.totalorder %s71_s24, %s71_s24 }
  0x31   :  { %p7042_p6 = scmp.ne.s32.totalorder %s71_s24, %s7041_s25  ;;  %p7047_p8 = scmp.lt.s32.totalorder %s7041_s25, %s7041_s25 }
  0x33   :  { %p7048_p9 = por %p7047_p8, %p7046_p7 }
  0x35   :  { %p7049_p10 = pnand %p7048_p9, %p7042_p6 }
  0x37   :  { %7052 = shalt.err (!%p7049_p10)
}
  0x38   :  { %73 = dma.hbm_to_vmem [thread:$0]  %s10207_s4, 128, %s71_s24, [#allocation9]  }
  0x39   :  { %7093 = dma.done.wait [#allocation3], 6144  }
  0x3a   :  { %7094 = vsyncadd [#allocation3], 4294961152 }
  0x3b   :  { %7095 = dma.done.wait [#allocation6], 6528  }
  0x3c   :  { %7096 = vsyncadd [#allocation6], 4294960768 }
  0x3d   :  { %7097 = dma.done.wait [#allocation9], 2176  }
  0x3e   :  { %7098 = vsyncadd [#allocation9], 4294965120  ;;  %v10249_v0 = vmov 0.0   ;;  %vm7113_vm0 = vmmov 0   ;;  %v7179_v1 = vld [vmem:[#allocation2 + $0x170] sm:$0xff]  ;;  %v7181_v2 = vld [vmem:[#allocation2 + $0x168] sm:$0xff]  ;;  %v91_v33 = vlaneseq }
  0x3f   :  { %209 = vmatprep.mubr.f32.mxu0 %v10249_v0  ;;  %5789 = vmatprep.subr.mxu1 %v10249_v0  ;;  %v7183_v3 = vld [vmem:[#allocation2 + $0x158] sm:$0xff]  ;;  %v7186_v4 = vld [vmem:[#allocation2 + $0x150] sm:$0xff]  ;;  %v7189_v5 = vld [vmem:[#allocation2 + $0x140] sm:$0xff]  ;;  %v10211_v50 = vmov 1.0  }
  0x40   :  { %5821 = vmatprep.mubr.msk.f32.mxu1 %vm7113_vm0, %v10249_v0  ;;  %145 = vmatprep.subr.mxu0 %v7179_v1  ;;  %v7192_v6 = vld [vmem:[#allocation2 + $0x138] sm:$0xff]  ;;  %v7195_v7 = vld [vmem:[#allocation2 + $0x128] sm:$0xff]  ;;  %v7198_v8 = vld [vmem:[#allocation2 + $0x120] sm:$0xff]  ;;  %v7295_v40 = vand.u32 127, %v91_v33 }
  0x41   :  { %146 = vmatpush1.msra.mxu0 %v7181_v2  ;;  %v7201_v9 = vld [vmem:[#allocation2 + $0x110] sm:$0xff]  ;;  %v7204_v10 = vld [vmem:[#allocation2 + $0x108] sm:$0xff]  ;;  %v7207_v11 = vld [vmem:[#allocation2 + $0xf8] sm:$0xff] }
  0x42   :  { %147 = vmatprep.subr.mxu0 %v7183_v3  ;;  %v7210_v12 = vld [vmem:[#allocation2 + $0xf0] sm:$0xff]  ;;  %v7213_v13 = vld [vmem:[#allocation2 + $0xe0] sm:$0xff]  ;;  %v7216_v14 = vld [vmem:[#allocation2 + $0xd8] sm:$0xff]  ;;  %vm93_vm1 = vcmp.eq.s32.totalorder %v7295_v40, 0 }
  0x43   :  { %148 = vmatpush1.msra.mxu0 %v7186_v4  ;;  %v7218_v15 = vld [vmem:[#allocation2 + $0x178] sm:$0xff]  ;;  %v7221_v16 = vld [vmem:[#allocation2 + $0xc8] sm:$0xff]  ;;  %v7224_v17 = vld [vmem:[#allocation2 + $0x160] sm:$0xff] }
  0x44   :  { %149 = vmatprep.subr.mxu0 %v7189_v5  ;;  %5790 = vmatpush3.msra.mxu1 %v7218_v15  ;;  %v7227_v18 = vld [vmem:[#allocation2 + $0xc0] sm:$0xff]  ;;  %v7230_v19 = vld [vmem:[#allocation2 + $0x148] sm:$0xff]  ;;  %v7233_v20 = vld [vmem:[#allocation2 + $0xb0] sm:$0xff] }
  0x45   :  { %150 = vmatpush1.msra.mxu0 %v7192_v6  ;;  %5791 = vmatprep.subr.mxu1 %v10249_v0  ;;  %v7237_v21 = vld [vmem:[#allocation2 + $0xa8] sm:$0xff]  ;;  %v7240_v22 = vld [vmem:[#allocation2 + $0x130] sm:$0xff]  ;;  %v7243_v23 = vld [vmem:[#allocation2 + $0x98] sm:$0xff] }
  0x46   :  { %151 = vmatprep.subr.mxu0 %v7195_v7  ;;  %5792 = vmatpush3.msra.mxu1 %v7224_v17  ;;  %v7247_v24 = vld [vmem:[#allocation2 + $0x90] sm:$0xff]  ;;  %v7250_v25 = vld [vmem:[#allocation2 + $0x118] sm:$0xff]  ;;  %v7253_v26 = vld [vmem:[#allocation2 + $0x80] sm:$0xff] }
  0x47   :  { %152 = vmatpush1.msra.mxu0 %v7198_v8  ;;  %5793 = vmatprep.subr.mxu1 %v10249_v0  ;;  %v7257_v27 = vld [vmem:[#allocation2 + $0x78] sm:$0xff]  ;;  %v7260_v28 = vld [vmem:[#allocation2 + $0x100] sm:$0xff]  ;;  %v7263_v29 = vld [vmem:[#allocation2 + $0x68] sm:$0xff] }
  0x48   :  { %153 = vmatprep.subr.mxu0 %v7201_v9  ;;  %5794 = vmatpush3.msra.mxu1 %v7230_v19  ;;  %v7267_v30 = vld [vmem:[#allocation2 + $0x60] sm:$0xff]  ;;  %v7270_v31 = vld [vmem:[#allocation2 + $0xe8] sm:$0xff]  ;;  %v7273_v32 = vld [vmem:[#allocation2 + $0x50] sm:$0xff] }
  0x49   :  { %154 = vmatpush1.msra.mxu0 %v7204_v10  ;;  %5795 = vmatprep.subr.mxu1 %v10249_v0  ;;  %v7277_v34 = vld [vmem:[#allocation2 + $0x48] sm:$0xff]  ;;  %v7280_v35 = vld [vmem:[#allocation2 + $0xd0] sm:$0xff]  ;;  %v7283_v36 = vld [vmem:[#allocation2 + $0x38] sm:$0xff] }
  0x4a   :  { %155 = vmatprep.subr.mxu0 %v7207_v11  ;;  %5796 = vmatpush3.msra.mxu1 %v7240_v22  ;;  %v7287_v37 = vld [vmem:[#allocation2 + $0x30] sm:$0xff]  ;;  %v7290_v38 = vld [vmem:[#allocation2 + $0xb8] sm:$0xff]  ;;  %v7293_v39 = vld [vmem:[#allocation2 + $0x20] sm:$0xff] }
  0x4b   :  { %156 = vmatpush1.msra.mxu0 %v7210_v12  ;;  %5797 = vmatprep.subr.mxu1 %v10249_v0  ;;  %v7299_v41 = vld [vmem:[#allocation2 + $0x18] sm:$0xff]  ;;  %v7302_v42 = vld [vmem:[#allocation2 + $0xa0] sm:$0xff]  ;;  %v7305_v43 = vld [vmem:[#allocation2 + $0x8] sm:$0xff] }
  0x4c   :  { %157 = vmatprep.subr.mxu0 %v7213_v13  ;;  %5798 = vmatpush3.msra.mxu1 %v7250_v25  ;;  %v7309_v44 = vld [vmem:[#allocation2] sm:$0xff]  ;;  %v7312_v45 = vld [vmem:[#allocation2 + $0x88] sm:$0xff]  ;;  %v7316_v46 = vld [vmem:[#allocation5 + $0x170] sm:$0xff] }
  0x4d   :  { %158 = vmatpush1.msra.mxu0 %v7216_v14  ;;  %5799 = vmatprep.subr.mxu1 %v10249_v0  ;;  %v7320_v47 = vld [vmem:[#allocation5 + $0x168] sm:$0xff]  ;;  %v7324_v48 = vld [vmem:[#allocation5 + $0x158] sm:$0xff]  ;;  %v7327_v49 = vld [vmem:[#allocation2 + $0x70] sm:$0xff] }
  0x4e   :  { %159 = vmatprep.subr.mxu0 %v7221_v16  ;;  %5800 = vmatpush3.msra.mxu1 %v7260_v28  ;;  %v7333_v51 = vld [vmem:[#allocation5 + $0x150] sm:$0xff]  ;;  %v7336_v52 = vld [vmem:[#allocation5 + $0x140] sm:$0xff]  ;;  %v7339_v53 = vld [vmem:[#allocation2 + $0x58] sm:$0xff] }
  0x4f   :  { %160 = vmatpush1.msra.mxu0 %v7227_v18  ;;  %5801 = vmatprep.subr.mxu1 %v10249_v0  ;;  %10418 = vst [vmem:[#allocation19_spill] sm:$0xff] %v7333_v51  ;;  %10419 = vst [vmem:[#allocation20_spill] sm:$0xff] %v7336_v52  ;;  %v7342_v54 = vld [vmem:[#allocation5 + $0x138] sm:$0xff]  ;;  %v7346_v55 = vld [vmem:[#allocation5 + $0x128] sm:$0xff] }
  0x50   :  { %161 = vmatprep.subr.mxu0 %v7233_v20  ;;  %5802 = vmatpush3.msra.mxu1 %v7270_v31  ;;  %10420 = vst [vmem:[#allocation21_spill] sm:$0xff] %v7342_v54  ;;  %10421 = vst [vmem:[#allocation22_spill] sm:$0xff] %v7346_v55  ;;  %v7349_v56 = vld [vmem:[#allocation2 + $0x40] sm:$0xff]  ;;  %v7356_v58 = vld [vmem:[#allocation5 + $0x110] sm:$0xff] }
  0x51   :  { %162 = vmatpush1.msra.mxu0 %v7237_v21  ;;  %5803 = vmatprep.subr.mxu1 %v10249_v0  ;;  %v7352_v57 = vld [vmem:[#allocation5 + $0x120] sm:$0xff]  ;;  %10423 = vst [vmem:[#allocation24_spill] sm:$0xff] %v7356_v58  ;;  %v7359_v59 = vld [vmem:[#allocation2 + $0x28] sm:$0xff]  ;;  %v7366_v61 = vld [vmem:[#allocation5 + $0xf8] sm:$0xff] }
  0x52   :  { %163 = vmatprep.subr.mxu0 %v7243_v23  ;;  %5804 = vmatpush3.msra.mxu1 %v7280_v35  ;;  %10422 = vst [vmem:[#allocation23_spill] sm:$0xff] %v7352_v57  ;;  %v7362_v60 = vld [vmem:[#allocation5 + $0x108] sm:$0xff]  ;;  %10425 = vst [vmem:[#allocation26_spill] sm:$0xff] %v7366_v61  ;;  %v7369_v62 = vld [vmem:[#allocation2 + $0x10] sm:$0xff] }
  0x53   :  { %164 = vmatpush1.msra.mxu0 %v7247_v24  ;;  %5805 = vmatprep.subr.mxu1 %v10249_v0  ;;  %10424 = vst [vmem:[#allocation25_spill] sm:$0xff] %v7362_v60  ;;  %v7372_v63 = vld [vmem:[#allocation5 + $0xf0] sm:$0xff]  ;;  %v7376_v33 = vld [vmem:[#allocation5 + $0xe0] sm:$0xff] }
  0x54   :  { %165 = vmatprep.subr.mxu0 %v7253_v26  ;;  %5806 = vmatpush3.msra.mxu1 %v7290_v38  ;;  %10426 = vst [vmem:[#allocation27_spill] sm:$0xff] %v7372_v63  ;;  %10427 = vst [vmem:[#allocation28_spill] sm:$0xff] %v7376_v33 }
  0x55   :  { %166 = vmatpush1.msra.mxu0 %v7257_v27  ;;  %5807 = vmatprep.subr.mxu1 %v10249_v0 }
  0x56   :  { %167 = vmatprep.subr.mxu0 %v7263_v29  ;;  %5808 = vmatpush3.msra.mxu1 %v7302_v42 }
  0x57   :  { %168 = vmatpush1.msra.mxu0 %v7267_v30  ;;  %5809 = vmatprep.subr.mxu1 %v10249_v0 }
  0x58   :  { %169 = vmatprep.subr.mxu0 %v7273_v32  ;;  %5810 = vmatpush3.msra.mxu1 %v7312_v45 }
  0x59   :  { %170 = vmatpush1.msra.mxu0 %v7277_v34  ;;  %5811 = vmatprep.subr.mxu1 %v10249_v0 }
  0x5a   :  { %171 = vmatprep.subr.mxu0 %v7283_v36  ;;  %5812 = vmatpush3.msra.mxu1 %v7327_v49 }
  0x5b   :  { %172 = vmatpush1.msra.mxu0 %v7287_v37  ;;  %5813 = vmatprep.subr.mxu1 %v10249_v0 }
  0x5c   :  { %173 = vmatprep.subr.mxu0 %v7293_v39  ;;  %5814 = vmatpush3.msra.mxu1 %v7339_v53 }
  0x5d   :  { %174 = vmatpush1.msra.mxu0 %v7299_v41  ;;  %5815 = vmatprep.subr.mxu1 %v10249_v0 }
  0x5e   :  { %175 = vmatprep.subr.mxu0 %v7305_v43  ;;  %5816 = vmatpush3.msra.mxu1 %v7349_v56 }
  0x5f   :  { %176 = vmatpush1.msra.mxu0 %v7309_v44  ;;  %5817 = vmatprep.subr.mxu1 %v10249_v0 }
  0x60   :  { %5230 = vmatmul.mubr.msk.f32.vlgmr.msra.gmra.mxu0 %vm93_vm1, %v10211_v50  ;;  %337 = vmatprep.subr.mxu0 %v7316_v46  ;;  %v7380_v50 = vld [vmem:[#allocation5 + $0xd8] sm:$0xff] }
  0x61   :  { %338 = vmatpush1.msra.mxu0 %v7320_v47  ;;  %5818 = vmatpush3.msra.mxu1 %v7359_v59  ;;  %10428 = vst [vmem:[#allocation29_spill] sm:$0xff] %v7380_v50 }
  0x62   :  { %339 = vmatprep.subr.mxu0 %v7324_v48  ;;  %5819 = vmatprep.subr.mxu1 %v10249_v0 }
  0x63   :  { %340 = vmatpush1.msra.mxu0 %v7333_v51  ;;  %5820 = vmatpush3.msra.mxu1 %v7369_v62  ;;  %v7419_v51 = vld [vmem:[#allocation5 + $0x130] sm:$0xff] }
  0x64   :  { %341 = vmatprep.subr.mxu0 %v7336_v52  ;;  %401 = vmatprep.mubr.f32.mxu0 %v10249_v0  ;;  %v7412_v52 = vld [vmem:[#allocation5 + $0x90] sm:$0xff]  ;;  %10439 = vst [vmem:[#allocation39_spill] sm:$0xff] %v7419_v51 }
  0x65   :  { %342 = vmatpush1.msra.mxu0 %v7342_v54  ;;  %5824 = vmatprep.subr.mxu1 %v10249_v0  ;;  %v7402_v54 = vld [vmem:[#allocation5 + $0xa8] sm:$0xff]  ;;  %10437 = vst [vmem:[#allocation37_spill] sm:$0xff] %v7412_v52 }
  0x66   :  { %343 = vmatprep.subr.mxu0 %v7346_v55  ;;  %v10432_v55 = vmov 1.0   ;;  %10434 = vst [vmem:[#allocation34_spill] sm:$0xff] %v7402_v54 }
  0x67   :  { %344 = vmatpush1.msra.mxu0 %v7352_v57  ;;  %v7384_v57 = vld [vmem:[#allocation5 + $0xc8] sm:$0xff]  ;;  %5822 = vmatmul.mubr.msk.f32.vlgmr.msra.gmra.mxu1 %vm93_vm1, %v10432_v55 }
  0x68   :  { %345 = vmatprep.subr.mxu0 %v7356_v58  ;;  %10429 = vst [vmem:[#allocation30_spill] sm:$0xff] %v7384_v57  ;;  %v7387_v58 = vld [vmem:[#allocation5 + $0x178] sm:$0xff]  ;;  %5856 = vmatprep.mubr.msk.f32.mxu1 %vm7113_vm0, %v10249_v0 }
  0x69   :  { %346 = vmatpush1.msra.mxu0 %v7362_v60  ;;  %v7390_v60 = vld [vmem:[#allocation5 + $0xc0] sm:$0xff]  ;;  %5825 = vmatpush3.msra.mxu1 %v7387_v58 }
  0x6a   :  { %347 = vmatprep.subr.mxu0 %v7366_v61  ;;  %10430 = vst [vmem:[#allocation31_spill] sm:$0xff] %v7390_v60  ;;  %v7394_v61 = vld [vmem:[#allocation5 + $0xb0] sm:$0xff]  ;;  %5826 = vmatprep.subr.mxu1 %v10249_v0 }
  0x6b   :  { %348 = vmatpush1.msra.mxu0 %v7372_v63  ;;  %10431 = vst [vmem:[#allocation32_spill] sm:$0xff] %v7394_v61  ;;  %v7399_v63 = vld [vmem:[#allocation5 + $0x160] sm:$0xff] }
  0x6c   :  { %349 = vmatprep.subr.mxu0 %v7376_v33  ;;  %10433 = vst [vmem:[#allocation33_spill] sm:$0xff] %v7399_v63  ;;  %v7406_v33 = vld [vmem:[#allocation5 + $0x98] sm:$0xff]  ;;  %5827 = vmatpush3.msra.mxu1 %v7399_v63 }
  0x6d   :  { %350 = vmatpush1.msra.mxu0 %v7380_v50  ;;  %10435 = vst [vmem:[#allocation35_spill] sm:$0xff] %v7406_v33  ;;  %v7409_v50 = vld [vmem:[#allocation5 + $0x148] sm:$0xff]  ;;  %5828 = vmatprep.subr.mxu1 %v10249_v0  ;;  %v7429_v63 = vld [vmem:[#allocation5 + $0x118] sm:$0xff] }
  0x6e   :  { %351 = vmatprep.subr.mxu0 %v7384_v57  ;;  %10436 = vst [vmem:[#allocation36_spill] sm:$0xff] %v7409_v50  ;;  %v7416_v57 = vld [vmem:[#allocation5 + $0x80] sm:$0xff]  ;;  %5829 = vmatpush3.msra.mxu1 %v7409_v50  ;;  %10442 = vst [vmem:[#allocation42_spill] sm:$0xff] %v7429_v63 }
  0x6f   :  { %352 = vmatpush1.msra.mxu0 %v7390_v60  ;;  %10438 = vst [vmem:[#allocation38_spill] sm:$0xff] %v7416_v57  ;;  %v7422_v60 = vld [vmem:[#allocation5 + $0x78] sm:$0xff]  ;;  %5830 = vmatprep.subr.mxu1 %v10249_v0  ;;  %v7439_v50 = vld [vmem:[#allocation5 + $0x100] sm:$0xff] }
  0x70   :  { %353 = vmatprep.subr.mxu0 %v7394_v61  ;;  %10440 = vst [vmem:[#allocation40_spill] sm:$0xff] %v7422_v60  ;;  %v7426_v61 = vld [vmem:[#allocation5 + $0x68] sm:$0xff]  ;;  %5831 = vmatpush3.msra.mxu1 %v7419_v51  ;;  %10445 = vst [vmem:[#allocation45_spill] sm:$0xff] %v7439_v50 }
  0x71   :  { %354 = vmatpush1.msra.mxu0 %v7402_v54  ;;  %10441 = vst [vmem:[#allocation41_spill] sm:$0xff] %v7426_v61  ;;  %v7432_v54 = vld [vmem:[#allocation5 + $0x60] sm:$0xff]  ;;  %5832 = vmatprep.subr.mxu1 %v10249_v0  ;;  %v7449_v51 = vld [vmem:[#allocation5 + $0xe8] sm:$0xff] }
  0x72   :  { %355 = vmatprep.subr.mxu0 %v7406_v33  ;;  %10443 = vst [vmem:[#allocation43_spill] sm:$0xff] %v7432_v54  ;;  %v7436_v33 = vld [vmem:[#allocation5 + $0x50] sm:$0xff]  ;;  %5833 = vmatpush3.msra.mxu1 %v7429_v63 }
  0x73   :  { %356 = vmatpush1.msra.mxu0 %v7412_v52  ;;  %10444 = vst [vmem:[#allocation44_spill] sm:$0xff] %v7436_v33  ;;  %v7442_v52 = vld [vmem:[#allocation5 + $0x48] sm:$0xff]  ;;  %5834 = vmatprep.subr.mxu1 %v10249_v0  ;;  %v7459_v63 = vld [vmem:[#allocation5 + $0xd0] sm:$0xff] }
  0x74   :  { %357 = vmatprep.subr.mxu0 %v7416_v57  ;;  %10446 = vst [vmem:[#allocation46_spill] sm:$0xff] %v7442_v52  ;;  %v7446_v57 = vld [vmem:[#allocation5 + $0x38] sm:$0xff]  ;;  %5835 = vmatpush3.msra.mxu1 %v7439_v50 }
  0x75   :  { %358 = vmatpush1.msra.mxu0 %v7422_v60  ;;  %10447 = vst [vmem:[#allocation47_spill] sm:$0xff] %v7446_v57  ;;  %v7452_v60 = vld [vmem:[#allocation5 + $0x30] sm:$0xff]  ;;  %5836 = vmatprep.subr.mxu1 %v10249_v0  ;;  %v7469_v50 = vld [vmem:[#allocation5 + $0xb8] sm:$0xff] }
  0x76   :  { %359 = vmatprep.subr.mxu0 %v7426_v61  ;;  %10448 = vst [vmem:[#allocation48_spill] sm:$0xff] %v7452_v60  ;;  %v7456_v61 = vld [vmem:[#allocation5 + $0x20] sm:$0xff]  ;;  %5837 = vmatpush3.msra.mxu1 %v7449_v51 }
  0x77   :  { %360 = vmatpush1.msra.mxu0 %v7432_v54  ;;  %10449 = vst [vmem:[#allocation49_spill] sm:$0xff] %v7456_v61  ;;  %v7462_v54 = vld [vmem:[#allocation5 + $0x18] sm:$0xff]  ;;  %5838 = vmatprep.subr.mxu1 %v10249_v0 }
  0x78   :  { %361 = vmatprep.subr.mxu0 %v7436_v33  ;;  %10450 = vst [vmem:[#allocation50_spill] sm:$0xff] %v7462_v54  ;;  %v7466_v33 = vld [vmem:[#allocation5 + $0x8] sm:$0xff]  ;;  %5839 = vmatpush3.msra.mxu1 %v7459_v63 }
  0x79   :  { %362 = vmatpush1.msra.mxu0 %v7442_v52  ;;  %10451 = vst [vmem:[#allocation51_spill] sm:$0xff] %v7466_v33  ;;  %v7472_v52 = vld [vmem:[#allocation5] sm:$0xff]  ;;  %5840 = vmatprep.subr.mxu1 %v10249_v0 }
  0x7a   :  { %363 = vmatprep.subr.mxu0 %v7446_v57  ;;  %10452 = vst [vmem:[#allocation52_spill] sm:$0xff] %v7472_v52  ;;  %v7479_v57 = vld [vmem:[%s10208_s5] sm:$0xff]  ;;  %5841 = vmatpush3.msra.mxu1 %v7469_v50  ;;  %s7115_s5 = smov [#allocation12]  }
  0x7b   :  { %364 = vmatpush1.msra.mxu0 %v7452_v60  ;;  %v7482_v60 = vld [vmem:[#allocation5 + $0xa0] sm:$0xff]  ;;  %5842 = vmatprep.subr.mxu1 %v10249_v0  ;;  %s5214_s27 = sshll.u32 %s7115_s5, 4  ;;  %s5215_s27 = int_to_ptr.vmem [resolvable:$true] %s5214_s27 }
  0x7c   :  { %365 = vmatprep.subr.mxu0 %v7456_v61  ;;  %10453 = vst [vmem:[#allocation53_spill] sm:$0xff] %v7482_v60  ;;  %v7488_v61 = vld [vmem:[#allocation5 + $0x88] sm:$0xff]  ;;  %5843 = vmatpush3.msra.mxu1 %v7482_v60  ;;  %v7514_v60 = vld [vmem:[#allocation5 + $0x10] sm:$0xff]  ;;  %s7053_s28 = scalar_lea.vmem %s5215_s27, 128  ;;  %p7058_p12 = scmp.lt.s32.totalorder %s5215_s27, %s5215_s27 }
  0x7d   :  { %366 = vmatpush1.msra.mxu0 %v7462_v54  ;;  %10454 = vst [vmem:[#allocation54_spill] sm:$0xff] %v7488_v61  ;;  %5844 = vmatprep.subr.mxu1 %v10249_v0  ;;  %v7493_v54 = vld [vmem:[#allocation5 + $0x70] sm:$0xff]  ;;  %p7054_p11 = scmp.ne.s32.totalorder %s5215_s27, %s7053_s28  ;;  %p7059_p13 = scmp.lt.s32.totalorder %s7053_s28, %s7053_s28 }
  0x7e   :  { %367 = vmatprep.subr.mxu0 %v7466_v33  ;;  %5845 = vmatpush3.msra.mxu1 %v7488_v61  ;;  %v7506_v33 = vld [vmem:[#allocation5 + $0x40] sm:$0xff]  ;;  %v7510_v61 = vld [vmem:[#allocation5 + $0x28] sm:$0xff] }
  0x7f   :  { %368 = vmatpush1.msra.mxu0 %v7472_v52  ;;  %5846 = vmatprep.subr.mxu1 %v10249_v0  ;;  %v7500_v52 = vld [vmem:[#allocation5 + $0x58] sm:$0xff]  ;;  %p7060_p0 = por %p7059_p13, %p7058_p12 }
  0x80   :  { %402 = vmatmul.mubr.f32.vlgmr.msra.gmra.mxu0 %v7479_v57  ;;  %5859 = vmatprep.subr.mxu0 %v10249_v0 }
  0x81   :  { %5891 = vmatprep.mubr.msk.f32.mxu0 %vm7113_vm0, %v10249_v0  ;;  %5847 = vmatpush3.msra.mxu1 %v7493_v54  ;;  %p7061_p1 = pnand %p7060_p0, %p7054_p11 }
  0x82   :  { %5848 = vmatprep.subr.mxu1 %v10249_v0 }
  0x83   :  { %5849 = vmatpush3.msra.mxu1 %v7500_v52 }
  0x84   :  { %5850 = vmatprep.subr.mxu1 %v10249_v0 }
  0x85   :  { %5851 = vmatpush3.msra.mxu1 %v7506_v33 }
  0x86   :  { %5852 = vmatprep.subr.mxu1 %v10249_v0 }
  0x87   :  { %5853 = vmatpush3.msra.mxu1 %v7510_v61 }
  0x88   :  { %5854 = vmatprep.subr.mxu1 %v10249_v0 }
  0x89   :  { %5855 = vmatpush3.msra.mxu1 %v7514_v60 }
  0x8a   :  { %5857 = vmatmul.mubr.f32.vlgmr.msra.gmra.mxu1 %v7479_v57  ;;  %656 = vmatprep.subr.mxu1 %v7179_v1  ;;  %v7554_v1 = vld [vmem:[#allocation8 + $0x78] sm:$0xff] }
  0x8b   :  { %657 = vmatpush1.msra.mxu1 %v7181_v2  ;;  %720 = vmatprep.mubr.f32.mxu1 %v10249_v0  ;;  %v7556_v2 = vld [vmem:[#allocation8 + $0x70] sm:$0xff] }
  0x8c   :  { %658 = vmatprep.subr.mxu1 %v7183_v3  ;;  %5860 = vmatpush3.msra.mxu0 %v7554_v1  ;;  %v7562_v3 = vld [vmem:[#allocation8 + $0x68] sm:$0xff] }
  0x8d   :  { %659 = vmatpush1.msra.mxu1 %v7186_v4  ;;  %5861 = vmatprep.subr.mxu0 %v10249_v0  ;;  %v7566_v4 = vld [vmem:[#allocation8 + $0x60] sm:$0xff] }
  0x8e   :  { %660 = vmatprep.subr.mxu1 %v7189_v5  ;;  %5862 = vmatpush3.msra.mxu0 %v7556_v2  ;;  %v7570_v5 = vld [vmem:[#allocation8 + $0x58] sm:$0xff] }
  0x8f   :  { %661 = vmatpush1.msra.mxu1 %v7192_v6  ;;  %5863 = vmatprep.subr.mxu0 %v10249_v0  ;;  %v7574_v6 = vld [vmem:[#allocation8 + $0x50] sm:$0xff] }
  0x90   :  { %662 = vmatprep.subr.mxu1 %v7195_v7  ;;  %5864 = vmatpush3.msra.mxu0 %v7562_v3  ;;  %v7578_v7 = vld [vmem:[#allocation8 + $0x48] sm:$0xff] }
  0x91   :  { %663 = vmatpush1.msra.mxu1 %v7198_v8  ;;  %5865 = vmatprep.subr.mxu0 %v10249_v0  ;;  %v7582_v8 = vld [vmem:[#allocation8 + $0x40] sm:$0xff] }
  0x92   :  { %664 = vmatprep.subr.mxu1 %v7201_v9  ;;  %5866 = vmatpush3.msra.mxu0 %v7566_v4  ;;  %v7584_v9 = vld [vmem:[#allocation8 + $0x38] sm:$0xff] }
  0x93   :  { %665 = vmatpush1.msra.mxu1 %v7204_v10  ;;  %5867 = vmatprep.subr.mxu0 %v10249_v0  ;;  %v7588_v10 = vld [vmem:[#allocation8 + $0x30] sm:$0xff] }
  0x94   :  { %666 = vmatprep.subr.mxu1 %v7207_v11  ;;  %5868 = vmatpush3.msra.mxu0 %v7570_v5  ;;  %v7592_v11 = vld [vmem:[#allocation8 + $0x28] sm:$0xff] }
  0x95   :  { %667 = vmatpush1.msra.mxu1 %v7210_v12  ;;  %5869 = vmatprep.subr.mxu0 %v10249_v0  ;;  %v7596_v12 = vld [vmem:[#allocation8 + $0x20] sm:$0xff] }
  0x96   :  { %668 = vmatprep.subr.mxu1 %v7213_v13  ;;  %5870 = vmatpush3.msra.mxu0 %v7574_v6  ;;  %v7600_v13 = vld [vmem:[#allocation8 + $0x18] sm:$0xff] }
  0x97   :  { %669 = vmatpush1.msra.mxu1 %v7216_v14  ;;  %5871 = vmatprep.subr.mxu0 %v10249_v0  ;;  %v7604_v14 = vld [vmem:[#allocation8 + $0x10] sm:$0xff] }
  0x98   :  { %670 = vmatprep.subr.mxu1 %v7221_v16  ;;  %5872 = vmatpush3.msra.mxu0 %v7578_v7  ;;  %v7608_v16 = vld [vmem:[#allocation8 + $0x8] sm:$0xff] }
  0x99   :  { %671 = vmatpush1.msra.mxu1 %v7227_v18  ;;  %5873 = vmatprep.subr.mxu0 %v10249_v0  ;;  %10455 = vst [vmem:[#allocation55_spill] sm:$0xff] %v7608_v16  ;;  %v7612_v18 = vld [vmem:[#allocation8] sm:$0xff] }
  0x9a   :  { %672 = vmatprep.subr.mxu1 %v7233_v20  ;;  %5874 = vmatpush3.msra.mxu0 %v7582_v8  ;;  %10456 = vst [vmem:[#allocation56_spill] sm:$0xff] %v7612_v18 }
  0x9b   :  { %673 = vmatpush1.msra.mxu1 %v7237_v21  ;;  %5875 = vmatprep.subr.mxu0 %v10249_v0 }
  0x9c   :  { %674 = vmatprep.subr.mxu1 %v7243_v23  ;;  %5876 = vmatpush3.msra.mxu0 %v7584_v9 }
  0x9d   :  { %675 = vmatpush1.msra.mxu1 %v7247_v24  ;;  %5877 = vmatprep.subr.mxu0 %v10249_v0 }
  0x9e   :  { %676 = vmatprep.subr.mxu1 %v7253_v26  ;;  %5878 = vmatpush3.msra.mxu0 %v7588_v10  ;;  %v7618_v26 = vld [vmem:[#allocation7] sm:$0xff] }
  0x9f   :  { %677 = vmatpush1.msra.mxu1 %v7257_v27  ;;  %5879 = vmatprep.subr.mxu0 %v10249_v0  ;;  %10457 = vst [vmem:[#allocation57_spill] sm:$0xff] %v7618_v26 }
  0xa0   :  { %678 = vmatprep.subr.mxu1 %v7263_v29  ;;  %5880 = vmatpush3.msra.mxu0 %v7592_v11 }
  0xa1   :  { %679 = vmatpush1.msra.mxu1 %v7267_v30  ;;  %5881 = vmatprep.subr.mxu0 %v10249_v0  ;;  %v7621_v30 = vld [vmem:[#allocation7 + $0x8] sm:$0xff] }
  0xa2   :  { %680 = vmatprep.subr.mxu1 %v7273_v32  ;;  %5882 = vmatpush3.msra.mxu0 %v7596_v12 }
  0xa3   :  { %681 = vmatpush1.msra.mxu1 %v7277_v34  ;;  %5883 = vmatprep.subr.mxu0 %v10249_v0 }
  0xa4   :  { %682 = vmatprep.subr.mxu1 %v7283_v36  ;;  %5884 = vmatpush3.msra.mxu0 %v7600_v13 }
  0xa5   :  { %683 = vmatpush1.msra.mxu1 %v7287_v37  ;;  %5885 = vmatprep.subr.mxu0 %v10249_v0 }
  0xa6   :  { %684 = vmatprep.subr.mxu1 %v7293_v39  ;;  %5886 = vmatpush3.msra.mxu0 %v7604_v14 }
  0xa7   :  { %685 = vmatpush1.msra.mxu1 %v7299_v41  ;;  %5887 = vmatprep.subr.mxu0 %v10249_v0 }
  0xa8   :  { %686 = vmatprep.subr.mxu1 %v7305_v43  ;;  %5888 = vmatpush3.msra.mxu0 %v7608_v16 }
  0xa9   :  { %687 = vmatpush1.msra.mxu1 %v7309_v44  ;;  %5889 = vmatprep.subr.mxu0 %v10249_v0 }
  0xaa   :  { %848 = vmatprep.subr.mxu1 %v7316_v46  ;;  %5890 = vmatpush3.msra.mxu0 %v7612_v18  ;;  %v7624_v18 = vld [vmem:[#allocation7 + $0x10] sm:$0xff] }
  0xab   :  { %5894 = vmatprep.subr.mxu0 %v10249_v0 }
 0x120   :  { %v211_v23 = vpop.f32.mrf.mxu0 }
 0x122   :  { %v213_v24 = vpop.f32.mrf.mxu0 }
 0x127   :  { %v282_v20 = vpop.f32.mrf.mxu1 }
 0x129   :  { %v5823_v21 = vpop.f32.mrf.mxu1 }
 0x140   :  { %v403_v27 = vpop.f32.mrf.mxu0 }
 0x141   :  { %v404_v29 = vadd.f32 %v403_v27, %v7618_v26 }
 0x142   :  { %v405_v32 = vpop.f32.mrf.mxu0 }
 0x143   :  { %v478_v34 = vadd.f32 %v404_v29, %v211_v23  ;;  %v406_v37 = vadd.f32 %v405_v32, %v7621_v30 }
 0x145   :  { %v5232_v36 = vmul.f32 -1.442695, %v478_v34  ;;  %v485_v39 = vadd.f32 %v406_v37, %v213_v24 }
 0x147   :  { %6853 = vpow2.f32 %v5232_v36  ;;  %v5233_v41 = vmul.f32 -1.442695, %v485_v39 }
 0x149   :  { %6855 = vpow2.f32 %v5233_v41  ;;  %v10462_v41 = vld [vmem:[#allocation21_spill] sm:$0xff] }
 0x14a   :  { %v474_v43 = vpop.f32.mrf.mxu1 }
 0x14b   :  { %v475_v26 = vadd.f32 %v474_v43, %v7624_v18  ;;  %v10463_v43 = vld [vmem:[#allocation36_spill] sm:$0xff] }
 0x14c   :  { %v5858_v44 = vpop.f32.mrf.mxu1 }
 0x14d   :  { %v10464_v44 = vld [vmem:[#allocation22_spill] sm:$0xff] }
 0x154   :  { %v6854_v46 = vpop.eup %6853 }
 0x155   :  { %v482_v21 = vadd.f32 1.0, %v6854_v46  ;;  %v10468_v46 = vld [vmem:[#allocation25_spill] sm:$0xff] }
 0x156   :  { %v6856_v0 = vpop.eup %6855 }
 0x157   :  { %6857 = vrcp.f32 %v482_v21  ;;  %v489_v27 = vadd.f32 1.0, %v6856_v0  ;;  %v10458_v0 = vmov 0.0   ;;  %v10469_v21 = vld [vmem:[#allocation42_spill] sm:$0xff] }
 0x159   :  { %6859 = vrcp.f32 %v489_v27  ;;  %v10470_v27 = vld [vmem:[#allocation26_spill] sm:$0xff] }
 0x164   :  { %v6858_v16 = vpop.eup %6857 }
 0x165   :  { %v492_v23 = vmul.f32 %v6858_v16, %v475_v26  ;;  %v10459_v16 = vld [vmem:[#allocation19_spill] sm:$0xff]  ;;  %v10461_v26 = vld [vmem:[#allocation20_spill] sm:$0xff] }
 0x166   :  { %v6860_v32 = vpop.eup %6859 }
 0x167   :  { %v493_v29 = vadd.f32 %v492_v23, %v282_v20  ;;  %v495_v24 = vsub.f32 1.0, %v6860_v32  ;;  %v497_v37 = vmul.f32 %v6860_v32, %v7479_v57  ;;  %v10460_v20 = vld [vmem:[#allocation33_spill] sm:$0xff]  ;;  %v10471_v23 = vld [vmem:[#allocation27_spill] sm:$0xff]  ;;  %v10473_v32 = vld [vmem:[#allocation28_spill] sm:$0xff] }
 0x169   :  { %6861 = vtanh.f32 %v493_v29  ;;  %v10472_v29 = vld [vmem:[#allocation45_spill] sm:$0xff] }
 0x176   :  { %v6862_v34 = vpop.eup %6861 }
 0x177   :  { %v496_v36 = vmul.f32 %v6862_v34, %v495_v24  ;;  %v10474_v24 = vld [vmem:[#allocation29_spill] sm:$0xff]  ;;  %v10475_v34 = vld [vmem:[#allocation30_spill] sm:$0xff] }
 0x179   :  { %v7628_v39 = vadd.f32 %v497_v37, %v496_v36  ;;  %v10476_v36 = vld [vmem:[#allocation31_spill] sm:$0xff]  ;;  %v10477_v37 = vld [vmem:[#allocation32_spill] sm:$0xff] }
 0x17b   :  { %5892 = vmatmul.mubr.f32.vlgmr.msra.gmra.mxu0 %v7628_v39 }
 0x17c   :  { %5895 = vmatpush3.msra.mxu0 %v7218_v15  ;;  %5926 = vmatprep.mubr.msk.f32.mxu0 %vm7113_vm0, %v10458_v0  ;;  %v7665_v15 = vld [vmem:[#allocation10] sm:$0xff] }
 0x17d   :  { %5896 = vmatprep.subr.mxu0 %v10458_v0 }
 0x17e   :  { %5897 = vmatpush3.msra.mxu0 %v7224_v17 }
 0x17f   :  { %5898 = vmatprep.subr.mxu0 %v10458_v0 }
 0x180   :  { %5899 = vmatpush3.msra.mxu0 %v7230_v19 }
 0x181   :  { %5900 = vmatprep.subr.mxu0 %v10458_v0 }
 0x182   :  { %5901 = vmatpush3.msra.mxu0 %v7240_v22 }
 0x183   :  { %5902 = vmatprep.subr.mxu0 %v10458_v0 }
 0x184   :  { %5903 = vmatpush3.msra.mxu0 %v7250_v25 }
 0x185   :  { %5904 = vmatprep.subr.mxu0 %v10458_v0 }
 0x186   :  { %5905 = vmatpush3.msra.mxu0 %v7260_v28 }
 0x187   :  { %5906 = vmatprep.subr.mxu0 %v10458_v0 }
 0x188   :  { %5907 = vmatpush3.msra.mxu0 %v7270_v31 }
 0x189   :  { %5908 = vmatprep.subr.mxu0 %v10458_v0 }
 0x18a   :  { %5909 = vmatpush3.msra.mxu0 %v7280_v35 }
 0x18b   :  { %5910 = vmatprep.subr.mxu0 %v10458_v0 }
 0x18c   :  { %5911 = vmatpush3.msra.mxu0 %v7290_v38 }
 0x18d   :  { %5912 = vmatprep.subr.mxu0 %v10458_v0 }
 0x18e   :  { %5913 = vmatpush3.msra.mxu0 %v7302_v42 }
 0x18f   :  { %5914 = vmatprep.subr.mxu0 %v10458_v0 }
 0x190   :  { %5915 = vmatpush3.msra.mxu0 %v7312_v45 }
 0x191   :  { %5916 = vmatprep.subr.mxu0 %v10458_v0 }
 0x192   :  { %5917 = vmatpush3.msra.mxu0 %v7327_v49 }
 0x193   :  { %5918 = vmatprep.subr.mxu0 %v10458_v0 }
 0x194   :  { %5919 = vmatpush3.msra.mxu0 %v7339_v53 }
 0x195   :  { %5920 = vmatprep.subr.mxu0 %v10458_v0 }
 0x196   :  { %5921 = vmatpush3.msra.mxu0 %v7349_v56 }
 0x197   :  { %5922 = vmatprep.subr.mxu0 %v10458_v0 }
 0x198   :  { %5923 = vmatpush3.msra.mxu0 %v7359_v59 }
 0x199   :  { %5924 = vmatprep.subr.mxu0 %v10458_v0 }
 0x19a   :  { %5925 = vmatpush3.msra.mxu0 %v7369_v62 }
 0x19b   :  { %5929 = vmatprep.subr.mxu0 %v10458_v0 }
 0x23b   :  { %v582_v17 = vpop.f32.mrf.mxu0 }
 0x23c   :  { %v583_v19 = vadd.f32 %v582_v17, %v7665_v15  ;;  %v10478_v17 = vld [vmem:[#allocation34_spill] sm:$0xff] }
 0x23d   :  { %v5893_v22 = vpop.f32.mrf.mxu0 }
 0x23e   :  { %586 = vst [vmem:[#allocation11] sm:$0xff] %v583_v19  ;;  %587 = vmax.xlane.f32.xlu0 %v583_v19  ;;  %v10481_v22 = vld [vmem:[#allocation53_spill] sm:$0xff] }
 0x2c7   :  { %v588_v25 = vpop.xlane.xlu0 %587 }
 0x2c8   :  { %vm589_vm2 = vcmp.eq.f32.partialorder %v583_v19, %v588_v25  ;;  %v10479_v19 = vld [vmem:[#allocation35_spill] sm:$0xff]  ;;  %v10482_v25 = vld [vmem:[#allocation38_spill] sm:$0xff] }
 0x2c9   :  { %v590_v28 = vsel %vm589_vm2, %v7295_v40, 128 }
 0x2ca   :  { %v592_v31 = vshra.s32 %v590_v28, 16  ;;  %v591_v38 = vand.u32 65535, %v590_v28  ;;  %v10484_v28 = vld [vmem:[#allocation54_spill] sm:$0xff] }
 0x2cc   :  { %v594_v35 = vcvt.s32.f32 %v592_v31  ;;  %v593_v45 = vcvt.s32.f32 %v591_v38  ;;  %v10485_v31 = vld [vmem:[#allocation41_spill] sm:$0xff]  ;;  %v10488_v38 = vld [vmem:[#allocation46_spill] sm:$0xff] }
 0x2ce   :  { %595 = vmin.xlane.f32.xlu0 %v594_v35 }
 0x357   :  { %v596_v42 = vpop.xlane.xlu0 %595 }
 0x358   :  { %vm597_vm3 = vcmp.eq.f32.partialorder %v594_v35, %v596_v42  ;;  %v602_v53 = vcvt.f32.s32 %v596_v42  ;;  %v10487_v35 = vld [vmem:[#allocation44_spill] sm:$0xff]  ;;  %v10489_v42 = vld [vmem:[#allocation47_spill] sm:$0xff] }
 0x359   :  { %v598_v49 = vsel %vm597_vm3, %v593_v45, inf  ;;  %v10490_v45 = vld [vmem:[#allocation48_spill] sm:$0xff] }
 0x35a   :  { %599 = vmin.xlane.f32.xlu1 %v598_v49  ;;  %v603_v57 = vshll.u32 %v602_v53, 16  ;;  %v10491_v49 = vld [vmem:[#allocation49_spill] sm:$0xff]  ;;  %v10493_v53 = vld [vmem:[#allocation51_spill] sm:$0xff] }
 0x3e3   :  { %v600_v56 = vpop.xlane.xlu1 %599 }
 0x3e4   :  { %v601_v59 = vcvt.f32.s32 %v600_v56 }
 0x3e6   :  { %v604_v62 = vadd.s32 %v603_v57, %v601_v59 }
 0x3e8   :  { %vm605_vm4 = vcmp.eq.s32.totalorder %v7295_v40, %v604_v62 }
 0x3e9   :  { %5235 = vmatmul.mubr.msk.f32.vlgmr.msra.gmra.mxu1 %vm605_vm4, %v10432_v55  ;;  %5927 = vmatmul.mubr.msk.f32.vlgmr.msra.gmra.mxu0 %vm605_vm4, %v10432_v55 }
 0x3ea   :  { %849 = vmatpush1.msra.mxu1 %v7320_v47  ;;  %5930 = vmatpush3.msra.mxu0 %v7387_v58  ;;  %v10465_v47 = vld [vmem:[#allocation23_spill] sm:$0xff]  ;;  %v10467_v58 = vld [vmem:[#allocation24_spill] sm:$0xff] }
 0x3eb   :  { %850 = vmatprep.subr.mxu1 %v7324_v48  ;;  %5931 = vmatprep.subr.mxu0 %v10458_v0  ;;  %v10466_v48 = vld [vmem:[#allocation39_spill] sm:$0xff] }
 0x3ec   :  { %851 = vmatpush1.msra.mxu1 %v10459_v16  ;;  %5932 = vmatpush3.msra.mxu0 %v10460_v20 }
 0x3ed   :  { %852 = vmatprep.subr.mxu1 %v10461_v26  ;;  %5933 = vmatprep.subr.mxu0 %v10458_v0 }
 0x3ee   :  { %853 = vmatpush1.msra.mxu1 %v10462_v41  ;;  %5934 = vmatpush3.msra.mxu0 %v10463_v43 }
 0x3ef   :  { %854 = vmatprep.subr.mxu1 %v10464_v44  ;;  %5935 = vmatprep.subr.mxu0 %v10458_v0 }
 0x3f0   :  { %855 = vmatpush1.msra.mxu1 %v10465_v47  ;;  %5936 = vmatpush3.msra.mxu0 %v10466_v48 }
 0x3f1   :  { %856 = vmatprep.subr.mxu1 %v10467_v58  ;;  %5937 = vmatprep.subr.mxu0 %v10458_v0 }
 0x3f2   :  { %857 = vmatpush1.msra.mxu1 %v10468_v46  ;;  %5938 = vmatpush3.msra.mxu0 %v10469_v21 }
 0x3f3   :  { %858 = vmatprep.subr.mxu1 %v10470_v27  ;;  %5939 = vmatprep.subr.mxu0 %v10458_v0 }
 0x3f4   :  { %859 = vmatpush1.msra.mxu1 %v10471_v23  ;;  %5940 = vmatpush3.msra.mxu0 %v10472_v29 }
 0x3f5   :  { %860 = vmatprep.subr.mxu1 %v10473_v32  ;;  %5941 = vmatprep.subr.mxu0 %v10458_v0  ;;  %v7792_v32 = vld [vmem:[#allocation2 + $0x170] sm:$0xff] }
 0x3f6   :  { %861 = vmatpush1.msra.mxu1 %v10474_v24  ;;  %5942 = vmatpush3.msra.mxu0 %v7449_v51  ;;  %v10480_v51 = vld [vmem:[#allocation37_spill] sm:$0xff] }
 0x3f7   :  { %862 = vmatprep.subr.mxu1 %v10475_v34  ;;  %5943 = vmatprep.subr.mxu0 %v10458_v0  ;;  %v7794_v24 = vld [vmem:[#allocation2 + $0x168] sm:$0xff]  ;;  %v7796_v34 = vld [vmem:[#allocation2 + $0x178] sm:$0xff] }
 0x3f8   :  { %863 = vmatpush1.msra.mxu1 %v10476_v36  ;;  %5944 = vmatpush3.msra.mxu0 %v7459_v63  ;;  %v10483_v63 = vld [vmem:[#allocation40_spill] sm:$0xff]  ;;  %v7802_v36 = vld [vmem:[#allocation2 + $0x150] sm:$0xff] }
 0x3f9   :  { %864 = vmatprep.subr.mxu1 %v10477_v37  ;;  %5945 = vmatprep.subr.mxu0 %v10458_v0  ;;  %v7804_v37 = vld [vmem:[#allocation2 + $0x160] sm:$0xff] }
 0x3fa   :  { %865 = vmatpush1.msra.mxu1 %v10478_v17  ;;  %5946 = vmatpush3.msra.mxu0 %v7469_v50  ;;  %v10486_v50 = vld [vmem:[#allocation43_spill] sm:$0xff]  ;;  %v7808_v17 = vld [vmem:[#allocation2 + $0x140] sm:$0xff] }
 0x3fb   :  { %866 = vmatprep.subr.mxu1 %v10479_v19  ;;  %5947 = vmatprep.subr.mxu0 %v10458_v0  ;;  %v7810_v19 = vld [vmem:[#allocation2 + $0x148] sm:$0xff] }
 0x3fc   :  { %867 = vmatpush1.msra.mxu1 %v10480_v51  ;;  %5948 = vmatpush3.msra.mxu0 %v10481_v22  ;;  %v7814_v51 = vld [vmem:[#allocation2 + $0x138] sm:$0xff]  ;;  %v7818_v22 = vld [vmem:[#allocation2 + $0x128] sm:$0xff] }
 0x3fd   :  { %868 = vmatprep.subr.mxu1 %v10482_v25  ;;  %5949 = vmatprep.subr.mxu0 %v10458_v0  ;;  %v7820_v25 = vld [vmem:[#allocation2 + $0x130] sm:$0xff] }
 0x3fe   :  { %869 = vmatpush1.msra.mxu1 %v10483_v63  ;;  %5950 = vmatpush3.msra.mxu0 %v10484_v28  ;;  %v7824_v63 = vld [vmem:[#allocation2 + $0x120] sm:$0xff]  ;;  %v7828_v28 = vld [vmem:[#allocation2 + $0x110] sm:$0xff] }
 0x3ff   :  { %870 = vmatprep.subr.mxu1 %v10485_v31  ;;  %5951 = vmatprep.subr.mxu0 %v10458_v0  ;;  %v7830_v31 = vld [vmem:[#allocation2 + $0x118] sm:$0xff] }
 0x400   :  { %871 = vmatpush1.msra.mxu1 %v10486_v50  ;;  %5952 = vmatpush3.msra.mxu0 %v7493_v54  ;;  %v10492_v54 = vld [vmem:[#allocation50_spill] sm:$0xff]  ;;  %v7834_v50 = vld [vmem:[#allocation2 + $0x108] sm:$0xff] }
 0x401   :  { %872 = vmatprep.subr.mxu1 %v10487_v35  ;;  %5953 = vmatprep.subr.mxu0 %v10458_v0  ;;  %v7838_v35 = vld [vmem:[#allocation2 + $0xf8] sm:$0xff] }
 0x402   :  { %873 = vmatpush1.msra.mxu1 %v10488_v38  ;;  %5954 = vmatpush3.msra.mxu0 %v7500_v52  ;;  %v10494_v52 = vld [vmem:[#allocation52_spill] sm:$0xff] }
 0x403   :  { %874 = vmatprep.subr.mxu1 %v10489_v42  ;;  %5955 = vmatprep.subr.mxu0 %v10458_v0  ;;  %v7840_v38 = vld [vmem:[#allocation2 + $0x100] sm:$0xff]  ;;  %v7844_v42 = vld [vmem:[#allocation2 + $0xf0] sm:$0xff] }
 0x404   :  { %875 = vmatpush1.msra.mxu1 %v10490_v45  ;;  %5956 = vmatpush3.msra.mxu0 %v7506_v33  ;;  %v7848_v45 = vld [vmem:[#allocation2 + $0xe0] sm:$0xff] }
 0x405   :  { %876 = vmatprep.subr.mxu1 %v10491_v49  ;;  %5957 = vmatprep.subr.mxu0 %v10458_v0  ;;  %v7850_v49 = vld [vmem:[#allocation2 + $0xe8] sm:$0xff] }
 0x406   :  { %877 = vmatpush1.msra.mxu1 %v10492_v54  ;;  %5958 = vmatpush3.msra.mxu0 %v7510_v61  ;;  %v10496_v61 = vld [vmem:[#allocation56_spill] sm:$0xff]  ;;  %v7854_v54 = vld [vmem:[#allocation2 + $0xd8] sm:$0xff] }
 0x407   :  { %878 = vmatprep.subr.mxu1 %v10493_v53  ;;  %5959 = vmatprep.subr.mxu0 %v10458_v0  ;;  %v7858_v53 = vld [vmem:[#allocation2 + $0xc8] sm:$0xff] }
 0x408   :  { %879 = vmatpush1.msra.mxu1 %v10494_v52  ;;  %912 = vmatprep.mubr.f32.mxu1 %v10458_v0  ;;  %v7860_v52 = vld [vmem:[#allocation2 + $0xd0] sm:$0xff] }
 0x409   :  { %5960 = vmatpush3.msra.mxu0 %v7514_v60  ;;  %5961 = vmatprep.mubr.msk.f32.mxu0 %vm7113_vm0, %v10458_v0  ;;  %v10495_v60 = vld [vmem:[#allocation55_spill] sm:$0xff] }
 0x40a   :  { %913 = vmatmul.mubr.f32.vlgmr.msra.gmra.mxu1 %v7628_v39  ;;  %5962 = vmatmul.mubr.f32.vlgmr.msra.gmra.mxu0 %v7628_v39 }
 0x40b   :  { %5964 = vmatprep.subr.mxu1 %v10458_v0  ;;  %5996 = vmatprep.mubr.msk.f32.mxu1 %vm7113_vm0, %v10458_v0 }
 0x40c   :  { %5965 = vmatpush3.msra.mxu1 %v7554_v1  ;;  %1232 = vmatprep.mubr.f32.mxu0 %v10458_v0 }
 0x40d   :  { %5966 = vmatprep.subr.mxu1 %v10458_v0  ;;  %1168 = vmatprep.subr.mxu0 %v7792_v32 }
 0x40e   :  { %5967 = vmatpush3.msra.mxu1 %v7556_v2  ;;  %1169 = vmatpush1.msra.mxu0 %v7794_v24 }
 0x40f   :  { %5968 = vmatprep.subr.mxu1 %v10458_v0 }
 0x410   :  { %5969 = vmatpush3.msra.mxu1 %v7562_v3 }
 0x411   :  { %5970 = vmatprep.subr.mxu1 %v10458_v0 }
 0x412   :  { %5971 = vmatpush3.msra.mxu1 %v7566_v4 }
 0x413   :  { %5972 = vmatprep.subr.mxu1 %v10458_v0 }
 0x414   :  { %5973 = vmatpush3.msra.mxu1 %v7570_v5 }
 0x415   :  { %5974 = vmatprep.subr.mxu1 %v10458_v0 }
 0x416   :  { %5975 = vmatpush3.msra.mxu1 %v7574_v6  ;;  %v10497_v6 = vld [vmem:[#allocation57_spill] sm:$0xff] }
 0x417   :  { %5976 = vmatprep.subr.mxu1 %v10458_v0 }
 0x418   :  { %5977 = vmatpush3.msra.mxu1 %v7578_v7 }
 0x419   :  { %5978 = vmatprep.subr.mxu1 %v10458_v0 }
 0x41a   :  { %5979 = vmatpush3.msra.mxu1 %v7582_v8 }
 0x41b   :  { %5980 = vmatprep.subr.mxu1 %v10458_v0 }
 0x41c   :  { %5981 = vmatpush3.msra.mxu1 %v7584_v9 }
 0x41d   :  { %5982 = vmatprep.subr.mxu1 %v10458_v0 }
 0x41e   :  { %5983 = vmatpush3.msra.mxu1 %v7588_v10 }
 0x41f   :  { %5984 = vmatprep.subr.mxu1 %v10458_v0 }
 0x420   :  { %5985 = vmatpush3.msra.mxu1 %v7592_v11 }
 0x421   :  { %5986 = vmatprep.subr.mxu1 %v10458_v0 }
 0x422   :  { %5987 = vmatpush3.msra.mxu1 %v7596_v12 }
 0x423   :  { %5988 = vmatprep.subr.mxu1 %v10458_v0 }
 0x424   :  { %5989 = vmatpush3.msra.mxu1 %v7600_v13 }
 0x425   :  { %5990 = vmatprep.subr.mxu1 %v10458_v0 }
 0x426   :  { %5991 = vmatpush3.msra.mxu1 %v7604_v14 }
 0x427   :  { %5992 = vmatprep.subr.mxu1 %v10458_v0 }
 0x428   :  { %5993 = vmatpush3.msra.mxu1 %v10495_v60  ;;  %v7864_v60 = vld [vmem:[#allocation2 + $0xc0] sm:$0xff] }
 0x429   :  { %5994 = vmatprep.subr.mxu1 %v10458_v0 }
 0x42a   :  { %5995 = vmatpush3.msra.mxu1 %v10496_v61  ;;  %v7868_v61 = vld [vmem:[#allocation2 + $0xb0] sm:$0xff] }
 0x42b   :  { %5999 = vmatprep.subr.mxu1 %v10458_v0 }
 0x4a9   :  { %v793_v33 = vpop.f32.mrf.mxu0  ;;  %v722_v2 = vpop.f32.mrf.mxu1 }
 0x4ab   :  { %v5928_v1 = vpop.f32.mrf.mxu0  ;;  %v724_v3 = vpop.f32.mrf.mxu1 }
 0x4ac   :  { %v7874_v1 = vld [vmem:[#allocation2 + $0xa8] sm:$0xff] }
 0x4ca   :  { %v914_v4 = vpop.f32.mrf.mxu1  ;;  %v985_v5 = vpop.f32.mrf.mxu0 }
 0x4cb   :  { %v915_v7 = vadd.f32 %v914_v4, %v10497_v6  ;;  %v986_v16 = vadd.f32 %v985_v5, %v7624_v18  ;;  %v7884_v4 = vld [vmem:[#allocation2 + $0x90] sm:$0xff]  ;;  %v7888_v5 = vld [vmem:[#allocation2 + $0x80] sm:$0xff]  ;;  %v7890_v6 = vld [vmem:[#allocation2 + $0x88] sm:$0xff] }
 0x4cc   :  { %v916_v8 = vpop.f32.mrf.mxu1  ;;  %v5963_v9 = vpop.f32.mrf.mxu0 }
 0x4cd   :  { %v989_v10 = vadd.f32 %v915_v7, %v722_v2  ;;  %v917_v12 = vadd.f32 %v916_v8, %v7621_v30  ;;  %v7878_v2 = vld [vmem:[#allocation2 + $0x98] sm:$0xff]  ;;  %v7898_v8 = vld [vmem:[#allocation2 + $0x68] sm:$0xff]  ;;  %v7900_v9 = vld [vmem:[#allocation2 + $0x70] sm:$0xff] }
 0x4ce   :  { %v7894_v7 = vld [vmem:[#allocation2 + $0x78] sm:$0xff] }
 0x4cf   :  { %v5237_v11 = vmul.f32 -1.442695, %v989_v10  ;;  %v996_v13 = vadd.f32 %v917_v12, %v724_v3  ;;  %v7880_v3 = vld [vmem:[#allocation2 + $0xa0] sm:$0xff]  ;;  %v7910_v12 = vld [vmem:[#allocation2 + $0x58] sm:$0xff] }
 0x4d0   :  { %v7904_v10 = vld [vmem:[#allocation2 + $0x60] sm:$0xff] }
 0x4d1   :  { %6863 = vpow2.f32 %v5237_v11  ;;  %v5238_v14 = vmul.f32 -1.442695, %v996_v13  ;;  %v7908_v11 = vld [vmem:[#allocation2 + $0x50] sm:$0xff]  ;;  %v7914_v13 = vld [vmem:[#allocation2 + $0x48] sm:$0xff] }
 0x4d3   :  { %6865 = vpow2.f32 %v5238_v14  ;;  %v7918_v14 = vld [vmem:[#allocation2 + $0x38] sm:$0xff] }
 0x4de   :  { %v6864_v56 = vpop.eup %6863 }
 0x4df   :  { %v993_v57 = vadd.f32 1.0, %v6864_v56  ;;  %v7920_v56 = vld [vmem:[#allocation2 + $0x40] sm:$0xff] }
 0x4e0   :  { %v6866_v59 = vpop.eup %6865 }
 0x4e1   :  { %6867 = vrcp.f32 %v993_v57  ;;  %v1000_v62 = vadd.f32 1.0, %v6866_v59  ;;  %v7924_v57 = vld [vmem:[#allocation2 + $0x30] sm:$0xff] }
 0x4e3   :  { %6869 = vrcp.f32 %v1000_v62 }
 0x4ee   :  { %v6868_v20 = vpop.eup %6867 }
 0x4ef   :  { %v1003_v26 = vmul.f32 %v6868_v20, %v986_v16 }
 0x4f0   :  { %v6870_v43 = vpop.eup %6869 }
 0x4f1   :  { %v1004_v41 = vadd.f32 %v1003_v26, %v793_v33  ;;  %v1006_v44 = vsub.f32 1.0, %v6870_v43  ;;  %v1008_v48 = vmul.f32 %v6870_v43, %v7628_v39  ;;  %v7870_v33 = vld [vmem:[#allocation2 + $0xb8] sm:$0xff]  ;;  %v7934_v26 = vld [vmem:[#allocation2 + $0x20] sm:$0xff]  ;;  %v7939_v43 = vld [vmem:[#allocation2 + $0x28] sm:$0xff] }
 0x4f3   :  { %6871 = vtanh.f32 %v1004_v41  ;;  %v7937_v41 = vld [vmem:[#allocation2 + $0x18] sm:$0xff] }
 0x500   :  { %v6872_v47 = vpop.eup %6871 }
 0x501   :  { %v1007_v30 = vmul.f32 %v6872_v47, %v1006_v44  ;;  %v7943_v44 = vld [vmem:[#allocation2 + $0x8] sm:$0xff]  ;;  %v7947_v47 = vld [vmem:[#allocation2] sm:$0xff] }
 0x503   :  { %v7779_v58 = vadd.f32 %v1008_v48, %v1007_v30  ;;  %v7949_v30 = vld [vmem:[#allocation2 + $0x10] sm:$0xff] }
 0x504   :  { %v7953_v48 = vld [vmem:[#allocation5 + $0x170] sm:$0xff] }
 0x505   :  { %5997 = vmatmul.mubr.f32.vlgmr.msra.gmra.mxu1 %v7779_v58 }
 0x506   :  { %6031 = vmatprep.mubr.msk.f32.mxu1 %vm7113_vm0, %v10458_v0  ;;  %6000 = vmatpush3.msra.mxu1 %v7796_v34 }
 0x507   :  { %6001 = vmatprep.subr.mxu1 %v10458_v0 }
 0x508   :  { %6002 = vmatpush3.msra.mxu1 %v7804_v37 }
 0x509   :  { %6003 = vmatprep.subr.mxu1 %v10458_v0 }
 0x50a   :  { %6004 = vmatpush3.msra.mxu1 %v7810_v19 }
 0x50b   :  { %6005 = vmatprep.subr.mxu1 %v10458_v0 }
 0x50c   :  { %6006 = vmatpush3.msra.mxu1 %v7820_v25 }
 0x50d   :  { %6007 = vmatprep.subr.mxu1 %v10458_v0 }
 0x50e   :  { %6008 = vmatpush3.msra.mxu1 %v7830_v31 }
 0x50f   :  { %6009 = vmatprep.subr.mxu1 %v10458_v0 }
 0x510   :  { %6010 = vmatpush3.msra.mxu1 %v7840_v38 }
 0x511   :  { %6011 = vmatprep.subr.mxu1 %v10458_v0 }
 0x512   :  { %6012 = vmatpush3.msra.mxu1 %v7850_v49 }
 0x513   :  { %6013 = vmatprep.subr.mxu1 %v10458_v0 }
 0x514   :  { %6014 = vmatpush3.msra.mxu1 %v7860_v52 }
 0x515   :  { %6015 = vmatprep.subr.mxu1 %v10458_v0 }
 0x516   :  { %6016 = vmatpush3.msra.mxu1 %v7870_v33 }
 0x517   :  { %6017 = vmatprep.subr.mxu1 %v10458_v0 }
 0x518   :  { %6018 = vmatpush3.msra.mxu1 %v7880_v3 }
 0x519   :  { %6019 = vmatprep.subr.mxu1 %v10458_v0 }
 0x51a   :  { %6020 = vmatpush3.msra.mxu1 %v7890_v6 }
 0x51b   :  { %6021 = vmatprep.subr.mxu1 %v10458_v0 }
 0x51c   :  { %6022 = vmatpush3.msra.mxu1 %v7900_v9 }
 0x51d   :  { %6023 = vmatprep.subr.mxu1 %v10458_v0 }
 0x51e   :  { %6024 = vmatpush3.msra.mxu1 %v7910_v12 }
 0x51f   :  { %6025 = vmatprep.subr.mxu1 %v10458_v0 }
 0x520   :  { %6026 = vmatpush3.msra.mxu1 %v7920_v56 }
 0x521   :  { %6027 = vmatprep.subr.mxu1 %v10458_v0 }
 0x522   :  { %6028 = vmatpush3.msra.mxu1 %v7939_v43 }
 0x523   :  { %6029 = vmatprep.subr.mxu1 %v10458_v0 }
 0x524   :  { %6030 = vmatpush3.msra.mxu1 %v7949_v30 }
 0x525   :  { %6034 = vmatprep.subr.mxu1 %v10458_v0 }
 0x5c5   :  { %v1093_v46 = vpop.f32.mrf.mxu1 }
 0x5c6   :  { %v1094_v18 = vadd.f32 %v1093_v46, %v7665_v15  ;;  %v7800_v15 = vld [vmem:[#allocation2 + $0x158] sm:$0xff] }
 0x5c7   :  { %v5998_v21 = vpop.f32.mrf.mxu1  ;;  %1170 = vmatprep.subr.mxu0 %v7800_v15 }
 0x5c8   :  { %1098 = vst [vmem:[#allocation11 + $0x8] sm:$0xff] %v1094_v18  ;;  %1099 = vmax.xlane.f32.xlu1 %v1094_v18  ;;  %1171 = vmatpush1.msra.mxu0 %v7802_v36 }
 0x5c9   :  { %1172 = vmatprep.subr.mxu0 %v7808_v17 }
 0x5ca   :  { %1173 = vmatpush1.msra.mxu0 %v7814_v51 }
 0x5cb   :  { %1174 = vmatprep.subr.mxu0 %v7818_v22 }
 0x5cc   :  { %1175 = vmatpush1.msra.mxu0 %v7824_v63 }
 0x5cd   :  { %1176 = vmatprep.subr.mxu0 %v7828_v28 }
 0x5ce   :  { %1177 = vmatpush1.msra.mxu0 %v7834_v50 }
 0x5cf   :  { %1178 = vmatprep.subr.mxu0 %v7838_v35 }
 0x5d0   :  { %1179 = vmatpush1.msra.mxu0 %v7844_v42 }
 0x5d1   :  { %1180 = vmatprep.subr.mxu0 %v7848_v45 }
 0x5d2   :  { %1181 = vmatpush1.msra.mxu0 %v7854_v54 }
 0x5d3   :  { %1182 = vmatprep.subr.mxu0 %v7858_v53 }
 0x5d4   :  { %1183 = vmatpush1.msra.mxu0 %v7864_v60 }
 0x5d5   :  { %1184 = vmatprep.subr.mxu0 %v7868_v61 }
 0x5d6   :  { %1185 = vmatpush1.msra.mxu0 %v7874_v1 }
 0x5d7   :  { %1186 = vmatprep.subr.mxu0 %v7878_v2 }
 0x5d8   :  { %1187 = vmatpush1.msra.mxu0 %v7884_v4 }
 0x5d9   :  { %1188 = vmatprep.subr.mxu0 %v7888_v5 }
 0x5da   :  { %1189 = vmatpush1.msra.mxu0 %v7894_v7 }
 0x5db   :  { %1190 = vmatprep.subr.mxu0 %v7898_v8 }
 0x5dc   :  { %1191 = vmatpush1.msra.mxu0 %v7904_v10 }
 0x5dd   :  { %1192 = vmatprep.subr.mxu0 %v7908_v11 }
 0x5de   :  { %1193 = vmatpush1.msra.mxu0 %v7914_v13 }
 0x5df   :  { %1194 = vmatprep.subr.mxu0 %v7918_v14 }
 0x5e0   :  { %1195 = vmatpush1.msra.mxu0 %v7924_v57 }
 0x5e1   :  { %1196 = vmatprep.subr.mxu0 %v7934_v26 }
 0x5e2   :  { %1197 = vmatpush1.msra.mxu0 %v7937_v41 }
 0x5e3   :  { %1198 = vmatprep.subr.mxu0 %v7943_v44 }
 0x5e4   :  { %1199 = vmatpush1.msra.mxu0 %v7947_v47 }
 0x5e5   :  { %1360 = vmatprep.subr.mxu0 %v7953_v48 }
 0x651   :  { %v1100_v27 = vpop.xlane.xlu1 %1099 }
 0x652   :  { %vm1101_vm5 = vcmp.eq.f32.partialorder %v1094_v18, %v1100_v27 }
 0x653   :  { %v7786_v23 = vsel %vm1101_vm5, %v7295_v40, 128 }
 0x654   :  { %v1104_v39 = vshra.s32 %v7786_v23, 16  ;;  %v1103_v59 = vand.u32 65535, %v7786_v23 }
 0x656   :  { %v7789_v29 = vcvt.s32.f32 %v1104_v39  ;;  %v1105_v16 = vcvt.s32.f32 %v1103_v59  ;;  %v7957_v39 = vld [vmem:[#allocation5 + $0x168] sm:$0xff]  ;;  %v7962_v59 = vld [vmem:[#allocation5 + $0x158] sm:$0xff] }
 0x657   :  { %10498 = vst [vmem:[#allocation19_spill] sm:$0xff] %v7962_v59 }
 0x658   :  { %1107 = vmin.xlane.f32.xlu0 %v7789_v29 }
 0x6e1   :  { %v1108_v62 = vpop.xlane.xlu0 %1107 }
 0x6e2   :  { %vm1109_vm6 = vcmp.eq.f32.partialorder %v7789_v29, %v1108_v62  ;;  %v1114_v46 = vcvt.f32.s32 %v1108_v62  ;;  %v7959_v29 = vld [vmem:[#allocation5 + $0x178] sm:$0xff]  ;;  %v7972_v62 = vld [vmem:[#allocation5 + $0x140] sm:$0xff] }
 0x6e3   :  { %v1110_v20 = vsel %vm1109_vm6, %v1105_v16, inf  ;;  %v7966_v16 = vld [vmem:[#allocation5 + $0x150] sm:$0xff]  ;;  %10501 = vst [vmem:[#allocation21_spill] sm:$0xff] %v7972_v62 }
 0x6e4   :  { %1111 = vmin.xlane.f32.xlu1 %v1110_v20  ;;  %v1115_v21 = vshll.u32 %v1114_v46, 16  ;;  %10499 = vst [vmem:[#allocation33_spill] sm:$0xff] %v7966_v16  ;;  %v7968_v20 = vld [vmem:[#allocation5 + $0x160] sm:$0xff]  ;;  %v7976_v46 = vld [vmem:[#allocation5 + $0x138] sm:$0xff] }
 0x6e5   :  { %10500 = vst [vmem:[#allocation20_spill] sm:$0xff] %v7968_v20  ;;  %10502 = vst [vmem:[#allocation36_spill] sm:$0xff] %v7976_v46 }
 0x76d   :  { %v1112_v18 = vpop.xlane.xlu1 %1111 }
 0x76e   :  { %v1113_v27 = vcvt.f32.s32 %v1112_v18  ;;  %v7978_v18 = vld [vmem:[#allocation5 + $0x148] sm:$0xff] }
 0x76f   :  { %10503 = vst [vmem:[#allocation22_spill] sm:$0xff] %v7978_v18 }
 0x770   :  { %v1116_v23 = vadd.s32 %v1115_v21, %v1113_v27  ;;  %v7982_v21 = vld [vmem:[#allocation5 + $0x128] sm:$0xff]  ;;  %v7986_v27 = vld [vmem:[#allocation5 + $0x120] sm:$0xff] }
 0x771   :  { %10504 = vst [vmem:[#allocation23_spill] sm:$0xff] %v7982_v21  ;;  %10505 = vst [vmem:[#allocation39_spill] sm:$0xff] %v7986_v27 }
 0x772   :  { %vm1117_vm7 = vcmp.eq.s32.totalorder %v7295_v40, %v1116_v23  ;;  %v7988_v23 = vld [vmem:[#allocation5 + $0x130] sm:$0xff] }
 0x773   :  { %5240 = vmatmul.mubr.msk.f32.vlgmr.msra.gmra.mxu0 %vm1117_vm7, %v10432_v55  ;;  %6032 = vmatmul.mubr.msk.f32.vlgmr.msra.gmra.mxu1 %vm1117_vm7, %v10432_v55  ;;  %10506 = vst [vmem:[#allocation24_spill] sm:$0xff] %v7988_v23 }
 0x774   :  { %1361 = vmatpush1.msra.mxu0 %v7957_v39  ;;  %6035 = vmatpush3.msra.mxu1 %v7959_v29 }
 0x775   :  { %1362 = vmatprep.subr.mxu0 %v7962_v59  ;;  %6036 = vmatprep.subr.mxu1 %v10458_v0  ;;  %v7992_v59 = vld [vmem:[#allocation5 + $0x110] sm:$0xff] }
 0x776   :  { %1363 = vmatpush1.msra.mxu0 %v7966_v16  ;;  %6037 = vmatpush3.msra.mxu1 %v7968_v20  ;;  %10507 = vst [vmem:[#allocation25_spill] sm:$0xff] %v7992_v59  ;;  %v7996_v20 = vld [vmem:[#allocation5 + $0x108] sm:$0xff]  ;;  %v7998_v16 = vld [vmem:[#allocation5 + $0x118] sm:$0xff] }
 0x777   :  { %1364 = vmatprep.subr.mxu0 %v7972_v62  ;;  %6038 = vmatprep.subr.mxu1 %v10458_v0  ;;  %10508 = vst [vmem:[#allocation42_spill] sm:$0xff] %v7996_v20  ;;  %10509 = vst [vmem:[#allocation26_spill] sm:$0xff] %v7998_v16  ;;  %v8002_v62 = vld [vmem:[#allocation5 + $0xf8] sm:$0xff] }
 0x778   :  { %1365 = vmatpush1.msra.mxu0 %v7976_v46  ;;  %6039 = vmatpush3.msra.mxu1 %v7978_v18  ;;  %10510 = vst [vmem:[#allocation27_spill] sm:$0xff] %v8002_v62  ;;  %v8006_v18 = vld [vmem:[#allocation5 + $0xf0] sm:$0xff]  ;;  %v8008_v46 = vld [vmem:[#allocation5 + $0x100] sm:$0xff] }
 0x779   :  { %1366 = vmatprep.subr.mxu0 %v7982_v21  ;;  %6040 = vmatprep.subr.mxu1 %v10458_v0  ;;  %10511 = vst [vmem:[#allocation45_spill] sm:$0xff] %v8006_v18  ;;  %10512 = vst [vmem:[#allocation28_spill] sm:$0xff] %v8008_v46  ;;  %v8012_v21 = vld [vmem:[#allocation5 + $0xe0] sm:$0xff] }
 0x77a   :  { %1367 = vmatpush1.msra.mxu0 %v7986_v27  ;;  %6041 = vmatpush3.msra.mxu1 %v7988_v23  ;;  %10513 = vst [vmem:[#allocation29_spill] sm:$0xff] %v8012_v21  ;;  %v8016_v23 = vld [vmem:[#allocation5 + $0xd8] sm:$0xff]  ;;  %v8018_v27 = vld [vmem:[#allocation5 + $0xe8] sm:$0xff] }
 0x77b   :  { %1368 = vmatprep.subr.mxu0 %v7992_v59  ;;  %6042 = vmatprep.subr.mxu1 %v10458_v0  ;;  %10514 = vst [vmem:[#allocation30_spill] sm:$0xff] %v8016_v23  ;;  %10515 = vst [vmem:[#allocation31_spill] sm:$0xff] %v8018_v27  ;;  %v8022_v59 = vld [vmem:[#allocation5 + $0xc8] sm:$0xff] }
 0x77c   :  { %1369 = vmatpush1.msra.mxu0 %v7996_v20  ;;  %6043 = vmatpush3.msra.mxu1 %v7998_v16  ;;  %10516 = vst [vmem:[#allocation32_spill] sm:$0xff] %v8022_v59  ;;  %v8026_v16 = vld [vmem:[#allocation5 + $0xc0] sm:$0xff]  ;;  %v8028_v20 = vld [vmem:[#allocation5 + $0xd0] sm:$0xff] }
 0x77d   :  { %1370 = vmatprep.subr.mxu0 %v8002_v62  ;;  %6044 = vmatprep.subr.mxu1 %v10458_v0  ;;  %10517 = vst [vmem:[#allocation34_spill] sm:$0xff] %v8026_v16  ;;  %10518 = vst [vmem:[#allocation35_spill] sm:$0xff] %v8028_v20  ;;  %v8032_v62 = vld [vmem:[#allocation5 + $0xb0] sm:$0xff] }
 0x77e   :  { %1371 = vmatpush1.msra.mxu0 %v8006_v18  ;;  %6045 = vmatpush3.msra.mxu1 %v8008_v46  ;;  %10519 = vst [vmem:[#allocation37_spill] sm:$0xff] %v8032_v62  ;;  %v8036_v46 = vld [vmem:[#allocation5 + $0xa8] sm:$0xff]  ;;  %v8038_v18 = vld [vmem:[#allocation5 + $0xb8] sm:$0xff] }
 0x77f   :  { %1372 = vmatprep.subr.mxu0 %v8012_v21  ;;  %6046 = vmatprep.subr.mxu1 %v10458_v0  ;;  %10520 = vst [vmem:[#allocation53_spill] sm:$0xff] %v8036_v46  ;;  %10521 = vst [vmem:[#allocation38_spill] sm:$0xff] %v8038_v18  ;;  %v8042_v21 = vld [vmem:[#allocation5 + $0x98] sm:$0xff] }
 0x780   :  { %1373 = vmatpush1.msra.mxu0 %v8016_v23  ;;  %6047 = vmatpush3.msra.mxu1 %v8018_v27  ;;  %10522 = vst [vmem:[#allocation40_spill] sm:$0xff] %v8042_v21  ;;  %v8046_v27 = vld [vmem:[#allocation5 + $0x90] sm:$0xff]  ;;  %v8048_v23 = vld [vmem:[#allocation5 + $0xa0] sm:$0xff] }
 0x781   :  { %1374 = vmatprep.subr.mxu0 %v8022_v59  ;;  %6048 = vmatprep.subr.mxu1 %v10458_v0  ;;  %10523 = vst [vmem:[#allocation54_spill] sm:$0xff] %v8046_v27  ;;  %10524 = vst [vmem:[#allocation41_spill] sm:$0xff] %v8048_v23  ;;  %v8052_v59 = vld [vmem:[#allocation5 + $0x80] sm:$0xff] }
 0x782   :  { %1375 = vmatpush1.msra.mxu0 %v8026_v16  ;;  %6049 = vmatpush3.msra.mxu1 %v8028_v20  ;;  %10525 = vst [vmem:[#allocation43_spill] sm:$0xff] %v8052_v59  ;;  %v8056_v20 = vld [vmem:[#allocation5 + $0x78] sm:$0xff]  ;;  %v8058_v16 = vld [vmem:[#allocation5 + $0x88] sm:$0xff] }
 0x783   :  { %1376 = vmatprep.subr.mxu0 %v8032_v62  ;;  %6050 = vmatprep.subr.mxu1 %v10458_v0  ;;  %10526 = vst [vmem:[#allocation44_spill] sm:$0xff] %v8056_v20  ;;  %10527 = vst [vmem:[#allocation46_spill] sm:$0xff] %v8058_v16  ;;  %v8062_v62 = vld [vmem:[#allocation5 + $0x68] sm:$0xff] }
 0x784   :  { %1377 = vmatpush1.msra.mxu0 %v8036_v46  ;;  %6051 = vmatpush3.msra.mxu1 %v8038_v18  ;;  %10528 = vst [vmem:[#allocation47_spill] sm:$0xff] %v8062_v62  ;;  %v8066_v18 = vld [vmem:[#allocation5 + $0x60] sm:$0xff]  ;;  %v8068_v46 = vld [vmem:[#allocation5 + $0x70] sm:$0xff] }
 0x785   :  { %1378 = vmatprep.subr.mxu0 %v8042_v21  ;;  %6052 = vmatprep.subr.mxu1 %v10458_v0  ;;  %10529 = vst [vmem:[#allocation48_spill] sm:$0xff] %v8066_v18  ;;  %10530 = vst [vmem:[#allocation49_spill] sm:$0xff] %v8068_v46  ;;  %v8072_v21 = vld [vmem:[#allocation5 + $0x50] sm:$0xff] }
 0x786   :  { %1379 = vmatpush1.msra.mxu0 %v8046_v27  ;;  %6053 = vmatpush3.msra.mxu1 %v8048_v23  ;;  %10531 = vst [vmem:[#allocation50_spill] sm:$0xff] %v8072_v21  ;;  %v8076_v23 = vld [vmem:[#allocation5 + $0x48] sm:$0xff]  ;;  %v8078_v27 = vld [vmem:[#allocation5 + $0x58] sm:$0xff] }
 0x787   :  { %1380 = vmatprep.subr.mxu0 %v8052_v59  ;;  %6054 = vmatprep.subr.mxu1 %v10458_v0  ;;  %10532 = vst [vmem:[#allocation51_spill] sm:$0xff] %v8078_v27  ;;  %v8082_v59 = vld [vmem:[#allocation5 + $0x38] sm:$0xff] }
 0x788   :  { %1381 = vmatpush1.msra.mxu0 %v8056_v20  ;;  %6055 = vmatpush3.msra.mxu1 %v8058_v16  ;;  %10533 = vst [vmem:[#allocation52_spill] sm:$0xff] %v8082_v59  ;;  %v8086_v16 = vld [vmem:[#allocation5 + $0x30] sm:$0xff]  ;;  %v8088_v20 = vld [vmem:[#allocation5 + $0x40] sm:$0xff] }
 0x789   :  { %1382 = vmatprep.subr.mxu0 %v8062_v62  ;;  %6056 = vmatprep.subr.mxu1 %v10458_v0  ;;  %v8092_v62 = vld [vmem:[#allocation5 + $0x20] sm:$0xff] }
 0x78a   :  { %1383 = vmatpush1.msra.mxu0 %v8066_v18  ;;  %6057 = vmatpush3.msra.mxu1 %v8068_v46  ;;  %v8096_v46 = vld [vmem:[#allocation5 + $0x18] sm:$0xff]  ;;  %v8098_v18 = vld [vmem:[#allocation5 + $0x28] sm:$0xff] }
 0x78b   :  { %1384 = vmatprep.subr.mxu0 %v8072_v21  ;;  %6058 = vmatprep.subr.mxu1 %v10458_v0  ;;  %v8102_v21 = vld [vmem:[#allocation5 + $0x8] sm:$0xff] }
 0x78c   :  { %1385 = vmatpush1.msra.mxu0 %v8076_v23  ;;  %6059 = vmatpush3.msra.mxu1 %v8078_v27  ;;  %v8106_v27 = vld [vmem:[#allocation5] sm:$0xff] }
 0x78d   :  { %1386 = vmatprep.subr.mxu0 %v8082_v59  ;;  %6060 = vmatprep.subr.mxu1 %v10458_v0  ;;  %v8110_v59 = vld [vmem:[#allocation5 + $0x10] sm:$0xff] }
 0x78e   :  { %1387 = vmatpush1.msra.mxu0 %v8086_v16  ;;  %6061 = vmatpush3.msra.mxu1 %v8088_v20 }
 0x78f   :  { %1388 = vmatprep.subr.mxu0 %v8092_v62  ;;  %6062 = vmatprep.subr.mxu1 %v10458_v0 }
 0x790   :  { %1389 = vmatpush1.msra.mxu0 %v8096_v46  ;;  %6063 = vmatpush3.msra.mxu1 %v8098_v18 }
 0x791   :  { %1390 = vmatprep.subr.mxu0 %v8102_v21  ;;  %6064 = vmatprep.subr.mxu1 %v10458_v0 }
 0x792   :  { %1391 = vmatpush1.msra.mxu0 %v8106_v27  ;;  %1424 = vmatprep.mubr.f32.mxu0 %v10458_v0 }
 0x793   :  { %6065 = vmatpush3.msra.mxu1 %v8110_v59  ;;  %6066 = vmatprep.mubr.msk.f32.mxu1 %vm7113_vm0, %v10458_v0 }
 0x794   :  { %1425 = vmatmul.mubr.f32.vlgmr.msra.gmra.mxu0 %v7779_v58  ;;  %6067 = vmatmul.mubr.f32.vlgmr.msra.gmra.mxu1 %v7779_v58 }
 0x795   :  { %6069 = vmatprep.subr.mxu0 %v10458_v0  ;;  %6101 = vmatprep.mubr.msk.f32.mxu0 %vm7113_vm0, %v10458_v0 }
 0x796   :  { %1680 = vmatprep.subr.mxu1 %v7792_v32  ;;  %1744 = vmatprep.mubr.f32.mxu1 %v10458_v0  ;;  %v8158_v32 = vld [vmem:[#allocation8 + $0x78] sm:$0xff] }
 0x797   :  { %1681 = vmatpush1.msra.mxu1 %v7794_v24  ;;  %6070 = vmatpush3.msra.mxu0 %v8158_v32  ;;  %v8162_v24 = vld [vmem:[#allocation8 + $0x70] sm:$0xff] }
 0x798   :  { %1682 = vmatprep.subr.mxu1 %v7800_v15  ;;  %6071 = vmatprep.subr.mxu0 %v10458_v0  ;;  %v8166_v15 = vld [vmem:[#allocation8 + $0x68] sm:$0xff] }
 0x799   :  { %1683 = vmatpush1.msra.mxu1 %v7802_v36  ;;  %6072 = vmatpush3.msra.mxu0 %v8162_v24  ;;  %v8170_v36 = vld [vmem:[#allocation8 + $0x60] sm:$0xff] }
 0x79a   :  { %1684 = vmatprep.subr.mxu1 %v7808_v17  ;;  %6073 = vmatprep.subr.mxu0 %v10458_v0  ;;  %v8174_v17 = vld [vmem:[#allocation8 + $0x58] sm:$0xff] }
 0x79b   :  { %1685 = vmatpush1.msra.mxu1 %v7814_v51  ;;  %6074 = vmatpush3.msra.mxu0 %v8166_v15  ;;  %v8178_v51 = vld [vmem:[#allocation8 + $0x50] sm:$0xff] }
 0x79c   :  { %1686 = vmatprep.subr.mxu1 %v7818_v22  ;;  %6075 = vmatprep.subr.mxu0 %v10458_v0  ;;  %v8182_v22 = vld [vmem:[#allocation8 + $0x48] sm:$0xff] }
 0x79d   :  { %1687 = vmatpush1.msra.mxu1 %v7824_v63  ;;  %6076 = vmatpush3.msra.mxu0 %v8170_v36  ;;  %v8186_v63 = vld [vmem:[#allocation8 + $0x40] sm:$0xff] }
 0x79e   :  { %1688 = vmatprep.subr.mxu1 %v7828_v28  ;;  %6077 = vmatprep.subr.mxu0 %v10458_v0  ;;  %v8188_v28 = vld [vmem:[#allocation8 + $0x38] sm:$0xff] }
 0x79f   :  { %1689 = vmatpush1.msra.mxu1 %v7834_v50  ;;  %6078 = vmatpush3.msra.mxu0 %v8174_v17  ;;  %v8192_v50 = vld [vmem:[#allocation8 + $0x30] sm:$0xff] }
 0x7a0   :  { %1690 = vmatprep.subr.mxu1 %v7838_v35  ;;  %6079 = vmatprep.subr.mxu0 %v10458_v0  ;;  %v8196_v35 = vld [vmem:[#allocation8 + $0x28] sm:$0xff] }
 0x7a1   :  { %1691 = vmatpush1.msra.mxu1 %v7844_v42  ;;  %6080 = vmatpush3.msra.mxu0 %v8178_v51  ;;  %v8200_v42 = vld [vmem:[#allocation8 + $0x20] sm:$0xff] }
 0x7a2   :  { %1692 = vmatprep.subr.mxu1 %v7848_v45  ;;  %6081 = vmatprep.subr.mxu0 %v10458_v0  ;;  %v8204_v45 = vld [vmem:[#allocation8 + $0x18] sm:$0xff] }
 0x7a3   :  { %1693 = vmatpush1.msra.mxu1 %v7854_v54  ;;  %6082 = vmatpush3.msra.mxu0 %v8182_v22  ;;  %10534 = vst [vmem:[#allocation55_spill] sm:$0xff] %v8204_v45  ;;  %v8208_v54 = vld [vmem:[#allocation8 + $0x10] sm:$0xff] }
 0x7a4   :  { %1694 = vmatprep.subr.mxu1 %v7858_v53  ;;  %6083 = vmatprep.subr.mxu0 %v10458_v0  ;;  %10535 = vst [vmem:[#allocation56_spill] sm:$0xff] %v8208_v54  ;;  %v8212_v53 = vld [vmem:[#allocation8 + $0x8] sm:$0xff] }
 0x7a5   :  { %1695 = vmatpush1.msra.mxu1 %v7864_v60  ;;  %6084 = vmatpush3.msra.mxu0 %v8186_v63  ;;  %10536 = vst [vmem:[#allocation57_spill] sm:$0xff] %v8212_v53  ;;  %v8216_v60 = vld [vmem:[#allocation8] sm:$0xff] }
 0x7a6   :  { %1696 = vmatprep.subr.mxu1 %v7868_v61  ;;  %6085 = vmatprep.subr.mxu0 %v10458_v0  ;;  %10537 = vst [vmem:[#allocation58_spill] sm:$0xff] %v8216_v60 }
 0x7a7   :  { %1697 = vmatpush1.msra.mxu1 %v7874_v1  ;;  %6086 = vmatpush3.msra.mxu0 %v8188_v28 }
 0x7a8   :  { %1698 = vmatprep.subr.mxu1 %v7878_v2  ;;  %6087 = vmatprep.subr.mxu0 %v10458_v0 }
 0x7a9   :  { %1699 = vmatpush1.msra.mxu1 %v7884_v4  ;;  %6088 = vmatpush3.msra.mxu0 %v8192_v50 }
 0x7aa   :  { %1700 = vmatprep.subr.mxu1 %v7888_v5  ;;  %6089 = vmatprep.subr.mxu0 %v10458_v0  ;;  %v8222_v5 = vld [vmem:[#allocation7] sm:$0xff] }
 0x7ab   :  { %1701 = vmatpush1.msra.mxu1 %v7894_v7  ;;  %6090 = vmatpush3.msra.mxu0 %v8196_v35  ;;  %10538 = vst [vmem:[#allocation59_spill] sm:$0xff] %v8222_v5 }
 0x7ac   :  { %1702 = vmatprep.subr.mxu1 %v7898_v8  ;;  %6091 = vmatprep.subr.mxu0 %v10458_v0 }
 0x7ad   :  { %1703 = vmatpush1.msra.mxu1 %v7904_v10  ;;  %6092 = vmatpush3.msra.mxu0 %v8200_v42 }
 0x7ae   :  { %1704 = vmatprep.subr.mxu1 %v7908_v11  ;;  %6093 = vmatprep.subr.mxu0 %v10458_v0  ;;  %v8225_v11 = vld [vmem:[#allocation7 + $0x8] sm:$0xff] }
 0x7af   :  { %1705 = vmatpush1.msra.mxu1 %v7914_v13  ;;  %6094 = vmatpush3.msra.mxu0 %v8204_v45 }
 0x7b0   :  { %1706 = vmatprep.subr.mxu1 %v7918_v14  ;;  %6095 = vmatprep.subr.mxu0 %v10458_v0 }
 0x7b1   :  { %1707 = vmatpush1.msra.mxu1 %v7924_v57  ;;  %6096 = vmatpush3.msra.mxu0 %v8208_v54 }
 0x7b2   :  { %1708 = vmatprep.subr.mxu1 %v7934_v26  ;;  %6097 = vmatprep.subr.mxu0 %v10458_v0 }
 0x7b3   :  { %1709 = vmatpush1.msra.mxu1 %v7937_v41  ;;  %6098 = vmatpush3.msra.mxu0 %v8212_v53  ;;  %v8228_v53 = vld [vmem:[#allocation7 + $0x10] sm:$0xff] }
 0x7b4   :  { %1710 = vmatprep.subr.mxu1 %v7943_v44  ;;  %6099 = vmatprep.subr.mxu0 %v10458_v0 }
 0x7b5   :  { %1711 = vmatpush1.msra.mxu1 %v7947_v47  ;;  %6100 = vmatpush3.msra.mxu0 %v8216_v60 }
 0x7b6   :  { %1872 = vmatprep.subr.mxu1 %v7953_v48  ;;  %6104 = vmatprep.subr.mxu0 %v10458_v0 }
 0x833   :  { %v1305_v61 = vpop.f32.mrf.mxu1  ;;  %v1234_v2 = vpop.f32.mrf.mxu0 }
 0x835   :  { %v6033_v1 = vpop.f32.mrf.mxu1  ;;  %v1236_v4 = vpop.f32.mrf.mxu0 }
 0x854   :  { %v1426_v7 = vpop.f32.mrf.mxu0  ;;  %v1497_v8 = vpop.f32.mrf.mxu1 }
 0x855   :  { %v1427_v10 = vadd.f32 %v1426_v7, %v8222_v5  ;;  %v1498_v7 = vadd.f32 %v1497_v8, %v8228_v53  ;;  %v10544_v8 = vld [vmem:[#allocation22_spill] sm:$0xff] }
 0x856   :  { %v1428_v13 = vpop.f32.mrf.mxu0  ;;  %v6068_v14 = vpop.f32.mrf.mxu1 }
 0x857   :  { %v1501_v57 = vadd.f32 %v1427_v10, %v1234_v2  ;;  %v1429_v41 = vadd.f32 %v1428_v13, %v8225_v11 }
 0x859   :  { %v5242_v26 = vmul.f32 -1.442695, %v1501_v57  ;;  %v1508_v44 = vadd.f32 %v1429_v41, %v1236_v4  ;;  %v10545_v41 = vld [vmem:[#allocation23_spill] sm:$0xff] }
 0x85b   :  { %6873 = vpow2.f32 %v5242_v26  ;;  %v5243_v47 = vmul.f32 -1.442695, %v1508_v44  ;;  %v10548_v44 = vld [vmem:[#allocation25_spill] sm:$0xff] }
 0x85d   :  { %6875 = vpow2.f32 %v5243_v47  ;;  %v10549_v47 = vld [vmem:[#allocation42_spill] sm:$0xff] }
 0x868   :  { %v6874_v48 = vpop.eup %6873 }
 0x869   :  { %v1505_v1 = vadd.f32 1.0, %v6874_v48  ;;  %v10550_v48 = vld [vmem:[#allocation26_spill] sm:$0xff] }
 0x86a   :  { %v6876_v60 = vpop.eup %6875 }
 0x86b   :  { %6877 = vrcp.f32 %v1505_v1  ;;  %v1512_v54 = vadd.f32 1.0, %v6876_v60  ;;  %v10541_v60 = vld [vmem:[#allocation20_spill] sm:$0xff]  ;;  %v10551_v1 = vld [vmem:[#allocation27_spill] sm:$0xff] }
 0x86d   :  { %6879 = vrcp.f32 %v1512_v54  ;;  %v10540_v54 = vld [vmem:[#allocation33_spill] sm:$0xff] }
 0x878   :  { %v6878_v5 = vpop.eup %6877 }
 0x879   :  { %v1515_v45 = vmul.f32 %v6878_v5, %v1498_v7  ;;  %v10543_v5 = vld [vmem:[#allocation36_spill] sm:$0xff]  ;;  %v10552_v7 = vld [vmem:[#allocation45_spill] sm:$0xff] }
 0x87a   :  { %v6880_v10 = vpop.eup %6879 }
 0x87b   :  { %v1516_v2 = vadd.f32 %v1515_v45, %v1305_v61  ;;  %v1518_v13 = vsub.f32 1.0, %v6880_v10  ;;  %v1520_v57 = vmul.f32 %v6880_v10, %v7779_v58  ;;  %v8269_v58 = vld [vmem:[#allocation10] sm:$0xff]  ;;  %v10542_v61 = vld [vmem:[#allocation21_spill] sm:$0xff] }
 0x87c   :  { %v10539_v45 = vld [vmem:[#allocation19_spill] sm:$0xff]  ;;  %v10554_v10 = vld [vmem:[#allocation29_spill] sm:$0xff] }
 0x87d   :  { %6881 = vtanh.f32 %v1516_v2  ;;  %v10553_v2 = vld [vmem:[#allocation28_spill] sm:$0xff] }
 0x88a   :  { %v6882_v14 = vpop.eup %6881 }
 0x88b   :  { %v1519_v4 = vmul.f32 %v6882_v14, %v1518_v13  ;;  %v10555_v13 = vld [vmem:[#allocation30_spill] sm:$0xff]  ;;  %v10556_v14 = vld [vmem:[#allocation31_spill] sm:$0xff] }
 0x88d   :  { %v8232_v26 = vadd.f32 %v1520_v57, %v1519_v4  ;;  %v10557_v4 = vld [vmem:[#allocation32_spill] sm:$0xff]  ;;  %v10558_v57 = vld [vmem:[#allocation34_spill] sm:$0xff] }
 0x88f   :  { %6102 = vmatmul.mubr.f32.vlgmr.msra.gmra.mxu0 %v8232_v26 }
 0x890   :  { %6105 = vmatpush3.msra.mxu0 %v7796_v34  ;;  %6136 = vmatprep.mubr.msk.f32.mxu0 %vm7113_vm0, %v10458_v0 }
 0x891   :  { %6106 = vmatprep.subr.mxu0 %v10458_v0 }
 0x892   :  { %6107 = vmatpush3.msra.mxu0 %v7804_v37 }
 0x893   :  { %6108 = vmatprep.subr.mxu0 %v10458_v0 }
 0x894   :  { %6109 = vmatpush3.msra.mxu0 %v7810_v19 }
 0x895   :  { %6110 = vmatprep.subr.mxu0 %v10458_v0 }
 0x896   :  { %6111 = vmatpush3.msra.mxu0 %v7820_v25 }
 0x897   :  { %6112 = vmatprep.subr.mxu0 %v10458_v0 }
 0x898   :  { %6113 = vmatpush3.msra.mxu0 %v7830_v31 }
 0x899   :  { %6114 = vmatprep.subr.mxu0 %v10458_v0 }
 0x89a   :  { %6115 = vmatpush3.msra.mxu0 %v7840_v38 }
 0x89b   :  { %6116 = vmatprep.subr.mxu0 %v10458_v0 }
 0x89c   :  { %6117 = vmatpush3.msra.mxu0 %v7850_v49 }
 0x89d   :  { %6118 = vmatprep.subr.mxu0 %v10458_v0 }
 0x89e   :  { %6119 = vmatpush3.msra.mxu0 %v7860_v52 }
 0x89f   :  { %6120 = vmatprep.subr.mxu0 %v10458_v0 }
 0x8a0   :  { %6121 = vmatpush3.msra.mxu0 %v7870_v33 }
 0x8a1   :  { %6122 = vmatprep.subr.mxu0 %v10458_v0 }
 0x8a2   :  { %6123 = vmatpush3.msra.mxu0 %v7880_v3 }
 0x8a3   :  { %6124 = vmatprep.subr.mxu0 %v10458_v0 }
 0x8a4   :  { %6125 = vmatpush3.msra.mxu0 %v7890_v6 }
 0x8a5   :  { %6126 = vmatprep.subr.mxu0 %v10458_v0 }
 0x8a6   :  { %6127 = vmatpush3.msra.mxu0 %v7900_v9 }
 0x8a7   :  { %6128 = vmatprep.subr.mxu0 %v10458_v0 }
 0x8a8   :  { %6129 = vmatpush3.msra.mxu0 %v7910_v12 }
 0x8a9   :  { %6130 = vmatprep.subr.mxu0 %v10458_v0 }
 0x8aa   :  { %6131 = vmatpush3.msra.mxu0 %v7920_v56 }
 0x8ab   :  { %6132 = vmatprep.subr.mxu0 %v10458_v0 }
 0x8ac   :  { %6133 = vmatpush3.msra.mxu0 %v7939_v43 }
 0x8ad   :  { %6134 = vmatprep.subr.mxu0 %v10458_v0 }
 0x8ae   :  { %6135 = vmatpush3.msra.mxu0 %v7949_v30 }
 0x8af   :  { %6139 = vmatprep.subr.mxu0 %v10458_v0 }
 0x94f   :  { %v1605_v34 = vpop.f32.mrf.mxu0 }
 0x950   :  { %v1606_v37 = vadd.f32 %v1605_v34, %v8269_v58  ;;  %v10559_v34 = vld [vmem:[#allocation35_spill] sm:$0xff] }
 0x951   :  { %v6103_v19 = vpop.f32.mrf.mxu0 }
 0x952   :  { %1610 = vst [vmem:[#allocation11 + $0x10] sm:$0xff] %v1606_v37  ;;  %1611 = vmax.xlane.f32.xlu0 %v1606_v37  ;;  %v10561_v19 = vld [vmem:[#allocation53_spill] sm:$0xff] }
 0x9db   :  { %v1612_v25 = vpop.xlane.xlu0 %1611 }
 0x9dc   :  { %vm1613_vm8 = vcmp.eq.f32.partialorder %v1606_v37, %v1612_v25  ;;  %v10560_v37 = vld [vmem:[#allocation37_spill] sm:$0xff]  ;;  %v10562_v25 = vld [vmem:[#allocation38_spill] sm:$0xff] }
 0x9dd   :  { %v1614_v31 = vsel %vm1613_vm8, %v7295_v40, 128 }
 0x9de   :  { %v1616_v38 = vshra.s32 %v1614_v31, 16  ;;  %v1615_v52 = vand.u32 65535, %v1614_v31  ;;  %v10563_v31 = vld [vmem:[#allocation40_spill] sm:$0xff] }
 0x9e0   :  { %v1618_v49 = vcvt.s32.f32 %v1616_v38  ;;  %v1617_v3 = vcvt.s32.f32 %v1615_v52  ;;  %v10564_v38 = vld [vmem:[#allocation54_spill] sm:$0xff]  ;;  %v10566_v52 = vld [vmem:[#allocation43_spill] sm:$0xff] }
 0x9e2   :  { %1619 = vmin.xlane.f32.xlu1 %v1618_v49 }
 0xa6b   :  { %v1620_v33 = vpop.xlane.xlu1 %1619 }
 0xa6c   :  { %vm1621_vm9 = vcmp.eq.f32.partialorder %v1618_v49, %v1620_v33  ;;  %v1626_v9 = vcvt.f32.s32 %v1620_v33  ;;  %v10565_v49 = vld [vmem:[#allocation41_spill] sm:$0xff]  ;;  %v10567_v33 = vld [vmem:[#allocation44_spill] sm:$0xff] }
 0xa6d   :  { %v1622_v6 = vsel %vm1621_vm9, %v1617_v3, inf  ;;  %v10568_v3 = vld [vmem:[#allocation46_spill] sm:$0xff] }
 0xa6e   :  { %1623 = vmin.xlane.f32.xlu0 %v1622_v6  ;;  %v1627_v56 = vshll.u32 %v1626_v9, 16  ;;  %v10569_v6 = vld [vmem:[#allocation47_spill] sm:$0xff]  ;;  %v10570_v9 = vld [vmem:[#allocation48_spill] sm:$0xff] }
 0xaf7   :  { %v1624_v12 = vpop.xlane.xlu0 %1623 }
 0xaf8   :  { %v1625_v43 = vcvt.f32.s32 %v1624_v12  ;;  %v10571_v12 = vld [vmem:[#allocation49_spill] sm:$0xff] }
 0xafa   :  { %v1628_v30 = vadd.s32 %v1627_v56, %v1625_v43  ;;  %v10572_v56 = vld [vmem:[#allocation50_spill] sm:$0xff]  ;;  %v10573_v43 = vld [vmem:[#allocation51_spill] sm:$0xff] }
 0xafc   :  { %vm1629_vm10 = vcmp.eq.s32.totalorder %v7295_v40, %v1628_v30  ;;  %v10574_v30 = vld [vmem:[#allocation52_spill] sm:$0xff] }
 0xafd   :  { %5245 = vmatmul.mubr.msk.f32.vlgmr.msra.gmra.mxu1 %vm1629_vm10, %v10432_v55  ;;  %6137 = vmatmul.mubr.msk.f32.vlgmr.msra.gmra.mxu0 %vm1629_vm10, %v10432_v55 }
 0xafe   :  { %1873 = vmatpush1.msra.mxu1 %v7957_v39  ;;  %6140 = vmatpush3.msra.mxu0 %v7959_v29  ;;  %v10546_v39 = vld [vmem:[#allocation39_spill] sm:$0xff]  ;;  %v10547_v29 = vld [vmem:[#allocation24_spill] sm:$0xff] }
 0xaff   :  { %1874 = vmatprep.subr.mxu1 %v10539_v45  ;;  %6141 = vmatprep.subr.mxu0 %v10458_v0 }
 0xb00   :  { %1875 = vmatpush1.msra.mxu1 %v10540_v54  ;;  %6142 = vmatpush3.msra.mxu0 %v10541_v60 }
 0xb01   :  { %1876 = vmatprep.subr.mxu1 %v10542_v61  ;;  %6143 = vmatprep.subr.mxu0 %v10458_v0 }
 0xb02   :  { %1877 = vmatpush1.msra.mxu1 %v10543_v5  ;;  %6144 = vmatpush3.msra.mxu0 %v10544_v8 }
 0xb03   :  { %1878 = vmatprep.subr.mxu1 %v10545_v41  ;;  %6145 = vmatprep.subr.mxu0 %v10458_v0 }
 0xb04   :  { %1879 = vmatpush1.msra.mxu1 %v10546_v39  ;;  %6146 = vmatpush3.msra.mxu0 %v10547_v29 }
 0xb05   :  { %1880 = vmatprep.subr.mxu1 %v10548_v44  ;;  %6147 = vmatprep.subr.mxu0 %v10458_v0 }
 0xb06   :  { %1881 = vmatpush1.msra.mxu1 %v10549_v47  ;;  %6148 = vmatpush3.msra.mxu0 %v10550_v48 }
 0xb07   :  { %1882 = vmatprep.subr.mxu1 %v10551_v1  ;;  %6149 = vmatprep.subr.mxu0 %v10458_v0 }
 0xb08   :  { %1883 = vmatpush1.msra.mxu1 %v10552_v7  ;;  %6150 = vmatpush3.msra.mxu0 %v10553_v2 }
 0xb09   :  { %1884 = vmatprep.subr.mxu1 %v10554_v10  ;;  %6151 = vmatprep.subr.mxu0 %v10458_v0 }
 0xb0a   :  { %1885 = vmatpush1.msra.mxu1 %v10555_v13  ;;  %6152 = vmatpush3.msra.mxu0 %v10556_v14  ;;  %v8396_v13 = vld [vmem:[#allocation2 + $0x170] sm:$0xff]  ;;  %v8398_v14 = vld [vmem:[#allocation2 + $0x168] sm:$0xff] }
 0xb0b   :  { %1886 = vmatprep.subr.mxu1 %v10557_v4  ;;  %6153 = vmatprep.subr.mxu0 %v10458_v0  ;;  %v8400_v4 = vld [vmem:[#allocation2 + $0x178] sm:$0xff] }
 0xb0c   :  { %1887 = vmatpush1.msra.mxu1 %v10558_v57  ;;  %6154 = vmatpush3.msra.mxu0 %v10559_v34  ;;  %v8406_v57 = vld [vmem:[#allocation2 + $0x150] sm:$0xff]  ;;  %v8408_v34 = vld [vmem:[#allocation2 + $0x160] sm:$0xff] }
 0xb0d   :  { %1888 = vmatprep.subr.mxu1 %v10560_v37  ;;  %6155 = vmatprep.subr.mxu0 %v10458_v0  ;;  %v8412_v37 = vld [vmem:[#allocation2 + $0x140] sm:$0xff] }
 0xb0e   :  { %1889 = vmatpush1.msra.mxu1 %v10561_v19  ;;  %6156 = vmatpush3.msra.mxu0 %v10562_v25  ;;  %v8414_v19 = vld [vmem:[#allocation2 + $0x148] sm:$0xff]  ;;  %v8418_v25 = vld [vmem:[#allocation2 + $0x138] sm:$0xff] }
 0xb0f   :  { %1890 = vmatprep.subr.mxu1 %v10563_v31  ;;  %6157 = vmatprep.subr.mxu0 %v10458_v0  ;;  %v8422_v31 = vld [vmem:[#allocation2 + $0x128] sm:$0xff] }
 0xb10   :  { %1891 = vmatpush1.msra.mxu1 %v10564_v38  ;;  %6158 = vmatpush3.msra.mxu0 %v10565_v49  ;;  %v8424_v38 = vld [vmem:[#allocation2 + $0x130] sm:$0xff]  ;;  %v8428_v49 = vld [vmem:[#allocation2 + $0x120] sm:$0xff] }
 0xb11   :  { %1892 = vmatprep.subr.mxu1 %v10566_v52  ;;  %6159 = vmatprep.subr.mxu0 %v10458_v0  ;;  %v8432_v52 = vld [vmem:[#allocation2 + $0x110] sm:$0xff] }
 0xb12   :  { %1893 = vmatpush1.msra.mxu1 %v10567_v33  ;;  %6160 = vmatpush3.msra.mxu0 %v10568_v3  ;;  %v8434_v33 = vld [vmem:[#allocation2 + $0x118] sm:$0xff]  ;;  %v8438_v3 = vld [vmem:[#allocation2 + $0x108] sm:$0xff] }
 0xb13   :  { %1894 = vmatprep.subr.mxu1 %v10569_v6  ;;  %6161 = vmatprep.subr.mxu0 %v10458_v0  ;;  %v8442_v6 = vld [vmem:[#allocation2 + $0xf8] sm:$0xff] }
 0xb14   :  { %1895 = vmatpush1.msra.mxu1 %v10570_v9  ;;  %6162 = vmatpush3.msra.mxu0 %v10571_v12  ;;  %v8444_v9 = vld [vmem:[#allocation2 + $0x100] sm:$0xff]  ;;  %v8448_v12 = vld [vmem:[#allocation2 + $0xf0] sm:$0xff] }
 0xb15   :  { %1896 = vmatprep.subr.mxu1 %v10572_v56  ;;  %6163 = vmatprep.subr.mxu0 %v10458_v0  ;;  %v8452_v56 = vld [vmem:[#allocation2 + $0xe0] sm:$0xff] }
 0xb16   :  { %1897 = vmatpush1.msra.mxu1 %v8076_v23  ;;  %6164 = vmatpush3.msra.mxu0 %v10573_v43  ;;  %v8454_v43 = vld [vmem:[#allocation2 + $0xe8] sm:$0xff] }
 0xb17   :  { %1898 = vmatprep.subr.mxu1 %v10574_v30  ;;  %6165 = vmatprep.subr.mxu0 %v10458_v0  ;;  %v8458_v30 = vld [vmem:[#allocation2 + $0xd8] sm:$0xff] }
 0xb18   :  { %1899 = vmatpush1.msra.mxu1 %v8086_v16  ;;  %6166 = vmatpush3.msra.mxu0 %v8088_v20  ;;  %v10576_v16 = vld [vmem:[#allocation56_spill] sm:$0xff]  ;;  %v10577_v20 = vld [vmem:[#allocation57_spill] sm:$0xff] }
 0xb19   :  { %1900 = vmatprep.subr.mxu1 %v8092_v62  ;;  %6167 = vmatprep.subr.mxu0 %v10458_v0  ;;  %v10578_v62 = vld [vmem:[#allocation58_spill] sm:$0xff] }
 0xb1a   :  { %1901 = vmatpush1.msra.mxu1 %v8096_v46  ;;  %6168 = vmatpush3.msra.mxu0 %v8098_v18 }
 0xb1b   :  { %1902 = vmatprep.subr.mxu1 %v8102_v21  ;;  %6169 = vmatprep.subr.mxu0 %v10458_v0 }
 0xb1c   :  { %1903 = vmatpush1.msra.mxu1 %v8106_v27  ;;  %1936 = vmatprep.mubr.f32.mxu1 %v10458_v0 }
 0xb1d   :  { %6170 = vmatpush3.msra.mxu0 %v8110_v59  ;;  %6171 = vmatprep.mubr.msk.f32.mxu0 %vm7113_vm0, %v10458_v0  ;;  %v10575_v59 = vld [vmem:[#allocation55_spill] sm:$0xff] }
 0xb1e   :  { %1937 = vmatmul.mubr.f32.vlgmr.msra.gmra.mxu1 %v8232_v26  ;;  %6172 = vmatmul.mubr.f32.vlgmr.msra.gmra.mxu0 %v8232_v26 }
 0xb1f   :  { %6174 = vmatprep.subr.mxu1 %v10458_v0  ;;  %6206 = vmatprep.mubr.msk.f32.mxu1 %vm7113_vm0, %v10458_v0 }
 0xb20   :  { %6175 = vmatpush3.msra.mxu1 %v8158_v32  ;;  %2256 = vmatprep.mubr.f32.mxu0 %v10458_v0 }
 0xb21   :  { %6176 = vmatprep.subr.mxu1 %v10458_v0  ;;  %2192 = vmatprep.subr.mxu0 %v8396_v13 }
 0xb22   :  { %6177 = vmatpush3.msra.mxu1 %v8162_v24  ;;  %v10579_v24 = vld [vmem:[#allocation59_spill] sm:$0xff]  ;;  %2193 = vmatpush1.msra.mxu0 %v8398_v14 }
 0xb23   :  { %6178 = vmatprep.subr.mxu1 %v10458_v0 }
 0xb24   :  { %6179 = vmatpush3.msra.mxu1 %v8166_v15 }
 0xb25   :  { %6180 = vmatprep.subr.mxu1 %v10458_v0 }
 0xb26   :  { %6181 = vmatpush3.msra.mxu1 %v8170_v36 }
 0xb27   :  { %6182 = vmatprep.subr.mxu1 %v10458_v0 }
 0xb28   :  { %6183 = vmatpush3.msra.mxu1 %v8174_v17 }
 0xb29   :  { %6184 = vmatprep.subr.mxu1 %v10458_v0 }
 0xb2a   :  { %6185 = vmatpush3.msra.mxu1 %v8178_v51 }
 0xb2b   :  { %6186 = vmatprep.subr.mxu1 %v10458_v0 }
 0xb2c   :  { %6187 = vmatpush3.msra.mxu1 %v8182_v22 }
 0xb2d   :  { %6188 = vmatprep.subr.mxu1 %v10458_v0 }
 0xb2e   :  { %6189 = vmatpush3.msra.mxu1 %v8186_v63 }
 0xb2f   :  { %6190 = vmatprep.subr.mxu1 %v10458_v0 }
 0xb30   :  { %6191 = vmatpush3.msra.mxu1 %v8188_v28 }
 0xb31   :  { %6192 = vmatprep.subr.mxu1 %v10458_v0 }
 0xb32   :  { %6193 = vmatpush3.msra.mxu1 %v8192_v50 }
 0xb33   :  { %6194 = vmatprep.subr.mxu1 %v10458_v0 }
 0xb34   :  { %6195 = vmatpush3.msra.mxu1 %v8196_v35 }
 0xb35   :  { %6196 = vmatprep.subr.mxu1 %v10458_v0 }
 0xb36   :  { %6197 = vmatpush3.msra.mxu1 %v8200_v42 }
 0xb37   :  { %6198 = vmatprep.subr.mxu1 %v10458_v0 }
 0xb38   :  { %6199 = vmatpush3.msra.mxu1 %v10575_v59  ;;  %v8462_v59 = vld [vmem:[#allocation2 + $0xc8] sm:$0xff] }
 0xb39   :  { %6200 = vmatprep.subr.mxu1 %v10458_v0 }
 0xb3a   :  { %6201 = vmatpush3.msra.mxu1 %v10576_v16  ;;  %v8464_v16 = vld [vmem:[#allocation2 + $0xd0] sm:$0xff] }
 0xb3b   :  { %6202 = vmatprep.subr.mxu1 %v10458_v0 }
 0xb3c   :  { %6203 = vmatpush3.msra.mxu1 %v10577_v20  ;;  %v8468_v20 = vld [vmem:[#allocation2 + $0xc0] sm:$0xff] }
 0xb3d   :  { %6204 = vmatprep.subr.mxu1 %v10458_v0 }
 0xb3e   :  { %6205 = vmatpush3.msra.mxu1 %v10578_v62  ;;  %v8472_v62 = vld [vmem:[#allocation2 + $0xb0] sm:$0xff] }
 0xb3f   :  { %6209 = vmatprep.subr.mxu1 %v10458_v0 }
 0xbbd   :  { %v1817_v46 = vpop.f32.mrf.mxu0  ;;  %v1746_v21 = vpop.f32.mrf.mxu1 }
 0xbbf   :  { %v6138_v18 = vpop.f32.mrf.mxu0  ;;  %v1748_v27 = vpop.f32.mrf.mxu1 }
 0xbc0   :  { %v8478_v18 = vld [vmem:[#allocation2 + $0xa8] sm:$0xff] }
 0xbde   :  { %v1938_v23 = vpop.f32.mrf.mxu1  ;;  %v2009_v32 = vpop.f32.mrf.mxu0 }
 0xbdf   :  { %v1939_v15 = vadd.f32 %v1938_v23, %v10579_v24  ;;  %v2010_v60 = vadd.f32 %v2009_v32, %v8228_v53  ;;  %v8488_v23 = vld [vmem:[#allocation2 + $0x90] sm:$0xff]  ;;  %v8492_v32 = vld [vmem:[#allocation2 + $0x80] sm:$0xff]  ;;  %v8494_v24 = vld [vmem:[#allocation2 + $0x88] sm:$0xff] }
 0xbe0   :  { %v1940_v36 = vpop.f32.mrf.mxu1  ;;  %v6173_v17 = vpop.f32.mrf.mxu0 }
 0xbe1   :  { %v2013_v51 = vadd.f32 %v1939_v15, %v1746_v21  ;;  %v1941_v63 = vadd.f32 %v1940_v36, %v8225_v11  ;;  %v8482_v21 = vld [vmem:[#allocation2 + $0x98] sm:$0xff]  ;;  %v8502_v36 = vld [vmem:[#allocation2 + $0x68] sm:$0xff]  ;;  %v8504_v17 = vld [vmem:[#allocation2 + $0x70] sm:$0xff] }
 0xbe2   :  { %v8498_v15 = vld [vmem:[#allocation2 + $0x78] sm:$0xff] }
 0xbe3   :  { %v5247_v22 = vmul.f32 -1.442695, %v2013_v51  ;;  %v2020_v28 = vadd.f32 %v1941_v63, %v1748_v27  ;;  %v8484_v27 = vld [vmem:[#allocation2 + $0xa0] sm:$0xff]  ;;  %v8514_v63 = vld [vmem:[#allocation2 + $0x58] sm:$0xff] }
 0xbe4   :  { %v8508_v51 = vld [vmem:[#allocation2 + $0x60] sm:$0xff] }
 0xbe5   :  { %6883 = vpow2.f32 %v5247_v22  ;;  %v5248_v50 = vmul.f32 -1.442695, %v2020_v28  ;;  %v8512_v22 = vld [vmem:[#allocation2 + $0x50] sm:$0xff]  ;;  %v8518_v28 = vld [vmem:[#allocation2 + $0x48] sm:$0xff] }
 0xbe7   :  { %6885 = vpow2.f32 %v5248_v50  ;;  %v8522_v50 = vld [vmem:[#allocation2 + $0x38] sm:$0xff] }
 0xbf2   :  { %v6884_v35 = vpop.eup %6883 }
 0xbf3   :  { %v2017_v42 = vadd.f32 1.0, %v6884_v35  ;;  %v8524_v35 = vld [vmem:[#allocation2 + $0x40] sm:$0xff] }
 0xbf4   :  { %v6886_v45 = vpop.eup %6885 }
 0xbf5   :  { %6887 = vrcp.f32 %v2017_v42  ;;  %v2024_v54 = vadd.f32 1.0, %v6886_v45  ;;  %v8528_v42 = vld [vmem:[#allocation2 + $0x30] sm:$0xff] }
 0xbf7   :  { %6889 = vrcp.f32 %v2024_v54 }
 0xc02   :  { %v6888_v61 = vpop.eup %6887 }
 0xc03   :  { %v2027_v5 = vmul.f32 %v6888_v61, %v2010_v60 }
 0xc04   :  { %v6890_v41 = vpop.eup %6889 }
 0xc05   :  { %v2028_v8 = vadd.f32 %v2027_v5, %v1817_v46  ;;  %v2030_v39 = vsub.f32 1.0, %v6890_v41  ;;  %v2032_v44 = vmul.f32 %v6890_v41, %v8232_v26  ;;  %v8474_v46 = vld [vmem:[#allocation2 + $0xb8] sm:$0xff]  ;;  %v8538_v5 = vld [vmem:[#allocation2 + $0x20] sm:$0xff]  ;;  %v8543_v41 = vld [vmem:[#allocation2 + $0x28] sm:$0xff] }
 0xc07   :  { %6891 = vtanh.f32 %v2028_v8  ;;  %v8541_v8 = vld [vmem:[#allocation2 + $0x18] sm:$0xff] }
 0xc14   :  { %v6892_v29 = vpop.eup %6891 }
 0xc15   :  { %v2031_v11 = vmul.f32 %v6892_v29, %v2030_v39  ;;  %v8547_v39 = vld [vmem:[#allocation2 + $0x8] sm:$0xff]  ;;  %v8551_v29 = vld [vmem:[#allocation2] sm:$0xff] }
 0xc17   :  { %v8383_v47 = vadd.f32 %v2032_v44, %v2031_v11  ;;  %v8553_v11 = vld [vmem:[#allocation2 + $0x10] sm:$0xff] }
 0xc18   :  { %v8557_v44 = vld [vmem:[#allocation5 + $0x170] sm:$0xff] }
 0xc19   :  { %6207 = vmatmul.mubr.f32.vlgmr.msra.gmra.mxu1 %v8383_v47 }
 0xc1a   :  { %6241 = vmatprep.mubr.msk.f32.mxu1 %vm7113_vm0, %v10458_v0  ;;  %6210 = vmatpush3.msra.mxu1 %v8400_v4 }
 0xc1b   :  { %6211 = vmatprep.subr.mxu1 %v10458_v0 }
 0xc1c   :  { %6212 = vmatpush3.msra.mxu1 %v8408_v34 }
 0xc1d   :  { %6213 = vmatprep.subr.mxu1 %v10458_v0 }
 0xc1e   :  { %6214 = vmatpush3.msra.mxu1 %v8414_v19 }
 0xc1f   :  { %6215 = vmatprep.subr.mxu1 %v10458_v0 }
 0xc20   :  { %6216 = vmatpush3.msra.mxu1 %v8424_v38 }
 0xc21   :  { %6217 = vmatprep.subr.mxu1 %v10458_v0 }
 0xc22   :  { %6218 = vmatpush3.msra.mxu1 %v8434_v33 }
 0xc23   :  { %6219 = vmatprep.subr.mxu1 %v10458_v0 }
 0xc24   :  { %6220 = vmatpush3.msra.mxu1 %v8444_v9 }
 0xc25   :  { %6221 = vmatprep.subr.mxu1 %v10458_v0 }
 0xc26   :  { %6222 = vmatpush3.msra.mxu1 %v8454_v43 }
 0xc27   :  { %6223 = vmatprep.subr.mxu1 %v10458_v0 }
 0xc28   :  { %6224 = vmatpush3.msra.mxu1 %v8464_v16 }
 0xc29   :  { %6225 = vmatprep.subr.mxu1 %v10458_v0 }
 0xc2a   :  { %6226 = vmatpush3.msra.mxu1 %v8474_v46 }
 0xc2b   :  { %6227 = vmatprep.subr.mxu1 %v10458_v0 }
 0xc2c   :  { %6228 = vmatpush3.msra.mxu1 %v8484_v27 }
 0xc2d   :  { %6229 = vmatprep.subr.mxu1 %v10458_v0 }
 0xc2e   :  { %6230 = vmatpush3.msra.mxu1 %v8494_v24 }
 0xc2f   :  { %6231 = vmatprep.subr.mxu1 %v10458_v0 }
 0xc30   :  { %6232 = vmatpush3.msra.mxu1 %v8504_v17 }
 0xc31   :  { %6233 = vmatprep.subr.mxu1 %v10458_v0 }
 0xc32   :  { %6234 = vmatpush3.msra.mxu1 %v8514_v63 }
 0xc33   :  { %6235 = vmatprep.subr.mxu1 %v10458_v0 }
 0xc34   :  { %6236 = vmatpush3.msra.mxu1 %v8524_v35 }
 0xc35   :  { %6237 = vmatprep.subr.mxu1 %v10458_v0 }
 0xc36   :  { %6238 = vmatpush3.msra.mxu1 %v8543_v41 }
 0xc37   :  { %6239 = vmatprep.subr.mxu1 %v10458_v0 }
 0xc38   :  { %6240 = vmatpush3.msra.mxu1 %v8553_v11 }
 0xc39   :  { %6244 = vmatprep.subr.mxu1 %v10458_v0 }
 0xcd9   :  { %v2117_v48 = vpop.f32.mrf.mxu1 }
 0xcda   :  { %v2118_v53 = vadd.f32 %v2117_v48, %v8269_v58  ;;  %v8404_v58 = vld [vmem:[#allocation2 + $0x158] sm:$0xff] }
 0xcdb   :  { %v6208_v1 = vpop.f32.mrf.mxu1  ;;  %2194 = vmatprep.subr.mxu0 %v8404_v58 }
 0xcdc   :  { %2122 = vst [vmem:[#allocation11 + $0x18] sm:$0xff] %v2118_v53  ;;  %2123 = vmax.xlane.f32.xlu1 %v2118_v53  ;;  %2195 = vmatpush1.msra.mxu0 %v8406_v57 }
 0xcdd   :  { %2196 = vmatprep.subr.mxu0 %v8412_v37 }
 0xcde   :  { %2197 = vmatpush1.msra.mxu0 %v8418_v25 }
 0xcdf   :  { %2198 = vmatprep.subr.mxu0 %v8422_v31 }
 0xce0   :  { %2199 = vmatpush1.msra.mxu0 %v8428_v49 }
 0xce1   :  { %2200 = vmatprep.subr.mxu0 %v8432_v52 }
 0xce2   :  { %2201 = vmatpush1.msra.mxu0 %v8438_v3 }
 0xce3   :  { %2202 = vmatprep.subr.mxu0 %v8442_v6 }
 0xce4   :  { %2203 = vmatpush1.msra.mxu0 %v8448_v12 }
 0xce5   :  { %2204 = vmatprep.subr.mxu0 %v8452_v56 }
 0xce6   :  { %2205 = vmatpush1.msra.mxu0 %v8458_v30 }
 0xce7   :  { %2206 = vmatprep.subr.mxu0 %v8462_v59 }
 0xce8   :  { %2207 = vmatpush1.msra.mxu0 %v8468_v20 }
 0xce9   :  { %2208 = vmatprep.subr.mxu0 %v8472_v62 }
 0xcea   :  { %2209 = vmatpush1.msra.mxu0 %v8478_v18 }
 0xceb   :  { %2210 = vmatprep.subr.mxu0 %v8482_v21 }
 0xcec   :  { %2211 = vmatpush1.msra.mxu0 %v8488_v23 }
 0xced   :  { %2212 = vmatprep.subr.mxu0 %v8492_v32 }
 0xcee   :  { %2213 = vmatpush1.msra.mxu0 %v8498_v15 }
 0xcef   :  { %2214 = vmatprep.subr.mxu0 %v8502_v36 }
 0xcf0   :  { %2215 = vmatpush1.msra.mxu0 %v8508_v51 }
 0xcf1   :  { %2216 = vmatprep.subr.mxu0 %v8512_v22 }
 0xcf2   :  { %2217 = vmatpush1.msra.mxu0 %v8518_v28 }
 0xcf3   :  { %2218 = vmatprep.subr.mxu0 %v8522_v50 }
 0xcf4   :  { %2219 = vmatpush1.msra.mxu0 %v8528_v42 }
 0xcf5   :  { %2220 = vmatprep.subr.mxu0 %v8538_v5 }
 0xcf6   :  { %2221 = vmatpush1.msra.mxu0 %v8541_v8 }
 0xcf7   :  { %2222 = vmatprep.subr.mxu0 %v8547_v39 }
 0xcf8   :  { %2223 = vmatpush1.msra.mxu0 %v8551_v29 }
 0xcf9   :  { %2384 = vmatprep.subr.mxu0 %v8557_v44 }
 0xd65   :  { %v2124_v7 = vpop.xlane.xlu1 %2123 }
 0xd66   :  { %vm2125_vm11 = vcmp.eq.f32.partialorder %v2118_v53, %v2124_v7 }
 0xd67   :  { %v8390_v2 = vsel %vm2125_vm11, %v7295_v40, 128 }
 0xd68   :  { %v2128_v26 = vshra.s32 %v8390_v2, 16  ;;  %v2127_v45 = vand.u32 65535, %v8390_v2 }
 0xd6a   :  { %v8393_v10 = vcvt.s32.f32 %v2128_v26  ;;  %v2129_v60 = vcvt.s32.f32 %v2127_v45  ;;  %v8561_v26 = vld [vmem:[#allocation5 + $0x168] sm:$0xff]  ;;  %v8566_v45 = vld [vmem:[#allocation5 + $0x158] sm:$0xff] }
 0xd6b   :  { %10580 = vst [vmem:[#allocation19_spill] sm:$0xff] %v8566_v45 }
 0xd6c   :  { %2131 = vmin.xlane.f32.xlu0 %v8393_v10 }
 0xdf5   :  { %v2132_v54 = vpop.xlane.xlu0 %2131 }
 0xdf6   :  { %vm2133_vm12 = vcmp.eq.f32.partialorder %v8393_v10, %v2132_v54  ;;  %v2138_v48 = vcvt.f32.s32 %v2132_v54  ;;  %v8563_v10 = vld [vmem:[#allocation5 + $0x178] sm:$0xff]  ;;  %v8576_v54 = vld [vmem:[#allocation5 + $0x140] sm:$0xff] }
 0xdf7   :  { %v2134_v61 = vsel %vm2133_vm12, %v2129_v60, inf  ;;  %v8570_v60 = vld [vmem:[#allocation5 + $0x150] sm:$0xff]  ;;  %10583 = vst [vmem:[#allocation21_spill] sm:$0xff] %v8576_v54 }
 0xdf8   :  { %2135 = vmin.xlane.f32.xlu1 %v2134_v61  ;;  %v2139_v1 = vshll.u32 %v2138_v48, 16  ;;  %10581 = vst [vmem:[#allocation33_spill] sm:$0xff] %v8570_v60  ;;  %v8572_v61 = vld [vmem:[#allocation5 + $0x160] sm:$0xff]  ;;  %v8580_v48 = vld [vmem:[#allocation5 + $0x138] sm:$0xff] }
 0xdf9   :  { %10582 = vst [vmem:[#allocation20_spill] sm:$0xff] %v8572_v61  ;;  %10584 = vst [vmem:[#allocation36_spill] sm:$0xff] %v8580_v48 }
 0xe81   :  { %v2136_v53 = vpop.xlane.xlu1 %2135 }
 0xe82   :  { %v2137_v7 = vcvt.f32.s32 %v2136_v53  ;;  %v8582_v53 = vld [vmem:[#allocation5 + $0x148] sm:$0xff] }
 0xe83   :  { %10585 = vst [vmem:[#allocation22_spill] sm:$0xff] %v8582_v53 }
 0xe84   :  { %v2140_v2 = vadd.s32 %v2139_v1, %v2137_v7  ;;  %v8586_v1 = vld [vmem:[#allocation5 + $0x128] sm:$0xff]  ;;  %v8590_v7 = vld [vmem:[#allocation5 + $0x120] sm:$0xff] }
 0xe85   :  { %10586 = vst [vmem:[#allocation23_spill] sm:$0xff] %v8586_v1  ;;  %10587 = vst [vmem:[#allocation39_spill] sm:$0xff] %v8590_v7 }
 0xe86   :  { %vm2141_vm13 = vcmp.eq.s32.totalorder %v7295_v40, %v2140_v2  ;;  %v8592_v2 = vld [vmem:[#allocation5 + $0x130] sm:$0xff] }
 0xe87   :  { %5250 = vmatmul.mubr.msk.f32.vlgmr.msra.gmra.mxu0 %vm2141_vm13, %v10432_v55  ;;  %6242 = vmatmul.mubr.msk.f32.vlgmr.msra.gmra.mxu1 %vm2141_vm13, %v10432_v55  ;;  %10588 = vst [vmem:[#allocation24_spill] sm:$0xff] %v8592_v2 }
 0xe88   :  { %2385 = vmatpush1.msra.mxu0 %v8561_v26  ;;  %6245 = vmatpush3.msra.mxu1 %v8563_v10 }
 0xe89   :  { %2386 = vmatprep.subr.mxu0 %v8566_v45  ;;  %6246 = vmatprep.subr.mxu1 %v10458_v0  ;;  %v8596_v45 = vld [vmem:[#allocation5 + $0x110] sm:$0xff] }
 0xe8a   :  { %2387 = vmatpush1.msra.mxu0 %v8570_v60  ;;  %6247 = vmatpush3.msra.mxu1 %v8572_v61  ;;  %10589 = vst [vmem:[#allocation25_spill] sm:$0xff] %v8596_v45  ;;  %v8600_v61 = vld [vmem:[#allocation5 + $0x108] sm:$0xff]  ;;  %v8602_v60 = vld [vmem:[#allocation5 + $0x118] sm:$0xff] }
 0xe8b   :  { %2388 = vmatprep.subr.mxu0 %v8576_v54  ;;  %6248 = vmatprep.subr.mxu1 %v10458_v0  ;;  %10590 = vst [vmem:[#allocation42_spill] sm:$0xff] %v8600_v61  ;;  %10591 = vst [vmem:[#allocation26_spill] sm:$0xff] %v8602_v60  ;;  %v8606_v54 = vld [vmem:[#allocation5 + $0xf8] sm:$0xff] }
 0xe8c   :  { %2389 = vmatpush1.msra.mxu0 %v8580_v48  ;;  %6249 = vmatpush3.msra.mxu1 %v8582_v53  ;;  %10592 = vst [vmem:[#allocation27_spill] sm:$0xff] %v8606_v54  ;;  %v8610_v53 = vld [vmem:[#allocation5 + $0xf0] sm:$0xff]  ;;  %v8612_v48 = vld [vmem:[#allocation5 + $0x100] sm:$0xff] }
 0xe8d   :  { %2390 = vmatprep.subr.mxu0 %v8586_v1  ;;  %6250 = vmatprep.subr.mxu1 %v10458_v0  ;;  %10593 = vst [vmem:[#allocation45_spill] sm:$0xff] %v8610_v53  ;;  %10594 = vst [vmem:[#allocation28_spill] sm:$0xff] %v8612_v48  ;;  %v8616_v1 = vld [vmem:[#allocation5 + $0xe0] sm:$0xff] }
 0xe8e   :  { %2391 = vmatpush1.msra.mxu0 %v8590_v7  ;;  %6251 = vmatpush3.msra.mxu1 %v8592_v2  ;;  %10595 = vst [vmem:[#allocation29_spill] sm:$0xff] %v8616_v1  ;;  %v8620_v2 = vld [vmem:[#allocation5 + $0xd8] sm:$0xff]  ;;  %v8622_v7 = vld [vmem:[#allocation5 + $0xe8] sm:$0xff] }
 0xe8f   :  { %2392 = vmatprep.subr.mxu0 %v8596_v45  ;;  %6252 = vmatprep.subr.mxu1 %v10458_v0  ;;  %10596 = vst [vmem:[#allocation30_spill] sm:$0xff] %v8620_v2  ;;  %10597 = vst [vmem:[#allocation31_spill] sm:$0xff] %v8622_v7  ;;  %v8626_v45 = vld [vmem:[#allocation5 + $0xc8] sm:$0xff] }
 0xe90   :  { %2393 = vmatpush1.msra.mxu0 %v8600_v61  ;;  %6253 = vmatpush3.msra.mxu1 %v8602_v60  ;;  %10598 = vst [vmem:[#allocation32_spill] sm:$0xff] %v8626_v45  ;;  %v8630_v60 = vld [vmem:[#allocation5 + $0xc0] sm:$0xff]  ;;  %v8632_v61 = vld [vmem:[#allocation5 + $0xd0] sm:$0xff] }
 0xe91   :  { %2394 = vmatprep.subr.mxu0 %v8606_v54  ;;  %6254 = vmatprep.subr.mxu1 %v10458_v0  ;;  %10599 = vst [vmem:[#allocation34_spill] sm:$0xff] %v8630_v60  ;;  %10600 = vst [vmem:[#allocation35_spill] sm:$0xff] %v8632_v61  ;;  %v8636_v54 = vld [vmem:[#allocation5 + $0xb0] sm:$0xff] }
 0xe92   :  { %2395 = vmatpush1.msra.mxu0 %v8610_v53  ;;  %6255 = vmatpush3.msra.mxu1 %v8612_v48  ;;  %10601 = vst [vmem:[#allocation37_spill] sm:$0xff] %v8636_v54  ;;  %v8640_v48 = vld [vmem:[#allocation5 + $0xa8] sm:$0xff]  ;;  %v8642_v53 = vld [vmem:[#allocation5 + $0xb8] sm:$0xff] }
 0xe93   :  { %2396 = vmatprep.subr.mxu0 %v8616_v1  ;;  %6256 = vmatprep.subr.mxu1 %v10458_v0  ;;  %10602 = vst [vmem:[#allocation53_spill] sm:$0xff] %v8640_v48  ;;  %10603 = vst [vmem:[#allocation38_spill] sm:$0xff] %v8642_v53  ;;  %v8646_v1 = vld [vmem:[#allocation5 + $0x98] sm:$0xff] }
 0xe94   :  { %2397 = vmatpush1.msra.mxu0 %v8620_v2  ;;  %6257 = vmatpush3.msra.mxu1 %v8622_v7  ;;  %10604 = vst [vmem:[#allocation40_spill] sm:$0xff] %v8646_v1  ;;  %v8650_v7 = vld [vmem:[#allocation5 + $0x90] sm:$0xff]  ;;  %v8652_v2 = vld [vmem:[#allocation5 + $0xa0] sm:$0xff] }
 0xe95   :  { %2398 = vmatprep.subr.mxu0 %v8626_v45  ;;  %6258 = vmatprep.subr.mxu1 %v10458_v0  ;;  %10605 = vst [vmem:[#allocation54_spill] sm:$0xff] %v8650_v7  ;;  %10606 = vst [vmem:[#allocation41_spill] sm:$0xff] %v8652_v2  ;;  %v8656_v45 = vld [vmem:[#allocation5 + $0x80] sm:$0xff] }
 0xe96   :  { %2399 = vmatpush1.msra.mxu0 %v8630_v60  ;;  %6259 = vmatpush3.msra.mxu1 %v8632_v61  ;;  %10607 = vst [vmem:[#allocation43_spill] sm:$0xff] %v8656_v45  ;;  %v8660_v61 = vld [vmem:[#allocation5 + $0x78] sm:$0xff]  ;;  %v8662_v60 = vld [vmem:[#allocation5 + $0x88] sm:$0xff] }
 0xe97   :  { %2400 = vmatprep.subr.mxu0 %v8636_v54  ;;  %6260 = vmatprep.subr.mxu1 %v10458_v0  ;;  %10608 = vst [vmem:[#allocation44_spill] sm:$0xff] %v8660_v61  ;;  %10609 = vst [vmem:[#allocation46_spill] sm:$0xff] %v8662_v60  ;;  %v8666_v54 = vld [vmem:[#allocation5 + $0x68] sm:$0xff] }
 0xe98   :  { %2401 = vmatpush1.msra.mxu0 %v8640_v48  ;;  %6261 = vmatpush3.msra.mxu1 %v8642_v53  ;;  %10610 = vst [vmem:[#allocation47_spill] sm:$0xff] %v8666_v54  ;;  %v8670_v53 = vld [vmem:[#allocation5 + $0x60] sm:$0xff]  ;;  %v8672_v48 = vld [vmem:[#allocation5 + $0x70] sm:$0xff] }
 0xe99   :  { %2402 = vmatprep.subr.mxu0 %v8646_v1  ;;  %6262 = vmatprep.subr.mxu1 %v10458_v0  ;;  %10611 = vst [vmem:[#allocation48_spill] sm:$0xff] %v8670_v53  ;;  %10612 = vst [vmem:[#allocation49_spill] sm:$0xff] %v8672_v48  ;;  %v8676_v1 = vld [vmem:[#allocation5 + $0x50] sm:$0xff] }
 0xe9a   :  { %2403 = vmatpush1.msra.mxu0 %v8650_v7  ;;  %6263 = vmatpush3.msra.mxu1 %v8652_v2  ;;  %10613 = vst [vmem:[#allocation50_spill] sm:$0xff] %v8676_v1  ;;  %v8680_v2 = vld [vmem:[#allocation5 + $0x48] sm:$0xff]  ;;  %v8682_v7 = vld [vmem:[#allocation5 + $0x58] sm:$0xff] }
 0xe9b   :  { %2404 = vmatprep.subr.mxu0 %v8656_v45  ;;  %6264 = vmatprep.subr.mxu1 %v10458_v0  ;;  %10614 = vst [vmem:[#allocation51_spill] sm:$0xff] %v8682_v7  ;;  %v8686_v45 = vld [vmem:[#allocation5 + $0x38] sm:$0xff] }
 0xe9c   :  { %2405 = vmatpush1.msra.mxu0 %v8660_v61  ;;  %6265 = vmatpush3.msra.mxu1 %v8662_v60  ;;  %10615 = vst [vmem:[#allocation52_spill] sm:$0xff] %v8686_v45  ;;  %v8690_v60 = vld [vmem:[#allocation5 + $0x30] sm:$0xff]  ;;  %v8692_v61 = vld [vmem:[#allocation5 + $0x40] sm:$0xff] }
 0xe9d   :  { %2406 = vmatprep.subr.mxu0 %v8666_v54  ;;  %6266 = vmatprep.subr.mxu1 %v10458_v0  ;;  %v8696_v54 = vld [vmem:[#allocation5 + $0x20] sm:$0xff] }
 0xe9e   :  { %2407 = vmatpush1.msra.mxu0 %v8670_v53  ;;  %6267 = vmatpush3.msra.mxu1 %v8672_v48  ;;  %v8700_v48 = vld [vmem:[#allocation5 + $0x18] sm:$0xff]  ;;  %v8702_v53 = vld [vmem:[#allocation5 + $0x28] sm:$0xff] }
 0xe9f   :  { %2408 = vmatprep.subr.mxu0 %v8676_v1  ;;  %6268 = vmatprep.subr.mxu1 %v10458_v0  ;;  %v8706_v1 = vld [vmem:[#allocation5 + $0x8] sm:$0xff] }
 0xea0   :  { %2409 = vmatpush1.msra.mxu0 %v8680_v2  ;;  %6269 = vmatpush3.msra.mxu1 %v8682_v7  ;;  %v8710_v7 = vld [vmem:[#allocation5] sm:$0xff] }
 0xea1   :  { %2410 = vmatprep.subr.mxu0 %v8686_v45  ;;  %6270 = vmatprep.subr.mxu1 %v10458_v0  ;;  %v8714_v45 = vld [vmem:[#allocation5 + $0x10] sm:$0xff] }
 0xea2   :  { %2411 = vmatpush1.msra.mxu0 %v8690_v60  ;;  %6271 = vmatpush3.msra.mxu1 %v8692_v61 }
 0xea3   :  { %2412 = vmatprep.subr.mxu0 %v8696_v54  ;;  %6272 = vmatprep.subr.mxu1 %v10458_v0 }
 0xea4   :  { %2413 = vmatpush1.msra.mxu0 %v8700_v48  ;;  %6273 = vmatpush3.msra.mxu1 %v8702_v53 }
 0xea5   :  { %2414 = vmatprep.subr.mxu0 %v8706_v1  ;;  %6274 = vmatprep.subr.mxu1 %v10458_v0 }
 0xea6   :  { %2415 = vmatpush1.msra.mxu0 %v8710_v7  ;;  %2448 = vmatprep.mubr.f32.mxu0 %v10458_v0 }
 0xea7   :  { %6275 = vmatpush3.msra.mxu1 %v8714_v45  ;;  %6276 = vmatprep.mubr.msk.f32.mxu1 %vm7113_vm0, %v10458_v0 }
 0xea8   :  { %2449 = vmatmul.mubr.f32.vlgmr.msra.gmra.mxu0 %v8383_v47  ;;  %6277 = vmatmul.mubr.f32.vlgmr.msra.gmra.mxu1 %v8383_v47 }
 0xea9   :  { %6279 = vmatprep.subr.mxu0 %v10458_v0  ;;  %6311 = vmatprep.mubr.msk.f32.mxu0 %vm7113_vm0, %v10458_v0 }
 0xeaa   :  { %2704 = vmatprep.subr.mxu1 %v8396_v13  ;;  %2768 = vmatprep.mubr.f32.mxu1 %v10458_v0  ;;  %v8762_v13 = vld [vmem:[#allocation8 + $0x78] sm:$0xff] }
 0xeab   :  { %2705 = vmatpush1.msra.mxu1 %v8398_v14  ;;  %6280 = vmatpush3.msra.mxu0 %v8762_v13  ;;  %v8766_v14 = vld [vmem:[#allocation8 + $0x70] sm:$0xff] }
 0xeac   :  { %2706 = vmatprep.subr.mxu1 %v8404_v58  ;;  %6281 = vmatprep.subr.mxu0 %v10458_v0  ;;  %v8770_v58 = vld [vmem:[#allocation8 + $0x68] sm:$0xff] }
 0xead   :  { %2707 = vmatpush1.msra.mxu1 %v8406_v57  ;;  %6282 = vmatpush3.msra.mxu0 %v8766_v14  ;;  %v8774_v57 = vld [vmem:[#allocation8 + $0x60] sm:$0xff] }
 0xeae   :  { %2708 = vmatprep.subr.mxu1 %v8412_v37  ;;  %6283 = vmatprep.subr.mxu0 %v10458_v0  ;;  %v8778_v37 = vld [vmem:[#allocation8 + $0x58] sm:$0xff] }
 0xeaf   :  { %2709 = vmatpush1.msra.mxu1 %v8418_v25  ;;  %6284 = vmatpush3.msra.mxu0 %v8770_v58  ;;  %v8782_v25 = vld [vmem:[#allocation8 + $0x50] sm:$0xff] }
 0xeb0   :  { %2710 = vmatprep.subr.mxu1 %v8422_v31  ;;  %6285 = vmatprep.subr.mxu0 %v10458_v0  ;;  %v8786_v31 = vld [vmem:[#allocation8 + $0x48] sm:$0xff] }
 0xeb1   :  { %2711 = vmatpush1.msra.mxu1 %v8428_v49  ;;  %6286 = vmatpush3.msra.mxu0 %v8774_v57  ;;  %v8790_v49 = vld [vmem:[#allocation8 + $0x40] sm:$0xff] }
 0xeb2   :  { %2712 = vmatprep.subr.mxu1 %v8432_v52  ;;  %6287 = vmatprep.subr.mxu0 %v10458_v0  ;;  %v8792_v52 = vld [vmem:[#allocation8 + $0x38] sm:$0xff] }
 0xeb3   :  { %2713 = vmatpush1.msra.mxu1 %v8438_v3  ;;  %6288 = vmatpush3.msra.mxu0 %v8778_v37  ;;  %v8796_v3 = vld [vmem:[#allocation8 + $0x30] sm:$0xff] }
 0xeb4   :  { %2714 = vmatprep.subr.mxu1 %v8442_v6  ;;  %6289 = vmatprep.subr.mxu0 %v10458_v0  ;;  %v8800_v6 = vld [vmem:[#allocation8 + $0x28] sm:$0xff] }
 0xeb5   :  { %2715 = vmatpush1.msra.mxu1 %v8448_v12  ;;  %6290 = vmatpush3.msra.mxu0 %v8782_v25  ;;  %v8804_v12 = vld [vmem:[#allocation8 + $0x20] sm:$0xff] }
 0xeb6   :  { %2716 = vmatprep.subr.mxu1 %v8452_v56  ;;  %6291 = vmatprep.subr.mxu0 %v10458_v0  ;;  %v8808_v56 = vld [vmem:[#allocation8 + $0x18] sm:$0xff] }
 0xeb7   :  { %2717 = vmatpush1.msra.mxu1 %v8458_v30  ;;  %6292 = vmatpush3.msra.mxu0 %v8786_v31  ;;  %10616 = vst [vmem:[#allocation55_spill] sm:$0xff] %v8808_v56  ;;  %v8812_v30 = vld [vmem:[#allocation8 + $0x10] sm:$0xff] }
 0xeb8   :  { %2718 = vmatprep.subr.mxu1 %v8462_v59  ;;  %6293 = vmatprep.subr.mxu0 %v10458_v0  ;;  %10617 = vst [vmem:[#allocation56_spill] sm:$0xff] %v8812_v30  ;;  %v8816_v59 = vld [vmem:[#allocation8 + $0x8] sm:$0xff] }
 0xeb9   :  { %2719 = vmatpush1.msra.mxu1 %v8468_v20  ;;  %6294 = vmatpush3.msra.mxu0 %v8790_v49  ;;  %10618 = vst [vmem:[#allocation57_spill] sm:$0xff] %v8816_v59  ;;  %v8820_v20 = vld [vmem:[#allocation8] sm:$0xff] }
 0xeba   :  { %2720 = vmatprep.subr.mxu1 %v8472_v62  ;;  %6295 = vmatprep.subr.mxu0 %v10458_v0  ;;  %10619 = vst [vmem:[#allocation58_spill] sm:$0xff] %v8820_v20 }
 0xebb   :  { %2721 = vmatpush1.msra.mxu1 %v8478_v18  ;;  %6296 = vmatpush3.msra.mxu0 %v8792_v52 }
 0xebc   :  { %2722 = vmatprep.subr.mxu1 %v8482_v21  ;;  %6297 = vmatprep.subr.mxu0 %v10458_v0 }
 0xebd   :  { %2723 = vmatpush1.msra.mxu1 %v8488_v23  ;;  %6298 = vmatpush3.msra.mxu0 %v8796_v3 }
 0xebe   :  { %2724 = vmatprep.subr.mxu1 %v8492_v32  ;;  %6299 = vmatprep.subr.mxu0 %v10458_v0  ;;  %v8826_v32 = vld [vmem:[#allocation7] sm:$0xff] }
 0xebf   :  { %2725 = vmatpush1.msra.mxu1 %v8498_v15  ;;  %6300 = vmatpush3.msra.mxu0 %v8800_v6  ;;  %10620 = vst [vmem:[#allocation59_spill] sm:$0xff] %v8826_v32 }
 0xec0   :  { %2726 = vmatprep.subr.mxu1 %v8502_v36  ;;  %6301 = vmatprep.subr.mxu0 %v10458_v0 }
 0xec1   :  { %2727 = vmatpush1.msra.mxu1 %v8508_v51  ;;  %6302 = vmatpush3.msra.mxu0 %v8804_v12 }
 0xec2   :  { %2728 = vmatprep.subr.mxu1 %v8512_v22  ;;  %6303 = vmatprep.subr.mxu0 %v10458_v0  ;;  %v8829_v22 = vld [vmem:[#allocation7 + $0x8] sm:$0xff] }
 0xec3   :  { %2729 = vmatpush1.msra.mxu1 %v8518_v28  ;;  %6304 = vmatpush3.msra.mxu0 %v8808_v56 }
 0xec4   :  { %2730 = vmatprep.subr.mxu1 %v8522_v50  ;;  %6305 = vmatprep.subr.mxu0 %v10458_v0 }
 0xec5   :  { %2731 = vmatpush1.msra.mxu1 %v8528_v42  ;;  %6306 = vmatpush3.msra.mxu0 %v8812_v30 }
 0xec6   :  { %2732 = vmatprep.subr.mxu1 %v8538_v5  ;;  %6307 = vmatprep.subr.mxu0 %v10458_v0 }
 0xec7   :  { %2733 = vmatpush1.msra.mxu1 %v8541_v8  ;;  %6308 = vmatpush3.msra.mxu0 %v8816_v59  ;;  %v8832_v59 = vld [vmem:[#allocation7 + $0x10] sm:$0xff] }
 0xec8   :  { %2734 = vmatprep.subr.mxu1 %v8547_v39  ;;  %6309 = vmatprep.subr.mxu0 %v10458_v0 }
 0xec9   :  { %2735 = vmatpush1.msra.mxu1 %v8551_v29  ;;  %6310 = vmatpush3.msra.mxu0 %v8820_v20 }
 0xeca   :  { %2896 = vmatprep.subr.mxu1 %v8557_v44  ;;  %6314 = vmatprep.subr.mxu0 %v10458_v0 }
 0xf47   :  { %v2329_v62 = vpop.f32.mrf.mxu1  ;;  %v2258_v21 = vpop.f32.mrf.mxu0 }
 0xf49   :  { %v6243_v18 = vpop.f32.mrf.mxu1  ;;  %v2260_v23 = vpop.f32.mrf.mxu0 }
 0xf68   :  { %v2450_v15 = vpop.f32.mrf.mxu0  ;;  %v2521_v36 = vpop.f32.mrf.mxu1 }
 0xf69   :  { %v2451_v51 = vadd.f32 %v2450_v15, %v8826_v32  ;;  %v2522_v15 = vadd.f32 %v2521_v36, %v8832_v59  ;;  %v10626_v36 = vld [vmem:[#allocation22_spill] sm:$0xff] }
 0xf6a   :  { %v2452_v28 = vpop.f32.mrf.mxu0  ;;  %v6278_v50 = vpop.f32.mrf.mxu1 }
 0xf6b   :  { %v2525_v42 = vadd.f32 %v2451_v51, %v2258_v21  ;;  %v2453_v8 = vadd.f32 %v2452_v28, %v8829_v22 }
 0xf6d   :  { %v5252_v5 = vmul.f32 -1.442695, %v2525_v42  ;;  %v2532_v39 = vadd.f32 %v2453_v8, %v2260_v23  ;;  %v10627_v8 = vld [vmem:[#allocation23_spill] sm:$0xff] }
 0xf6f   :  { %6893 = vpow2.f32 %v5252_v5  ;;  %v5253_v29 = vmul.f32 -1.442695, %v2532_v39  ;;  %v10630_v39 = vld [vmem:[#allocation25_spill] sm:$0xff] }
 0xf71   :  { %6895 = vpow2.f32 %v5253_v29  ;;  %v10631_v29 = vld [vmem:[#allocation42_spill] sm:$0xff] }
 0xf7c   :  { %v6894_v44 = vpop.eup %6893 }
 0xf7d   :  { %v2529_v18 = vadd.f32 1.0, %v6894_v44  ;;  %v10632_v44 = vld [vmem:[#allocation26_spill] sm:$0xff] }
 0xf7e   :  { %v6896_v20 = vpop.eup %6895 }
 0xf7f   :  { %6897 = vrcp.f32 %v2529_v18  ;;  %v2536_v30 = vadd.f32 1.0, %v6896_v20  ;;  %v10623_v20 = vld [vmem:[#allocation20_spill] sm:$0xff]  ;;  %v10633_v18 = vld [vmem:[#allocation27_spill] sm:$0xff] }
 0xf81   :  { %6899 = vrcp.f32 %v2536_v30  ;;  %v10622_v30 = vld [vmem:[#allocation33_spill] sm:$0xff] }
 0xf8c   :  { %v6898_v32 = vpop.eup %6897 }
 0xf8d   :  { %v2539_v56 = vmul.f32 %v6898_v32, %v2522_v15  ;;  %v10625_v32 = vld [vmem:[#allocation36_spill] sm:$0xff]  ;;  %v10634_v15 = vld [vmem:[#allocation45_spill] sm:$0xff] }
 0xf8e   :  { %v6900_v51 = vpop.eup %6899 }
 0xf8f   :  { %v2540_v21 = vadd.f32 %v2539_v56, %v2329_v62  ;;  %v2542_v28 = vsub.f32 1.0, %v6900_v51  ;;  %v2544_v42 = vmul.f32 %v6900_v51, %v8383_v47  ;;  %v8873_v47 = vld [vmem:[#allocation10] sm:$0xff]  ;;  %v10624_v62 = vld [vmem:[#allocation21_spill] sm:$0xff] }
 0xf90   :  { %v10621_v56 = vld [vmem:[#allocation19_spill] sm:$0xff]  ;;  %v10636_v51 = vld [vmem:[#allocation29_spill] sm:$0xff] }
 0xf91   :  { %6901 = vtanh.f32 %v2540_v21  ;;  %v10635_v21 = vld [vmem:[#allocation28_spill] sm:$0xff] }
 0xf9e   :  { %v6902_v50 = vpop.eup %6901 }
 0xf9f   :  { %v2543_v23 = vmul.f32 %v6902_v50, %v2542_v28  ;;  %v10637_v28 = vld [vmem:[#allocation30_spill] sm:$0xff]  ;;  %v10638_v50 = vld [vmem:[#allocation31_spill] sm:$0xff] }
 0xfa1   :  { %v8836_v5 = vadd.f32 %v2544_v42, %v2543_v23  ;;  %v10639_v23 = vld [vmem:[#allocation32_spill] sm:$0xff]  ;;  %v10640_v42 = vld [vmem:[#allocation34_spill] sm:$0xff] }
 0xfa3   :  { %6312 = vmatmul.mubr.f32.vlgmr.msra.gmra.mxu0 %v8836_v5 }
 0xfa4   :  { %6315 = vmatpush3.msra.mxu0 %v8400_v4  ;;  %6346 = vmatprep.mubr.msk.f32.mxu0 %vm7113_vm0, %v10458_v0 }
 0xfa5   :  { %6316 = vmatprep.subr.mxu0 %v10458_v0 }
 0xfa6   :  { %6317 = vmatpush3.msra.mxu0 %v8408_v34 }
 0xfa7   :  { %6318 = vmatprep.subr.mxu0 %v10458_v0 }
 0xfa8   :  { %6319 = vmatpush3.msra.mxu0 %v8414_v19 }
 0xfa9   :  { %6320 = vmatprep.subr.mxu0 %v10458_v0 }
 0xfaa   :  { %6321 = vmatpush3.msra.mxu0 %v8424_v38 }
 0xfab   :  { %6322 = vmatprep.subr.mxu0 %v10458_v0 }
 0xfac   :  { %6323 = vmatpush3.msra.mxu0 %v8434_v33 }
 0xfad   :  { %6324 = vmatprep.subr.mxu0 %v10458_v0 }
 0xfae   :  { %6325 = vmatpush3.msra.mxu0 %v8444_v9 }
 0xfaf   :  { %6326 = vmatprep.subr.mxu0 %v10458_v0 }
 0xfb0   :  { %6327 = vmatpush3.msra.mxu0 %v8454_v43 }
 0xfb1   :  { %6328 = vmatprep.subr.mxu0 %v10458_v0 }
 0xfb2   :  { %6329 = vmatpush3.msra.mxu0 %v8464_v16 }
 0xfb3   :  { %6330 = vmatprep.subr.mxu0 %v10458_v0 }
 0xfb4   :  { %6331 = vmatpush3.msra.mxu0 %v8474_v46 }
 0xfb5   :  { %6332 = vmatprep.subr.mxu0 %v10458_v0 }
 0xfb6   :  { %6333 = vmatpush3.msra.mxu0 %v8484_v27 }
 0xfb7   :  { %6334 = vmatprep.subr.mxu0 %v10458_v0 }
 0xfb8   :  { %6335 = vmatpush3.msra.mxu0 %v8494_v24 }
 0xfb9   :  { %6336 = vmatprep.subr.mxu0 %v10458_v0 }
 0xfba   :  { %6337 = vmatpush3.msra.mxu0 %v8504_v17 }
 0xfbb   :  { %6338 = vmatprep.subr.mxu0 %v10458_v0 }
 0xfbc   :  { %6339 = vmatpush3.msra.mxu0 %v8514_v63 }
 0xfbd   :  { %6340 = vmatprep.subr.mxu0 %v10458_v0 }
 0xfbe   :  { %6341 = vmatpush3.msra.mxu0 %v8524_v35 }
 0xfbf   :  { %6342 = vmatprep.subr.mxu0 %v10458_v0 }
 0xfc0   :  { %6343 = vmatpush3.msra.mxu0 %v8543_v41 }
 0xfc1   :  { %6344 = vmatprep.subr.mxu0 %v10458_v0 }
 0xfc2   :  { %6345 = vmatpush3.msra.mxu0 %v8553_v11 }
 0xfc3   :  { %6349 = vmatprep.subr.mxu0 %v10458_v0 }
0x1063   :  { %v2629_v4 = vpop.f32.mrf.mxu0 }
0x1064   :  { %v2630_v34 = vadd.f32 %v2629_v4, %v8873_v47  ;;  %v10641_v4 = vld [vmem:[#allocation35_spill] sm:$0xff] }
0x1065   :  { %v6313_v19 = vpop.f32.mrf.mxu0 }
0x1066   :  { %2634 = vst [vmem:[#allocation11 + $0x20] sm:$0xff] %v2630_v34  ;;  %2635 = vmax.xlane.f32.xlu0 %v2630_v34  ;;  %v10643_v19 = vld [vmem:[#allocation53_spill] sm:$0xff] }
0x10ef   :  { %v2636_v38 = vpop.xlane.xlu0 %2635 }
0x10f0   :  { %vm2637_vm14 = vcmp.eq.f32.partialorder %v2630_v34, %v2636_v38  ;;  %v10642_v34 = vld [vmem:[#allocation37_spill] sm:$0xff]  ;;  %v10644_v38 = vld [vmem:[#allocation38_spill] sm:$0xff] }
0x10f1   :  { %v2638_v33 = vsel %vm2637_vm14, %v7295_v40, 128 }
0x10f2   :  { %v2640_v9 = vshra.s32 %v2638_v33, 16  ;;  %v2639_v16 = vand.u32 65535, %v2638_v33  ;;  %v10645_v33 = vld [vmem:[#allocation40_spill] sm:$0xff] }
0x10f4   :  { %v2642_v43 = vcvt.s32.f32 %v2640_v9  ;;  %v2641_v27 = vcvt.s32.f32 %v2639_v16  ;;  %v10646_v9 = vld [vmem:[#allocation54_spill] sm:$0xff]  ;;  %v10648_v16 = vld [vmem:[#allocation43_spill] sm:$0xff] }
0x10f6   :  { %2643 = vmin.xlane.f32.xlu1 %v2642_v43 }
0x117f   :  { %v2644_v46 = vpop.xlane.xlu1 %2643 }
0x1180   :  { %vm2645_vm15 = vcmp.eq.f32.partialorder %v2642_v43, %v2644_v46  ;;  %v2650_v17 = vcvt.f32.s32 %v2644_v46  ;;  %v10647_v43 = vld [vmem:[#allocation41_spill] sm:$0xff]  ;;  %v10649_v46 = vld [vmem:[#allocation44_spill] sm:$0xff] }
0x1181   :  { %v2646_v24 = vsel %vm2645_vm15, %v2641_v27, inf  ;;  %v10650_v27 = vld [vmem:[#allocation46_spill] sm:$0xff] }
0x1182   :  { %2647 = vmin.xlane.f32.xlu0 %v2646_v24  ;;  %v2651_v35 = vshll.u32 %v2650_v17, 16  ;;  %v10651_v24 = vld [vmem:[#allocation47_spill] sm:$0xff]  ;;  %v10652_v17 = vld [vmem:[#allocation48_spill] sm:$0xff] }
0x120b   :  { %v2648_v63 = vpop.xlane.xlu0 %2647 }
0x120c   :  { %v2649_v41 = vcvt.f32.s32 %v2648_v63  ;;  %v10653_v63 = vld [vmem:[#allocation49_spill] sm:$0xff] }
0x120e   :  { %v2652_v11 = vadd.s32 %v2651_v35, %v2649_v41  ;;  %v10654_v35 = vld [vmem:[#allocation50_spill] sm:$0xff]  ;;  %v10655_v41 = vld [vmem:[#allocation51_spill] sm:$0xff] }
0x1210   :  { %vm2653_vm1 = vcmp.eq.s32.totalorder %v7295_v40, %v2652_v11  ;;  %v10656_v11 = vld [vmem:[#allocation52_spill] sm:$0xff] }
0x1211   :  { %5255 = vmatmul.mubr.msk.f32.vlgmr.msra.gmra.mxu1 %vm2653_vm1, %v10432_v55  ;;  %6347 = vmatmul.mubr.msk.f32.vlgmr.msra.gmra.mxu0 %vm2653_vm1, %v10432_v55 }
0x1212   :  { %2897 = vmatpush1.msra.mxu1 %v8561_v26  ;;  %6350 = vmatpush3.msra.mxu0 %v8563_v10  ;;  %v10628_v26 = vld [vmem:[#allocation39_spill] sm:$0xff]  ;;  %v10629_v10 = vld [vmem:[#allocation24_spill] sm:$0xff] }
0x1213   :  { %2898 = vmatprep.subr.mxu1 %v10621_v56  ;;  %6351 = vmatprep.subr.mxu0 %v10458_v0 }
0x1214   :  { %2899 = vmatpush1.msra.mxu1 %v10622_v30  ;;  %6352 = vmatpush3.msra.mxu0 %v10623_v20 }
0x1215   :  { %2900 = vmatprep.subr.mxu1 %v10624_v62  ;;  %6353 = vmatprep.subr.mxu0 %v10458_v0 }
0x1216   :  { %2901 = vmatpush1.msra.mxu1 %v10625_v32  ;;  %6354 = vmatpush3.msra.mxu0 %v10626_v36 }
0x1217   :  { %2902 = vmatprep.subr.mxu1 %v10627_v8  ;;  %6355 = vmatprep.subr.mxu0 %v10458_v0 }
0x1218   :  { %2903 = vmatpush1.msra.mxu1 %v10628_v26  ;;  %6356 = vmatpush3.msra.mxu0 %v10629_v10 }
0x1219   :  { %2904 = vmatprep.subr.mxu1 %v10630_v39  ;;  %6357 = vmatprep.subr.mxu0 %v10458_v0 }
0x121a   :  { %2905 = vmatpush1.msra.mxu1 %v10631_v29  ;;  %6358 = vmatpush3.msra.mxu0 %v10632_v44 }
0x121b   :  { %2906 = vmatprep.subr.mxu1 %v10633_v18  ;;  %6359 = vmatprep.subr.mxu0 %v10458_v0 }
0x121c   :  { %2907 = vmatpush1.msra.mxu1 %v10634_v15  ;;  %6360 = vmatpush3.msra.mxu0 %v10635_v21 }
0x121d   :  { %2908 = vmatprep.subr.mxu1 %v10636_v51  ;;  %6361 = vmatprep.subr.mxu0 %v10458_v0 }
0x121e   :  { %2909 = vmatpush1.msra.mxu1 %v10637_v28  ;;  %6362 = vmatpush3.msra.mxu0 %v10638_v50  ;;  %v9000_v28 = vld [vmem:[#allocation2 + $0x170] sm:$0xff]  ;;  %v9002_v50 = vld [vmem:[#allocation2 + $0x168] sm:$0xff] }
0x121f   :  { %2910 = vmatprep.subr.mxu1 %v10639_v23  ;;  %6363 = vmatprep.subr.mxu0 %v10458_v0  ;;  %v9004_v23 = vld [vmem:[#allocation2 + $0x178] sm:$0xff] }
0x1220   :  { %2911 = vmatpush1.msra.mxu1 %v10640_v42  ;;  %6364 = vmatpush3.msra.mxu0 %v10641_v4  ;;  %v9010_v42 = vld [vmem:[#allocation2 + $0x150] sm:$0xff]  ;;  %v9012_v4 = vld [vmem:[#allocation2 + $0x160] sm:$0xff] }
0x1221   :  { %2912 = vmatprep.subr.mxu1 %v10642_v34  ;;  %6365 = vmatprep.subr.mxu0 %v10458_v0  ;;  %v9016_v34 = vld [vmem:[#allocation2 + $0x140] sm:$0xff] }
0x1222   :  { %2913 = vmatpush1.msra.mxu1 %v10643_v19  ;;  %6366 = vmatpush3.msra.mxu0 %v10644_v38  ;;  %v9018_v19 = vld [vmem:[#allocation2 + $0x148] sm:$0xff]  ;;  %v9022_v38 = vld [vmem:[#allocation2 + $0x138] sm:$0xff] }
0x1223   :  { %2914 = vmatprep.subr.mxu1 %v10645_v33  ;;  %6367 = vmatprep.subr.mxu0 %v10458_v0  ;;  %v9026_v33 = vld [vmem:[#allocation2 + $0x128] sm:$0xff] }
0x1224   :  { %2915 = vmatpush1.msra.mxu1 %v10646_v9  ;;  %6368 = vmatpush3.msra.mxu0 %v10647_v43  ;;  %v9028_v9 = vld [vmem:[#allocation2 + $0x130] sm:$0xff]  ;;  %v9032_v43 = vld [vmem:[#allocation2 + $0x120] sm:$0xff] }
0x1225   :  { %2916 = vmatprep.subr.mxu1 %v10648_v16  ;;  %6369 = vmatprep.subr.mxu0 %v10458_v0  ;;  %v9036_v16 = vld [vmem:[#allocation2 + $0x110] sm:$0xff] }
0x1226   :  { %2917 = vmatpush1.msra.mxu1 %v10649_v46  ;;  %6370 = vmatpush3.msra.mxu0 %v10650_v27  ;;  %v9038_v46 = vld [vmem:[#allocation2 + $0x118] sm:$0xff]  ;;  %v9042_v27 = vld [vmem:[#allocation2 + $0x108] sm:$0xff] }
0x1227   :  { %2918 = vmatprep.subr.mxu1 %v10651_v24  ;;  %6371 = vmatprep.subr.mxu0 %v10458_v0  ;;  %v9046_v24 = vld [vmem:[#allocation2 + $0xf8] sm:$0xff] }
0x1228   :  { %2919 = vmatpush1.msra.mxu1 %v10652_v17  ;;  %6372 = vmatpush3.msra.mxu0 %v10653_v63  ;;  %v9048_v17 = vld [vmem:[#allocation2 + $0x100] sm:$0xff]  ;;  %v9052_v63 = vld [vmem:[#allocation2 + $0xf0] sm:$0xff] }
0x1229   :  { %2920 = vmatprep.subr.mxu1 %v10654_v35  ;;  %6373 = vmatprep.subr.mxu0 %v10458_v0  ;;  %v9056_v35 = vld [vmem:[#allocation2 + $0xe0] sm:$0xff] }
0x122a   :  { %2921 = vmatpush1.msra.mxu1 %v8680_v2  ;;  %6374 = vmatpush3.msra.mxu0 %v10655_v41  ;;  %v9058_v41 = vld [vmem:[#allocation2 + $0xe8] sm:$0xff] }
0x122b   :  { %2922 = vmatprep.subr.mxu1 %v10656_v11  ;;  %6375 = vmatprep.subr.mxu0 %v10458_v0  ;;  %v9062_v11 = vld [vmem:[#allocation2 + $0xd8] sm:$0xff] }
0x122c   :  { %2923 = vmatpush1.msra.mxu1 %v8690_v60  ;;  %6376 = vmatpush3.msra.mxu0 %v8692_v61  ;;  %v10658_v60 = vld [vmem:[#allocation56_spill] sm:$0xff]  ;;  %v10659_v61 = vld [vmem:[#allocation57_spill] sm:$0xff] }
0x122d   :  { %2924 = vmatprep.subr.mxu1 %v8696_v54  ;;  %6377 = vmatprep.subr.mxu0 %v10458_v0  ;;  %v10660_v54 = vld [vmem:[#allocation58_spill] sm:$0xff] }
0x122e   :  { %2925 = vmatpush1.msra.mxu1 %v8700_v48  ;;  %6378 = vmatpush3.msra.mxu0 %v8702_v53 }
0x122f   :  { %2926 = vmatprep.subr.mxu1 %v8706_v1  ;;  %6379 = vmatprep.subr.mxu0 %v10458_v0 }
0x1230   :  { %2927 = vmatpush1.msra.mxu1 %v8710_v7  ;;  %2960 = vmatprep.mubr.f32.mxu1 %v10458_v0 }
0x1231   :  { %6380 = vmatpush3.msra.mxu0 %v8714_v45  ;;  %6381 = vmatprep.mubr.msk.f32.mxu0 %vm7113_vm0, %v10458_v0  ;;  %v10657_v45 = vld [vmem:[#allocation55_spill] sm:$0xff] }
0x1232   :  { %2961 = vmatmul.mubr.f32.vlgmr.msra.gmra.mxu1 %v8836_v5  ;;  %6382 = vmatmul.mubr.f32.vlgmr.msra.gmra.mxu0 %v8836_v5 }
0x1233   :  { %6384 = vmatprep.subr.mxu1 %v10458_v0  ;;  %6416 = vmatprep.mubr.msk.f32.mxu1 %vm7113_vm0, %v10458_v0 }
0x1234   :  { %6385 = vmatpush3.msra.mxu1 %v8762_v13  ;;  %3280 = vmatprep.mubr.f32.mxu0 %v10458_v0 }
0x1235   :  { %6386 = vmatprep.subr.mxu1 %v10458_v0  ;;  %3216 = vmatprep.subr.mxu0 %v9000_v28 }
0x1236   :  { %6387 = vmatpush3.msra.mxu1 %v8766_v14  ;;  %v10661_v14 = vld [vmem:[#allocation59_spill] sm:$0xff]  ;;  %3217 = vmatpush1.msra.mxu0 %v9002_v50 }
0x1237   :  { %6388 = vmatprep.subr.mxu1 %v10458_v0 }
0x1238   :  { %6389 = vmatpush3.msra.mxu1 %v8770_v58 }
0x1239   :  { %6390 = vmatprep.subr.mxu1 %v10458_v0 }
0x123a   :  { %6391 = vmatpush3.msra.mxu1 %v8774_v57 }
0x123b   :  { %6392 = vmatprep.subr.mxu1 %v10458_v0 }
0x123c   :  { %6393 = vmatpush3.msra.mxu1 %v8778_v37 }
0x123d   :  { %6394 = vmatprep.subr.mxu1 %v10458_v0 }
0x123e   :  { %6395 = vmatpush3.msra.mxu1 %v8782_v25 }
0x123f   :  { %6396 = vmatprep.subr.mxu1 %v10458_v0 }
0x1240   :  { %6397 = vmatpush3.msra.mxu1 %v8786_v31 }
0x1241   :  { %6398 = vmatprep.subr.mxu1 %v10458_v0 }
0x1242   :  { %6399 = vmatpush3.msra.mxu1 %v8790_v49 }
0x1243   :  { %6400 = vmatprep.subr.mxu1 %v10458_v0 }
0x1244   :  { %6401 = vmatpush3.msra.mxu1 %v8792_v52 }
0x1245   :  { %6402 = vmatprep.subr.mxu1 %v10458_v0 }
0x1246   :  { %6403 = vmatpush3.msra.mxu1 %v8796_v3 }
0x1247   :  { %6404 = vmatprep.subr.mxu1 %v10458_v0 }
0x1248   :  { %6405 = vmatpush3.msra.mxu1 %v8800_v6 }
0x1249   :  { %6406 = vmatprep.subr.mxu1 %v10458_v0 }
0x124a   :  { %6407 = vmatpush3.msra.mxu1 %v8804_v12 }
0x124b   :  { %6408 = vmatprep.subr.mxu1 %v10458_v0 }
0x124c   :  { %6409 = vmatpush3.msra.mxu1 %v10657_v45  ;;  %v9066_v45 = vld [vmem:[#allocation2 + $0xc8] sm:$0xff] }
0x124d   :  { %6410 = vmatprep.subr.mxu1 %v10458_v0 }
0x124e   :  { %6411 = vmatpush3.msra.mxu1 %v10658_v60  ;;  %v9068_v60 = vld [vmem:[#allocation2 + $0xd0] sm:$0xff] }
0x124f   :  { %6412 = vmatprep.subr.mxu1 %v10458_v0 }
0x1250   :  { %6413 = vmatpush3.msra.mxu1 %v10659_v61  ;;  %v9072_v61 = vld [vmem:[#allocation2 + $0xc0] sm:$0xff] }
0x1251   :  { %6414 = vmatprep.subr.mxu1 %v10458_v0 }
0x1252   :  { %6415 = vmatpush3.msra.mxu1 %v10660_v54  ;;  %v9076_v54 = vld [vmem:[#allocation2 + $0xb0] sm:$0xff] }
0x1253   :  { %6419 = vmatprep.subr.mxu1 %v10458_v0 }
0x12d1   :  { %v2841_v48 = vpop.f32.mrf.mxu0  ;;  %v2770_v1 = vpop.f32.mrf.mxu1 }
0x12d3   :  { %v6348_v53 = vpop.f32.mrf.mxu0  ;;  %v2772_v7 = vpop.f32.mrf.mxu1 }
0x12d4   :  { %v9082_v53 = vld [vmem:[#allocation2 + $0xa8] sm:$0xff] }
0x12f2   :  { %v2962_v2 = vpop.f32.mrf.mxu1  ;;  %v3033_v13 = vpop.f32.mrf.mxu0 }
0x12f3   :  { %v2963_v58 = vadd.f32 %v2962_v2, %v10661_v14  ;;  %v3034_v20 = vadd.f32 %v3033_v13, %v8832_v59  ;;  %v9092_v2 = vld [vmem:[#allocation2 + $0x90] sm:$0xff]  ;;  %v9096_v13 = vld [vmem:[#allocation2 + $0x80] sm:$0xff]  ;;  %v9098_v14 = vld [vmem:[#allocation2 + $0x88] sm:$0xff] }
0x12f4   :  { %v2964_v57 = vpop.f32.mrf.mxu1  ;;  %v6383_v37 = vpop.f32.mrf.mxu0 }
0x12f5   :  { %v3037_v25 = vadd.f32 %v2963_v58, %v2770_v1  ;;  %v2965_v49 = vadd.f32 %v2964_v57, %v8829_v22  ;;  %v9086_v1 = vld [vmem:[#allocation2 + $0x98] sm:$0xff]  ;;  %v9106_v57 = vld [vmem:[#allocation2 + $0x68] sm:$0xff]  ;;  %v9108_v37 = vld [vmem:[#allocation2 + $0x70] sm:$0xff] }
0x12f6   :  { %v9102_v58 = vld [vmem:[#allocation2 + $0x78] sm:$0xff] }
0x12f7   :  { %v5257_v31 = vmul.f32 -1.442695, %v3037_v25  ;;  %v3044_v52 = vadd.f32 %v2965_v49, %v2772_v7  ;;  %v9088_v7 = vld [vmem:[#allocation2 + $0xa0] sm:$0xff]  ;;  %v9118_v49 = vld [vmem:[#allocation2 + $0x58] sm:$0xff] }
0x12f8   :  { %v9112_v25 = vld [vmem:[#allocation2 + $0x60] sm:$0xff] }
0x12f9   :  { %6903 = vpow2.f32 %v5257_v31  ;;  %v5258_v3 = vmul.f32 -1.442695, %v3044_v52  ;;  %v9116_v31 = vld [vmem:[#allocation2 + $0x50] sm:$0xff]  ;;  %v9122_v52 = vld [vmem:[#allocation2 + $0x48] sm:$0xff] }
0x12fb   :  { %6905 = vpow2.f32 %v5258_v3  ;;  %v9126_v3 = vld [vmem:[#allocation2 + $0x38] sm:$0xff] }
0x1306   :  { %v6904_v6 = vpop.eup %6903 }
0x1307   :  { %v3041_v12 = vadd.f32 1.0, %v6904_v6  ;;  %v9128_v6 = vld [vmem:[#allocation2 + $0x40] sm:$0xff] }
0x1308   :  { %v6906_v56 = vpop.eup %6905 }
0x1309   :  { %6907 = vrcp.f32 %v3041_v12  ;;  %v3048_v30 = vadd.f32 1.0, %v6906_v56  ;;  %v9132_v12 = vld [vmem:[#allocation2 + $0x30] sm:$0xff] }
0x130b   :  { %6909 = vrcp.f32 %v3048_v30 }
0x1316   :  { %v6908_v62 = vpop.eup %6907 }
0x1317   :  { %v3051_v32 = vmul.f32 %v6908_v62, %v3034_v20 }
0x1318   :  { %v6910_v8 = vpop.eup %6909 }
0x1319   :  { %v3052_v36 = vadd.f32 %v3051_v32, %v2841_v48  ;;  %v3054_v26 = vsub.f32 1.0, %v6910_v8  ;;  %v3056_v39 = vmul.f32 %v6910_v8, %v8836_v5  ;;  %v9078_v48 = vld [vmem:[#allocation2 + $0xb8] sm:$0xff]  ;;  %v9142_v32 = vld [vmem:[#allocation2 + $0x20] sm:$0xff]  ;;  %v9147_v8 = vld [vmem:[#allocation2 + $0x28] sm:$0xff] }
0x131b   :  { %6911 = vtanh.f32 %v3052_v36  ;;  %v9145_v36 = vld [vmem:[#allocation2 + $0x18] sm:$0xff] }
0x1328   :  { %v6912_v10 = vpop.eup %6911 }
0x1329   :  { %v3055_v22 = vmul.f32 %v6912_v10, %v3054_v26  ;;  %v9151_v26 = vld [vmem:[#allocation2 + $0x8] sm:$0xff]  ;;  %v9155_v10 = vld [vmem:[#allocation2] sm:$0xff] }
0x132b   :  { %v8987_v29 = vadd.f32 %v3056_v39, %v3055_v22  ;;  %v9157_v22 = vld [vmem:[#allocation2 + $0x10] sm:$0xff] }
0x132c   :  { %v9161_v39 = vld [vmem:[#allocation5 + $0x170] sm:$0xff] }
0x132d   :  { %6417 = vmatmul.mubr.f32.vlgmr.msra.gmra.mxu1 %v8987_v29 }
0x132e   :  { %6451 = vmatprep.mubr.msk.f32.mxu1 %vm7113_vm0, %v10458_v0  ;;  %6420 = vmatpush3.msra.mxu1 %v9004_v23 }
0x132f   :  { %6421 = vmatprep.subr.mxu1 %v10458_v0 }
0x1330   :  { %6422 = vmatpush3.msra.mxu1 %v9012_v4 }
0x1331   :  { %6423 = vmatprep.subr.mxu1 %v10458_v0 }
0x1332   :  { %6424 = vmatpush3.msra.mxu1 %v9018_v19 }
0x1333   :  { %6425 = vmatprep.subr.mxu1 %v10458_v0 }
0x1334   :  { %6426 = vmatpush3.msra.mxu1 %v9028_v9 }
0x1335   :  { %6427 = vmatprep.subr.mxu1 %v10458_v0 }
0x1336   :  { %6428 = vmatpush3.msra.mxu1 %v9038_v46 }
0x1337   :  { %6429 = vmatprep.subr.mxu1 %v10458_v0 }
0x1338   :  { %6430 = vmatpush3.msra.mxu1 %v9048_v17 }
0x1339   :  { %6431 = vmatprep.subr.mxu1 %v10458_v0 }
0x133a   :  { %6432 = vmatpush3.msra.mxu1 %v9058_v41 }
0x133b   :  { %6433 = vmatprep.subr.mxu1 %v10458_v0 }
0x133c   :  { %6434 = vmatpush3.msra.mxu1 %v9068_v60 }
0x133d   :  { %6435 = vmatprep.subr.mxu1 %v10458_v0 }
0x133e   :  { %6436 = vmatpush3.msra.mxu1 %v9078_v48 }
0x133f   :  { %6437 = vmatprep.subr.mxu1 %v10458_v0 }
0x1340   :  { %6438 = vmatpush3.msra.mxu1 %v9088_v7 }
0x1341   :  { %6439 = vmatprep.subr.mxu1 %v10458_v0 }
0x1342   :  { %6440 = vmatpush3.msra.mxu1 %v9098_v14 }
0x1343   :  { %6441 = vmatprep.subr.mxu1 %v10458_v0 }
0x1344   :  { %6442 = vmatpush3.msra.mxu1 %v9108_v37 }
0x1345   :  { %6443 = vmatprep.subr.mxu1 %v10458_v0 }
0x1346   :  { %6444 = vmatpush3.msra.mxu1 %v9118_v49 }
0x1347   :  { %6445 = vmatprep.subr.mxu1 %v10458_v0 }
0x1348   :  { %6446 = vmatpush3.msra.mxu1 %v9128_v6 }
0x1349   :  { %6447 = vmatprep.subr.mxu1 %v10458_v0 }
0x134a   :  { %6448 = vmatpush3.msra.mxu1 %v9147_v8 }
0x134b   :  { %6449 = vmatprep.subr.mxu1 %v10458_v0 }
0x134c   :  { %6450 = vmatpush3.msra.mxu1 %v9157_v22 }
0x134d   :  { %6454 = vmatprep.subr.mxu1 %v10458_v0 }
0x13ed   :  { %v3141_v44 = vpop.f32.mrf.mxu1 }
0x13ee   :  { %v3142_v59 = vadd.f32 %v3141_v44, %v8873_v47  ;;  %v9008_v47 = vld [vmem:[#allocation2 + $0x158] sm:$0xff] }
0x13ef   :  { %v6418_v18 = vpop.f32.mrf.mxu1  ;;  %3218 = vmatprep.subr.mxu0 %v9008_v47 }
0x13f0   :  { %3146 = vst [vmem:[#allocation11 + $0x28] sm:$0xff] %v3142_v59  ;;  %3147 = vmax.xlane.f32.xlu1 %v3142_v59  ;;  %3219 = vmatpush1.msra.mxu0 %v9010_v42 }
0x13f1   :  { %3220 = vmatprep.subr.mxu0 %v9016_v34 }
0x13f2   :  { %3221 = vmatpush1.msra.mxu0 %v9022_v38 }
0x13f3   :  { %3222 = vmatprep.subr.mxu0 %v9026_v33 }
0x13f4   :  { %3223 = vmatpush1.msra.mxu0 %v9032_v43 }
0x13f5   :  { %3224 = vmatprep.subr.mxu0 %v9036_v16 }
0x13f6   :  { %3225 = vmatpush1.msra.mxu0 %v9042_v27 }
0x13f7   :  { %3226 = vmatprep.subr.mxu0 %v9046_v24 }
0x13f8   :  { %3227 = vmatpush1.msra.mxu0 %v9052_v63 }
0x13f9   :  { %3228 = vmatprep.subr.mxu0 %v9056_v35 }
0x13fa   :  { %3229 = vmatpush1.msra.mxu0 %v9062_v11 }
0x13fb   :  { %3230 = vmatprep.subr.mxu0 %v9066_v45 }
0x13fc   :  { %3231 = vmatpush1.msra.mxu0 %v9072_v61 }
0x13fd   :  { %3232 = vmatprep.subr.mxu0 %v9076_v54 }
0x13fe   :  { %3233 = vmatpush1.msra.mxu0 %v9082_v53 }
0x13ff   :  { %3234 = vmatprep.subr.mxu0 %v9086_v1 }
0x1400   :  { %3235 = vmatpush1.msra.mxu0 %v9092_v2 }
0x1401   :  { %3236 = vmatprep.subr.mxu0 %v9096_v13 }
0x1402   :  { %3237 = vmatpush1.msra.mxu0 %v9102_v58 }
0x1403   :  { %3238 = vmatprep.subr.mxu0 %v9106_v57 }
0x1404   :  { %3239 = vmatpush1.msra.mxu0 %v9112_v25 }
0x1405   :  { %3240 = vmatprep.subr.mxu0 %v9116_v31 }
0x1406   :  { %3241 = vmatpush1.msra.mxu0 %v9122_v52 }
0x1407   :  { %3242 = vmatprep.subr.mxu0 %v9126_v3 }
0x1408   :  { %3243 = vmatpush1.msra.mxu0 %v9132_v12 }
0x1409   :  { %3244 = vmatprep.subr.mxu0 %v9142_v32 }
0x140a   :  { %3245 = vmatpush1.msra.mxu0 %v9145_v36 }
0x140b   :  { %3246 = vmatprep.subr.mxu0 %v9151_v26 }
0x140c   :  { %3247 = vmatpush1.msra.mxu0 %v9155_v10 }
0x140d   :  { %3408 = vmatprep.subr.mxu0 %v9161_v39 }
0x1479   :  { %v3148_v15 = vpop.xlane.xlu1 %3147 }
0x147a   :  { %vm3149_vm2 = vcmp.eq.f32.partialorder %v3142_v59, %v3148_v15 }
0x147b   :  { %v8994_v21 = vsel %vm3149_vm2, %v7295_v40, 128 }
0x147c   :  { %v3152_v5 = vshra.s32 %v8994_v21, 16  ;;  %v3151_v56 = vand.u32 65535, %v8994_v21 }
0x147e   :  { %v8997_v51 = vcvt.s32.f32 %v3152_v5  ;;  %v3153_v20 = vcvt.s32.f32 %v3151_v56  ;;  %v9165_v5 = vld [vmem:[#allocation5 + $0x168] sm:$0xff]  ;;  %v9170_v56 = vld [vmem:[#allocation5 + $0x158] sm:$0xff] }
0x147f   :  { %10662 = vst [vmem:[#allocation19_spill] sm:$0xff] %v9170_v56 }
0x1480   :  { %3155 = vmin.xlane.f32.xlu0 %v8997_v51 }
0x1509   :  { %v3156_v30 = vpop.xlane.xlu0 %3155 }
0x150a   :  { %vm3157_vm3 = vcmp.eq.f32.partialorder %v8997_v51, %v3156_v30  ;;  %v3162_v44 = vcvt.f32.s32 %v3156_v30  ;;  %v9167_v51 = vld [vmem:[#allocation5 + $0x178] sm:$0xff]  ;;  %v9180_v30 = vld [vmem:[#allocation5 + $0x140] sm:$0xff] }
0x150b   :  { %v3158_v62 = vsel %vm3157_vm3, %v3153_v20, inf  ;;  %v9174_v20 = vld [vmem:[#allocation5 + $0x150] sm:$0xff]  ;;  %10665 = vst [vmem:[#allocation21_spill] sm:$0xff] %v9180_v30 }
0x150c   :  { %3159 = vmin.xlane.f32.xlu1 %v3158_v62  ;;  %v3163_v18 = vshll.u32 %v3162_v44, 16  ;;  %10663 = vst [vmem:[#allocation33_spill] sm:$0xff] %v9174_v20  ;;  %v9176_v62 = vld [vmem:[#allocation5 + $0x160] sm:$0xff]  ;;  %v9184_v44 = vld [vmem:[#allocation5 + $0x138] sm:$0xff] }
0x150d   :  { %10664 = vst [vmem:[#allocation20_spill] sm:$0xff] %v9176_v62  ;;  %10666 = vst [vmem:[#allocation36_spill] sm:$0xff] %v9184_v44 }
0x1595   :  { %v3160_v59 = vpop.xlane.xlu1 %3159 }
0x1596   :  { %v3161_v15 = vcvt.f32.s32 %v3160_v59  ;;  %v9186_v59 = vld [vmem:[#allocation5 + $0x148] sm:$0xff] }
0x1597   :  { %10667 = vst [vmem:[#allocation22_spill] sm:$0xff] %v9186_v59 }
0x1598   :  { %v3164_v21 = vadd.s32 %v3163_v18, %v3161_v15  ;;  %v9190_v18 = vld [vmem:[#allocation5 + $0x128] sm:$0xff]  ;;  %v9194_v15 = vld [vmem:[#allocation5 + $0x120] sm:$0xff] }
0x1599   :  { %10668 = vst [vmem:[#allocation23_spill] sm:$0xff] %v9190_v18  ;;  %10669 = vst [vmem:[#allocation39_spill] sm:$0xff] %v9194_v15 }
0x159a   :  { %vm3165_vm4 = vcmp.eq.s32.totalorder %v7295_v40, %v3164_v21  ;;  %v9196_v21 = vld [vmem:[#allocation5 + $0x130] sm:$0xff] }
0x159b   :  { %5260 = vmatmul.mubr.msk.f32.vlgmr.msra.gmra.mxu0 %vm3165_vm4, %v10432_v55  ;;  %6452 = vmatmul.mubr.msk.f32.vlgmr.msra.gmra.mxu1 %vm3165_vm4, %v10432_v55  ;;  %10670 = vst [vmem:[#allocation24_spill] sm:$0xff] %v9196_v21 }
0x159c   :  { %3409 = vmatpush1.msra.mxu0 %v9165_v5  ;;  %6455 = vmatpush3.msra.mxu1 %v9167_v51 }
0x159d   :  { %3410 = vmatprep.subr.mxu0 %v9170_v56  ;;  %6456 = vmatprep.subr.mxu1 %v10458_v0  ;;  %v9200_v56 = vld [vmem:[#allocation5 + $0x110] sm:$0xff] }
0x159e   :  { %3411 = vmatpush1.msra.mxu0 %v9174_v20  ;;  %6457 = vmatpush3.msra.mxu1 %v9176_v62  ;;  %10671 = vst [vmem:[#allocation25_spill] sm:$0xff] %v9200_v56  ;;  %v9204_v62 = vld [vmem:[#allocation5 + $0x108] sm:$0xff]  ;;  %v9206_v20 = vld [vmem:[#allocation5 + $0x118] sm:$0xff] }
0x159f   :  { %3412 = vmatprep.subr.mxu0 %v9180_v30  ;;  %6458 = vmatprep.subr.mxu1 %v10458_v0  ;;  %10672 = vst [vmem:[#allocation42_spill] sm:$0xff] %v9204_v62  ;;  %10673 = vst [vmem:[#allocation26_spill] sm:$0xff] %v9206_v20  ;;  %v9210_v30 = vld [vmem:[#allocation5 + $0xf8] sm:$0xff] }
0x15a0   :  { %3413 = vmatpush1.msra.mxu0 %v9184_v44  ;;  %6459 = vmatpush3.msra.mxu1 %v9186_v59  ;;  %10674 = vst [vmem:[#allocation27_spill] sm:$0xff] %v9210_v30  ;;  %v9214_v59 = vld [vmem:[#allocation5 + $0xf0] sm:$0xff]  ;;  %v9216_v44 = vld [vmem:[#allocation5 + $0x100] sm:$0xff] }
0x15a1   :  { %3414 = vmatprep.subr.mxu0 %v9190_v18  ;;  %6460 = vmatprep.subr.mxu1 %v10458_v0  ;;  %10675 = vst [vmem:[#allocation45_spill] sm:$0xff] %v9214_v59  ;;  %10676 = vst [vmem:[#allocation28_spill] sm:$0xff] %v9216_v44  ;;  %v9220_v18 = vld [vmem:[#allocation5 + $0xe0] sm:$0xff] }
0x15a2   :  { %3415 = vmatpush1.msra.mxu0 %v9194_v15  ;;  %6461 = vmatpush3.msra.mxu1 %v9196_v21  ;;  %10677 = vst [vmem:[#allocation29_spill] sm:$0xff] %v9220_v18  ;;  %v9224_v21 = vld [vmem:[#allocation5 + $0xd8] sm:$0xff]  ;;  %v9226_v15 = vld [vmem:[#allocation5 + $0xe8] sm:$0xff] }
0x15a3   :  { %3416 = vmatprep.subr.mxu0 %v9200_v56  ;;  %6462 = vmatprep.subr.mxu1 %v10458_v0  ;;  %10678 = vst [vmem:[#allocation30_spill] sm:$0xff] %v9224_v21  ;;  %10679 = vst [vmem:[#allocation31_spill] sm:$0xff] %v9226_v15  ;;  %v9230_v56 = vld [vmem:[#allocation5 + $0xc8] sm:$0xff] }
0x15a4   :  { %3417 = vmatpush1.msra.mxu0 %v9204_v62  ;;  %6463 = vmatpush3.msra.mxu1 %v9206_v20  ;;  %10680 = vst [vmem:[#allocation32_spill] sm:$0xff] %v9230_v56  ;;  %v9234_v20 = vld [vmem:[#allocation5 + $0xc0] sm:$0xff]  ;;  %v9236_v62 = vld [vmem:[#allocation5 + $0xd0] sm:$0xff] }
0x15a5   :  { %3418 = vmatprep.subr.mxu0 %v9210_v30  ;;  %6464 = vmatprep.subr.mxu1 %v10458_v0  ;;  %10681 = vst [vmem:[#allocation34_spill] sm:$0xff] %v9234_v20  ;;  %10682 = vst [vmem:[#allocation35_spill] sm:$0xff] %v9236_v62  ;;  %v9240_v30 = vld [vmem:[#allocation5 + $0xb0] sm:$0xff] }
0x15a6   :  { %3419 = vmatpush1.msra.mxu0 %v9214_v59  ;;  %6465 = vmatpush3.msra.mxu1 %v9216_v44  ;;  %10683 = vst [vmem:[#allocation37_spill] sm:$0xff] %v9240_v30  ;;  %v9244_v44 = vld [vmem:[#allocation5 + $0xa8] sm:$0xff]  ;;  %v9246_v59 = vld [vmem:[#allocation5 + $0xb8] sm:$0xff] }
0x15a7   :  { %3420 = vmatprep.subr.mxu0 %v9220_v18  ;;  %6466 = vmatprep.subr.mxu1 %v10458_v0  ;;  %10684 = vst [vmem:[#allocation53_spill] sm:$0xff] %v9244_v44  ;;  %10685 = vst [vmem:[#allocation38_spill] sm:$0xff] %v9246_v59  ;;  %v9250_v18 = vld [vmem:[#allocation5 + $0x98] sm:$0xff] }
0x15a8   :  { %3421 = vmatpush1.msra.mxu0 %v9224_v21  ;;  %6467 = vmatpush3.msra.mxu1 %v9226_v15  ;;  %10686 = vst [vmem:[#allocation40_spill] sm:$0xff] %v9250_v18  ;;  %v9254_v15 = vld [vmem:[#allocation5 + $0x90] sm:$0xff]  ;;  %v9256_v21 = vld [vmem:[#allocation5 + $0xa0] sm:$0xff] }
0x15a9   :  { %3422 = vmatprep.subr.mxu0 %v9230_v56  ;;  %6468 = vmatprep.subr.mxu1 %v10458_v0  ;;  %10687 = vst [vmem:[#allocation54_spill] sm:$0xff] %v9254_v15  ;;  %10688 = vst [vmem:[#allocation41_spill] sm:$0xff] %v9256_v21  ;;  %v9260_v56 = vld [vmem:[#allocation5 + $0x80] sm:$0xff] }
0x15aa   :  { %3423 = vmatpush1.msra.mxu0 %v9234_v20  ;;  %6469 = vmatpush3.msra.mxu1 %v9236_v62  ;;  %10689 = vst [vmem:[#allocation43_spill] sm:$0xff] %v9260_v56  ;;  %v9264_v62 = vld [vmem:[#allocation5 + $0x78] sm:$0xff]  ;;  %v9266_v20 = vld [vmem:[#allocation5 + $0x88] sm:$0xff] }
0x15ab   :  { %3424 = vmatprep.subr.mxu0 %v9240_v30  ;;  %6470 = vmatprep.subr.mxu1 %v10458_v0  ;;  %10690 = vst [vmem:[#allocation44_spill] sm:$0xff] %v9264_v62  ;;  %10691 = vst [vmem:[#allocation46_spill] sm:$0xff] %v9266_v20  ;;  %v9270_v30 = vld [vmem:[#allocation5 + $0x68] sm:$0xff] }
0x15ac   :  { %3425 = vmatpush1.msra.mxu0 %v9244_v44  ;;  %6471 = vmatpush3.msra.mxu1 %v9246_v59  ;;  %10692 = vst [vmem:[#allocation47_spill] sm:$0xff] %v9270_v30  ;;  %v9274_v59 = vld [vmem:[#allocation5 + $0x60] sm:$0xff]  ;;  %v9276_v44 = vld [vmem:[#allocation5 + $0x70] sm:$0xff] }
0x15ad   :  { %3426 = vmatprep.subr.mxu0 %v9250_v18  ;;  %6472 = vmatprep.subr.mxu1 %v10458_v0  ;;  %10693 = vst [vmem:[#allocation48_spill] sm:$0xff] %v9274_v59  ;;  %10694 = vst [vmem:[#allocation49_spill] sm:$0xff] %v9276_v44  ;;  %v9280_v18 = vld [vmem:[#allocation5 + $0x50] sm:$0xff] }
0x15ae   :  { %3427 = vmatpush1.msra.mxu0 %v9254_v15  ;;  %6473 = vmatpush3.msra.mxu1 %v9256_v21  ;;  %10695 = vst [vmem:[#allocation50_spill] sm:$0xff] %v9280_v18  ;;  %v9284_v21 = vld [vmem:[#allocation5 + $0x48] sm:$0xff]  ;;  %v9286_v15 = vld [vmem:[#allocation5 + $0x58] sm:$0xff] }
0x15af   :  { %3428 = vmatprep.subr.mxu0 %v9260_v56  ;;  %6474 = vmatprep.subr.mxu1 %v10458_v0  ;;  %10696 = vst [vmem:[#allocation51_spill] sm:$0xff] %v9286_v15  ;;  %v9290_v56 = vld [vmem:[#allocation5 + $0x38] sm:$0xff] }
0x15b0   :  { %3429 = vmatpush1.msra.mxu0 %v9264_v62  ;;  %6475 = vmatpush3.msra.mxu1 %v9266_v20  ;;  %10697 = vst [vmem:[#allocation52_spill] sm:$0xff] %v9290_v56  ;;  %v9294_v20 = vld [vmem:[#allocation5 + $0x30] sm:$0xff]  ;;  %v9296_v62 = vld [vmem:[#allocation5 + $0x40] sm:$0xff] }
0x15b1   :  { %3430 = vmatprep.subr.mxu0 %v9270_v30  ;;  %6476 = vmatprep.subr.mxu1 %v10458_v0  ;;  %v9300_v30 = vld [vmem:[#allocation5 + $0x20] sm:$0xff] }
0x15b2   :  { %3431 = vmatpush1.msra.mxu0 %v9274_v59  ;;  %6477 = vmatpush3.msra.mxu1 %v9276_v44  ;;  %v9304_v44 = vld [vmem:[#allocation5 + $0x18] sm:$0xff]  ;;  %v9306_v59 = vld [vmem:[#allocation5 + $0x28] sm:$0xff] }
0x15b3   :  { %3432 = vmatprep.subr.mxu0 %v9280_v18  ;;  %6478 = vmatprep.subr.mxu1 %v10458_v0  ;;  %v9310_v18 = vld [vmem:[#allocation5 + $0x8] sm:$0xff] }
0x15b4   :  { %3433 = vmatpush1.msra.mxu0 %v9284_v21  ;;  %6479 = vmatpush3.msra.mxu1 %v9286_v15  ;;  %v9314_v15 = vld [vmem:[#allocation5] sm:$0xff] }
0x15b5   :  { %3434 = vmatprep.subr.mxu0 %v9290_v56  ;;  %6480 = vmatprep.subr.mxu1 %v10458_v0  ;;  %v9318_v56 = vld [vmem:[#allocation5 + $0x10] sm:$0xff] }
0x15b6   :  { %3435 = vmatpush1.msra.mxu0 %v9294_v20  ;;  %6481 = vmatpush3.msra.mxu1 %v9296_v62 }
0x15b7   :  { %3436 = vmatprep.subr.mxu0 %v9300_v30  ;;  %6482 = vmatprep.subr.mxu1 %v10458_v0 }
0x15b8   :  { %3437 = vmatpush1.msra.mxu0 %v9304_v44  ;;  %6483 = vmatpush3.msra.mxu1 %v9306_v59 }
0x15b9   :  { %3438 = vmatprep.subr.mxu0 %v9310_v18  ;;  %6484 = vmatprep.subr.mxu1 %v10458_v0 }
0x15ba   :  { %3439 = vmatpush1.msra.mxu0 %v9314_v15  ;;  %3472 = vmatprep.mubr.f32.mxu0 %v10458_v0 }
0x15bb   :  { %6485 = vmatpush3.msra.mxu1 %v9318_v56  ;;  %6486 = vmatprep.mubr.msk.f32.mxu1 %vm7113_vm0, %v10458_v0 }
0x15bc   :  { %3473 = vmatmul.mubr.f32.vlgmr.msra.gmra.mxu0 %v8987_v29  ;;  %6487 = vmatmul.mubr.f32.vlgmr.msra.gmra.mxu1 %v8987_v29 }
0x15bd   :  { %6489 = vmatprep.subr.mxu0 %v10458_v0  ;;  %6521 = vmatprep.mubr.msk.f32.mxu0 %vm7113_vm0, %v10458_v0 }
0x15be   :  { %3728 = vmatprep.subr.mxu1 %v9000_v28  ;;  %3792 = vmatprep.mubr.f32.mxu1 %v10458_v0  ;;  %v9366_v28 = vld [vmem:[#allocation8 + $0x78] sm:$0xff] }
0x15bf   :  { %3729 = vmatpush1.msra.mxu1 %v9002_v50  ;;  %6490 = vmatpush3.msra.mxu0 %v9366_v28  ;;  %v9370_v50 = vld [vmem:[#allocation8 + $0x70] sm:$0xff] }
0x15c0   :  { %3730 = vmatprep.subr.mxu1 %v9008_v47  ;;  %6491 = vmatprep.subr.mxu0 %v10458_v0  ;;  %v9374_v47 = vld [vmem:[#allocation8 + $0x68] sm:$0xff] }
0x15c1   :  { %3731 = vmatpush1.msra.mxu1 %v9010_v42  ;;  %6492 = vmatpush3.msra.mxu0 %v9370_v50  ;;  %v9378_v42 = vld [vmem:[#allocation8 + $0x60] sm:$0xff] }
0x15c2   :  { %3732 = vmatprep.subr.mxu1 %v9016_v34  ;;  %6493 = vmatprep.subr.mxu0 %v10458_v0  ;;  %v9382_v34 = vld [vmem:[#allocation8 + $0x58] sm:$0xff] }
0x15c3   :  { %3733 = vmatpush1.msra.mxu1 %v9022_v38  ;;  %6494 = vmatpush3.msra.mxu0 %v9374_v47  ;;  %v9386_v38 = vld [vmem:[#allocation8 + $0x50] sm:$0xff] }
0x15c4   :  { %3734 = vmatprep.subr.mxu1 %v9026_v33  ;;  %6495 = vmatprep.subr.mxu0 %v10458_v0  ;;  %v9390_v33 = vld [vmem:[#allocation8 + $0x48] sm:$0xff] }
0x15c5   :  { %3735 = vmatpush1.msra.mxu1 %v9032_v43  ;;  %6496 = vmatpush3.msra.mxu0 %v9378_v42  ;;  %v9394_v43 = vld [vmem:[#allocation8 + $0x40] sm:$0xff] }
0x15c6   :  { %3736 = vmatprep.subr.mxu1 %v9036_v16  ;;  %6497 = vmatprep.subr.mxu0 %v10458_v0  ;;  %v9396_v16 = vld [vmem:[#allocation8 + $0x38] sm:$0xff] }
0x15c7   :  { %3737 = vmatpush1.msra.mxu1 %v9042_v27  ;;  %6498 = vmatpush3.msra.mxu0 %v9382_v34  ;;  %v9400_v27 = vld [vmem:[#allocation8 + $0x30] sm:$0xff] }
0x15c8   :  { %3738 = vmatprep.subr.mxu1 %v9046_v24  ;;  %6499 = vmatprep.subr.mxu0 %v10458_v0  ;;  %v9404_v24 = vld [vmem:[#allocation8 + $0x28] sm:$0xff] }
0x15c9   :  { %3739 = vmatpush1.msra.mxu1 %v9052_v63  ;;  %6500 = vmatpush3.msra.mxu0 %v9386_v38  ;;  %v9408_v63 = vld [vmem:[#allocation8 + $0x20] sm:$0xff] }
0x15ca   :  { %3740 = vmatprep.subr.mxu1 %v9056_v35  ;;  %6501 = vmatprep.subr.mxu0 %v10458_v0  ;;  %v9412_v35 = vld [vmem:[#allocation8 + $0x18] sm:$0xff] }
0x15cb   :  { %3741 = vmatpush1.msra.mxu1 %v9062_v11  ;;  %6502 = vmatpush3.msra.mxu0 %v9390_v33  ;;  %10698 = vst [vmem:[#allocation55_spill] sm:$0xff] %v9412_v35  ;;  %v9416_v11 = vld [vmem:[#allocation8 + $0x10] sm:$0xff] }
0x15cc   :  { %3742 = vmatprep.subr.mxu1 %v9066_v45  ;;  %6503 = vmatprep.subr.mxu0 %v10458_v0  ;;  %10699 = vst [vmem:[#allocation56_spill] sm:$0xff] %v9416_v11  ;;  %v9420_v45 = vld [vmem:[#allocation8 + $0x8] sm:$0xff] }
0x15cd   :  { %3743 = vmatpush1.msra.mxu1 %v9072_v61  ;;  %6504 = vmatpush3.msra.mxu0 %v9394_v43  ;;  %10700 = vst [vmem:[#allocation57_spill] sm:$0xff] %v9420_v45  ;;  %v9424_v61 = vld [vmem:[#allocation8] sm:$0xff] }
0x15ce   :  { %3744 = vmatprep.subr.mxu1 %v9076_v54  ;;  %6505 = vmatprep.subr.mxu0 %v10458_v0  ;;  %10701 = vst [vmem:[#allocation58_spill] sm:$0xff] %v9424_v61 }
0x15cf   :  { %3745 = vmatpush1.msra.mxu1 %v9082_v53  ;;  %6506 = vmatpush3.msra.mxu0 %v9396_v16 }
0x15d0   :  { %3746 = vmatprep.subr.mxu1 %v9086_v1  ;;  %6507 = vmatprep.subr.mxu0 %v10458_v0 }
0x15d1   :  { %3747 = vmatpush1.msra.mxu1 %v9092_v2  ;;  %6508 = vmatpush3.msra.mxu0 %v9400_v27 }
0x15d2   :  { %3748 = vmatprep.subr.mxu1 %v9096_v13  ;;  %6509 = vmatprep.subr.mxu0 %v10458_v0  ;;  %v9430_v13 = vld [vmem:[#allocation7] sm:$0xff] }
0x15d3   :  { %3749 = vmatpush1.msra.mxu1 %v9102_v58  ;;  %6510 = vmatpush3.msra.mxu0 %v9404_v24  ;;  %10702 = vst [vmem:[#allocation59_spill] sm:$0xff] %v9430_v13 }
0x15d4   :  { %3750 = vmatprep.subr.mxu1 %v9106_v57  ;;  %6511 = vmatprep.subr.mxu0 %v10458_v0 }
0x15d5   :  { %3751 = vmatpush1.msra.mxu1 %v9112_v25  ;;  %6512 = vmatpush3.msra.mxu0 %v9408_v63 }
0x15d6   :  { %3752 = vmatprep.subr.mxu1 %v9116_v31  ;;  %6513 = vmatprep.subr.mxu0 %v10458_v0  ;;  %v9433_v31 = vld [vmem:[#allocation7 + $0x8] sm:$0xff] }
0x15d7   :  { %3753 = vmatpush1.msra.mxu1 %v9122_v52  ;;  %6514 = vmatpush3.msra.mxu0 %v9412_v35 }
0x15d8   :  { %3754 = vmatprep.subr.mxu1 %v9126_v3  ;;  %6515 = vmatprep.subr.mxu0 %v10458_v0 }
0x15d9   :  { %3755 = vmatpush1.msra.mxu1 %v9132_v12  ;;  %6516 = vmatpush3.msra.mxu0 %v9416_v11 }
0x15da   :  { %3756 = vmatprep.subr.mxu1 %v9142_v32  ;;  %6517 = vmatprep.subr.mxu0 %v10458_v0 }
0x15db   :  { %3757 = vmatpush1.msra.mxu1 %v9145_v36  ;;  %6518 = vmatpush3.msra.mxu0 %v9420_v45  ;;  %v9436_v45 = vld [vmem:[#allocation7 + $0x10] sm:$0xff] }
0x15dc   :  { %3758 = vmatprep.subr.mxu1 %v9151_v26  ;;  %6519 = vmatprep.subr.mxu0 %v10458_v0 }
0x15dd   :  { %3759 = vmatpush1.msra.mxu1 %v9155_v10  ;;  %6520 = vmatpush3.msra.mxu0 %v9424_v61 }
0x15de   :  { %3920 = vmatprep.subr.mxu1 %v9161_v39  ;;  %6524 = vmatprep.subr.mxu0 %v10458_v0 }
0x165b   :  { %v3353_v54 = vpop.f32.mrf.mxu1  ;;  %v3282_v1 = vpop.f32.mrf.mxu0 }
0x165d   :  { %v6453_v53 = vpop.f32.mrf.mxu1  ;;  %v3284_v2 = vpop.f32.mrf.mxu0 }
0x167c   :  { %v3474_v58 = vpop.f32.mrf.mxu0  ;;  %v3545_v57 = vpop.f32.mrf.mxu1 }
0x167d   :  { %v3475_v25 = vadd.f32 %v3474_v58, %v9430_v13  ;;  %v3546_v58 = vadd.f32 %v3545_v57, %v9436_v45  ;;  %v10708_v57 = vld [vmem:[#allocation22_spill] sm:$0xff] }
0x167e   :  { %v3476_v52 = vpop.f32.mrf.mxu0  ;;  %v6488_v3 = vpop.f32.mrf.mxu1 }
0x167f   :  { %v3549_v12 = vadd.f32 %v3475_v25, %v3282_v1  ;;  %v3477_v36 = vadd.f32 %v3476_v52, %v9433_v31 }
0x1681   :  { %v5262_v32 = vmul.f32 -1.442695, %v3549_v12  ;;  %v3556_v26 = vadd.f32 %v3477_v36, %v3284_v2  ;;  %v10709_v36 = vld [vmem:[#allocation23_spill] sm:$0xff] }
0x1683   :  { %6913 = vpow2.f32 %v5262_v32  ;;  %v5263_v10 = vmul.f32 -1.442695, %v3556_v26  ;;  %v10712_v26 = vld [vmem:[#allocation25_spill] sm:$0xff] }
0x1685   :  { %6915 = vpow2.f32 %v5263_v10  ;;  %v10713_v10 = vld [vmem:[#allocation42_spill] sm:$0xff] }
0x1690   :  { %v6914_v39 = vpop.eup %6913 }
0x1691   :  { %v3553_v53 = vadd.f32 1.0, %v6914_v39  ;;  %v10714_v39 = vld [vmem:[#allocation26_spill] sm:$0xff] }
0x1692   :  { %v6916_v61 = vpop.eup %6915 }
0x1693   :  { %6917 = vrcp.f32 %v3553_v53  ;;  %v3560_v11 = vadd.f32 1.0, %v6916_v61  ;;  %v10705_v61 = vld [vmem:[#allocation20_spill] sm:$0xff]  ;;  %v10715_v53 = vld [vmem:[#allocation27_spill] sm:$0xff] }
0x1695   :  { %6919 = vrcp.f32 %v3560_v11  ;;  %v10704_v11 = vld [vmem:[#allocation33_spill] sm:$0xff] }
0x16a0   :  { %v6918_v13 = vpop.eup %6917 }
0x16a1   :  { %v3563_v35 = vmul.f32 %v6918_v13, %v3546_v58  ;;  %v10707_v13 = vld [vmem:[#allocation36_spill] sm:$0xff]  ;;  %v10716_v58 = vld [vmem:[#allocation45_spill] sm:$0xff] }
0x16a2   :  { %v6920_v25 = vpop.eup %6919 }
0x16a3   :  { %v3564_v1 = vadd.f32 %v3563_v35, %v3353_v54  ;;  %v3566_v52 = vsub.f32 1.0, %v6920_v25  ;;  %v3568_v12 = vmul.f32 %v6920_v25, %v8987_v29  ;;  %v9477_v29 = vld [vmem:[#allocation10] sm:$0xff]  ;;  %v10706_v54 = vld [vmem:[#allocation21_spill] sm:$0xff] }
0x16a4   :  { %v10703_v35 = vld [vmem:[#allocation19_spill] sm:$0xff]  ;;  %v10718_v25 = vld [vmem:[#allocation29_spill] sm:$0xff] }
0x16a5   :  { %6921 = vtanh.f32 %v3564_v1  ;;  %v10717_v1 = vld [vmem:[#allocation28_spill] sm:$0xff] }
0x16b2   :  { %v6922_v3 = vpop.eup %6921 }
0x16b3   :  { %v3567_v2 = vmul.f32 %v6922_v3, %v3566_v52  ;;  %v10719_v52 = vld [vmem:[#allocation30_spill] sm:$0xff]  ;;  %v10720_v3 = vld [vmem:[#allocation31_spill] sm:$0xff] }
0x16b5   :  { %v9440_v32 = vadd.f32 %v3568_v12, %v3567_v2  ;;  %v10721_v2 = vld [vmem:[#allocation32_spill] sm:$0xff]  ;;  %v10722_v12 = vld [vmem:[#allocation34_spill] sm:$0xff] }
0x16b7   :  { %6522 = vmatmul.mubr.f32.vlgmr.msra.gmra.mxu0 %v9440_v32 }
0x16b8   :  { %6525 = vmatpush3.msra.mxu0 %v9004_v23  ;;  %6556 = vmatprep.mubr.msk.f32.mxu0 %vm7113_vm0, %v10458_v0 }
0x16b9   :  { %6526 = vmatprep.subr.mxu0 %v10458_v0 }
0x16ba   :  { %6527 = vmatpush3.msra.mxu0 %v9012_v4 }
0x16bb   :  { %6528 = vmatprep.subr.mxu0 %v10458_v0 }
0x16bc   :  { %6529 = vmatpush3.msra.mxu0 %v9018_v19 }
0x16bd   :  { %6530 = vmatprep.subr.mxu0 %v10458_v0 }
0x16be   :  { %6531 = vmatpush3.msra.mxu0 %v9028_v9 }
0x16bf   :  { %6532 = vmatprep.subr.mxu0 %v10458_v0 }
0x16c0   :  { %6533 = vmatpush3.msra.mxu0 %v9038_v46 }
0x16c1   :  { %6534 = vmatprep.subr.mxu0 %v10458_v0 }
0x16c2   :  { %6535 = vmatpush3.msra.mxu0 %v9048_v17 }
0x16c3   :  { %6536 = vmatprep.subr.mxu0 %v10458_v0 }
0x16c4   :  { %6537 = vmatpush3.msra.mxu0 %v9058_v41 }
0x16c5   :  { %6538 = vmatprep.subr.mxu0 %v10458_v0 }
0x16c6   :  { %6539 = vmatpush3.msra.mxu0 %v9068_v60 }
0x16c7   :  { %6540 = vmatprep.subr.mxu0 %v10458_v0 }
0x16c8   :  { %6541 = vmatpush3.msra.mxu0 %v9078_v48 }
0x16c9   :  { %6542 = vmatprep.subr.mxu0 %v10458_v0 }
0x16ca   :  { %6543 = vmatpush3.msra.mxu0 %v9088_v7 }
0x16cb   :  { %6544 = vmatprep.subr.mxu0 %v10458_v0 }
0x16cc   :  { %6545 = vmatpush3.msra.mxu0 %v9098_v14 }
0x16cd   :  { %6546 = vmatprep.subr.mxu0 %v10458_v0 }
0x16ce   :  { %6547 = vmatpush3.msra.mxu0 %v9108_v37 }
0x16cf   :  { %6548 = vmatprep.subr.mxu0 %v10458_v0 }
0x16d0   :  { %6549 = vmatpush3.msra.mxu0 %v9118_v49 }
0x16d1   :  { %6550 = vmatprep.subr.mxu0 %v10458_v0 }
0x16d2   :  { %6551 = vmatpush3.msra.mxu0 %v9128_v6 }
0x16d3   :  { %6552 = vmatprep.subr.mxu0 %v10458_v0 }
0x16d4   :  { %6553 = vmatpush3.msra.mxu0 %v9147_v8 }
0x16d5   :  { %6554 = vmatprep.subr.mxu0 %v10458_v0 }
0x16d6   :  { %6555 = vmatpush3.msra.mxu0 %v9157_v22 }
0x16d7   :  { %6559 = vmatprep.subr.mxu0 %v10458_v0 }
0x1777   :  { %v3653_v23 = vpop.f32.mrf.mxu0 }
0x1778   :  { %v3654_v4 = vadd.f32 %v3653_v23, %v9477_v29  ;;  %v10723_v23 = vld [vmem:[#allocation35_spill] sm:$0xff] }
0x1779   :  { %v6523_v19 = vpop.f32.mrf.mxu0 }
0x177a   :  { %3658 = vst [vmem:[#allocation11 + $0x30] sm:$0xff] %v3654_v4  ;;  %3659 = vmax.xlane.f32.xlu0 %v3654_v4  ;;  %v10725_v19 = vld [vmem:[#allocation53_spill] sm:$0xff] }
0x1803   :  { %v3660_v9 = vpop.xlane.xlu0 %3659 }
0x1804   :  { %vm3661_vm5 = vcmp.eq.f32.partialorder %v3654_v4, %v3660_v9  ;;  %v10724_v4 = vld [vmem:[#allocation37_spill] sm:$0xff]  ;;  %v10726_v9 = vld [vmem:[#allocation38_spill] sm:$0xff] }
0x1805   :  { %v3662_v46 = vsel %vm3661_vm5, %v7295_v40, 128 }
0x1806   :  { %v3664_v17 = vshra.s32 %v3662_v46, 16  ;;  %v3663_v60 = vand.u32 65535, %v3662_v46  ;;  %v10727_v46 = vld [vmem:[#allocation40_spill] sm:$0xff] }
0x1808   :  { %v3666_v41 = vcvt.s32.f32 %v3664_v17  ;;  %v3665_v7 = vcvt.s32.f32 %v3663_v60  ;;  %v10728_v17 = vld [vmem:[#allocation54_spill] sm:$0xff]  ;;  %v10730_v60 = vld [vmem:[#allocation43_spill] sm:$0xff] }
0x180a   :  { %3667 = vmin.xlane.f32.xlu1 %v3666_v41 }
0x1893   :  { %v3668_v48 = vpop.xlane.xlu1 %3667 }
0x1894   :  { %vm3669_vm6 = vcmp.eq.f32.partialorder %v3666_v41, %v3668_v48  ;;  %v3674_v37 = vcvt.f32.s32 %v3668_v48  ;;  %v10729_v41 = vld [vmem:[#allocation41_spill] sm:$0xff]  ;;  %v10731_v48 = vld [vmem:[#allocation44_spill] sm:$0xff] }
0x1895   :  { %v3670_v14 = vsel %vm3669_vm6, %v3665_v7, inf  ;;  %v10732_v7 = vld [vmem:[#allocation46_spill] sm:$0xff] }
0x1896   :  { %3671 = vmin.xlane.f32.xlu0 %v3670_v14  ;;  %v3675_v6 = vshll.u32 %v3674_v37, 16  ;;  %v10733_v14 = vld [vmem:[#allocation47_spill] sm:$0xff]  ;;  %v10734_v37 = vld [vmem:[#allocation48_spill] sm:$0xff] }
0x191f   :  { %v3672_v49 = vpop.xlane.xlu0 %3671 }
0x1920   :  { %v3673_v8 = vcvt.f32.s32 %v3672_v49  ;;  %v10735_v49 = vld [vmem:[#allocation49_spill] sm:$0xff] }
0x1922   :  { %v3676_v22 = vadd.s32 %v3675_v6, %v3673_v8  ;;  %v10736_v6 = vld [vmem:[#allocation50_spill] sm:$0xff]  ;;  %v10737_v8 = vld [vmem:[#allocation51_spill] sm:$0xff] }
0x1924   :  { %vm3677_vm7 = vcmp.eq.s32.totalorder %v7295_v40, %v3676_v22  ;;  %v10738_v22 = vld [vmem:[#allocation52_spill] sm:$0xff] }
0x1925   :  { %5265 = vmatmul.mubr.msk.f32.vlgmr.msra.gmra.mxu1 %vm3677_vm7, %v10432_v55  ;;  %6557 = vmatmul.mubr.msk.f32.vlgmr.msra.gmra.mxu0 %vm3677_vm7, %v10432_v55 }
0x1926   :  { %3921 = vmatpush1.msra.mxu1 %v9165_v5  ;;  %6560 = vmatpush3.msra.mxu0 %v9167_v51  ;;  %v10710_v5 = vld [vmem:[#allocation39_spill] sm:$0xff]  ;;  %v10711_v51 = vld [vmem:[#allocation24_spill] sm:$0xff] }
0x1927   :  { %3922 = vmatprep.subr.mxu1 %v10703_v35  ;;  %6561 = vmatprep.subr.mxu0 %v10458_v0 }
0x1928   :  { %3923 = vmatpush1.msra.mxu1 %v10704_v11  ;;  %6562 = vmatpush3.msra.mxu0 %v10705_v61 }
0x1929   :  { %3924 = vmatprep.subr.mxu1 %v10706_v54  ;;  %6563 = vmatprep.subr.mxu0 %v10458_v0 }
0x192a   :  { %3925 = vmatpush1.msra.mxu1 %v10707_v13  ;;  %6564 = vmatpush3.msra.mxu0 %v10708_v57 }
0x192b   :  { %3926 = vmatprep.subr.mxu1 %v10709_v36  ;;  %6565 = vmatprep.subr.mxu0 %v10458_v0 }
0x192c   :  { %3927 = vmatpush1.msra.mxu1 %v10710_v5  ;;  %6566 = vmatpush3.msra.mxu0 %v10711_v51 }
0x192d   :  { %3928 = vmatprep.subr.mxu1 %v10712_v26  ;;  %6567 = vmatprep.subr.mxu0 %v10458_v0 }
0x192e   :  { %3929 = vmatpush1.msra.mxu1 %v10713_v10  ;;  %6568 = vmatpush3.msra.mxu0 %v10714_v39 }
0x192f   :  { %3930 = vmatprep.subr.mxu1 %v10715_v53  ;;  %6569 = vmatprep.subr.mxu0 %v10458_v0 }
0x1930   :  { %3931 = vmatpush1.msra.mxu1 %v10716_v58  ;;  %6570 = vmatpush3.msra.mxu0 %v10717_v1 }
0x1931   :  { %3932 = vmatprep.subr.mxu1 %v10718_v25  ;;  %6571 = vmatprep.subr.mxu0 %v10458_v0 }
0x1932   :  { %3933 = vmatpush1.msra.mxu1 %v10719_v52  ;;  %6572 = vmatpush3.msra.mxu0 %v10720_v3  ;;  %v9604_v52 = vld [vmem:[#allocation2 + $0x170] sm:$0xff]  ;;  %v9606_v3 = vld [vmem:[#allocation2 + $0x168] sm:$0xff] }
0x1933   :  { %3934 = vmatprep.subr.mxu1 %v10721_v2  ;;  %6573 = vmatprep.subr.mxu0 %v10458_v0  ;;  %v9608_v2 = vld [vmem:[#allocation2 + $0x178] sm:$0xff] }
0x1934   :  { %3935 = vmatpush1.msra.mxu1 %v10722_v12  ;;  %6574 = vmatpush3.msra.mxu0 %v10723_v23  ;;  %v9614_v12 = vld [vmem:[#allocation2 + $0x150] sm:$0xff]  ;;  %v9616_v23 = vld [vmem:[#allocation2 + $0x160] sm:$0xff] }
0x1935   :  { %3936 = vmatprep.subr.mxu1 %v10724_v4  ;;  %6575 = vmatprep.subr.mxu0 %v10458_v0  ;;  %v9620_v4 = vld [vmem:[#allocation2 + $0x140] sm:$0xff] }
0x1936   :  { %3937 = vmatpush1.msra.mxu1 %v10725_v19  ;;  %6576 = vmatpush3.msra.mxu0 %v10726_v9  ;;  %v9622_v19 = vld [vmem:[#allocation2 + $0x148] sm:$0xff]  ;;  %v9626_v9 = vld [vmem:[#allocation2 + $0x138] sm:$0xff] }
0x1937   :  { %3938 = vmatprep.subr.mxu1 %v10727_v46  ;;  %6577 = vmatprep.subr.mxu0 %v10458_v0  ;;  %v9630_v46 = vld [vmem:[#allocation2 + $0x128] sm:$0xff] }
0x1938   :  { %3939 = vmatpush1.msra.mxu1 %v10728_v17  ;;  %6578 = vmatpush3.msra.mxu0 %v10729_v41  ;;  %v9632_v17 = vld [vmem:[#allocation2 + $0x130] sm:$0xff]  ;;  %v9636_v41 = vld [vmem:[#allocation2 + $0x120] sm:$0xff] }
0x1939   :  { %3940 = vmatprep.subr.mxu1 %v10730_v60  ;;  %6579 = vmatprep.subr.mxu0 %v10458_v0  ;;  %v9640_v60 = vld [vmem:[#allocation2 + $0x110] sm:$0xff] }
0x193a   :  { %3941 = vmatpush1.msra.mxu1 %v10731_v48  ;;  %6580 = vmatpush3.msra.mxu0 %v10732_v7  ;;  %v9642_v48 = vld [vmem:[#allocation2 + $0x118] sm:$0xff]  ;;  %v9646_v7 = vld [vmem:[#allocation2 + $0x108] sm:$0xff] }
0x193b   :  { %3942 = vmatprep.subr.mxu1 %v10733_v14  ;;  %6581 = vmatprep.subr.mxu0 %v10458_v0  ;;  %v9650_v14 = vld [vmem:[#allocation2 + $0xf8] sm:$0xff] }
0x193c   :  { %3943 = vmatpush1.msra.mxu1 %v10734_v37  ;;  %6582 = vmatpush3.msra.mxu0 %v10735_v49  ;;  %v9652_v37 = vld [vmem:[#allocation2 + $0x100] sm:$0xff]  ;;  %v9656_v49 = vld [vmem:[#allocation2 + $0xf0] sm:$0xff] }
0x193d   :  { %3944 = vmatprep.subr.mxu1 %v10736_v6  ;;  %6583 = vmatprep.subr.mxu0 %v10458_v0  ;;  %v9660_v6 = vld [vmem:[#allocation2 + $0xe0] sm:$0xff] }
0x193e   :  { %3945 = vmatpush1.msra.mxu1 %v9284_v21  ;;  %6584 = vmatpush3.msra.mxu0 %v10737_v8  ;;  %v9662_v8 = vld [vmem:[#allocation2 + $0xe8] sm:$0xff] }
0x193f   :  { %3946 = vmatprep.subr.mxu1 %v10738_v22  ;;  %6585 = vmatprep.subr.mxu0 %v10458_v0  ;;  %v9666_v22 = vld [vmem:[#allocation2 + $0xd8] sm:$0xff] }
0x1940   :  { %3947 = vmatpush1.msra.mxu1 %v9294_v20  ;;  %6586 = vmatpush3.msra.mxu0 %v9296_v62  ;;  %v10740_v20 = vld [vmem:[#allocation56_spill] sm:$0xff]  ;;  %v10741_v62 = vld [vmem:[#allocation57_spill] sm:$0xff] }
0x1941   :  { %3948 = vmatprep.subr.mxu1 %v9300_v30  ;;  %6587 = vmatprep.subr.mxu0 %v10458_v0  ;;  %v10742_v30 = vld [vmem:[#allocation58_spill] sm:$0xff] }
0x1942   :  { %3949 = vmatpush1.msra.mxu1 %v9304_v44  ;;  %6588 = vmatpush3.msra.mxu0 %v9306_v59 }
0x1943   :  { %3950 = vmatprep.subr.mxu1 %v9310_v18  ;;  %6589 = vmatprep.subr.mxu0 %v10458_v0 }
0x1944   :  { %3951 = vmatpush1.msra.mxu1 %v9314_v15  ;;  %3984 = vmatprep.mubr.f32.mxu1 %v10458_v0 }
0x1945   :  { %6590 = vmatpush3.msra.mxu0 %v9318_v56  ;;  %6591 = vmatprep.mubr.msk.f32.mxu0 %vm7113_vm0, %v10458_v0  ;;  %v10739_v56 = vld [vmem:[#allocation55_spill] sm:$0xff] }
0x1946   :  { %3985 = vmatmul.mubr.f32.vlgmr.msra.gmra.mxu1 %v9440_v32  ;;  %6592 = vmatmul.mubr.f32.vlgmr.msra.gmra.mxu0 %v9440_v32 }
0x1947   :  { %6594 = vmatprep.subr.mxu1 %v10458_v0  ;;  %6626 = vmatprep.mubr.msk.f32.mxu1 %vm7113_vm0, %v10458_v0 }
0x1948   :  { %6595 = vmatpush3.msra.mxu1 %v9366_v28  ;;  %4304 = vmatprep.mubr.f32.mxu0 %v10458_v0 }
0x1949   :  { %6596 = vmatprep.subr.mxu1 %v10458_v0  ;;  %4240 = vmatprep.subr.mxu0 %v9604_v52 }
0x194a   :  { %6597 = vmatpush3.msra.mxu1 %v9370_v50  ;;  %v10743_v50 = vld [vmem:[#allocation59_spill] sm:$0xff]  ;;  %4241 = vmatpush1.msra.mxu0 %v9606_v3 }
0x194b   :  { %6598 = vmatprep.subr.mxu1 %v10458_v0 }
0x194c   :  { %6599 = vmatpush3.msra.mxu1 %v9374_v47 }
0x194d   :  { %6600 = vmatprep.subr.mxu1 %v10458_v0 }
0x194e   :  { %6601 = vmatpush3.msra.mxu1 %v9378_v42 }
0x194f   :  { %6602 = vmatprep.subr.mxu1 %v10458_v0 }
0x1950   :  { %6603 = vmatpush3.msra.mxu1 %v9382_v34 }
0x1951   :  { %6604 = vmatprep.subr.mxu1 %v10458_v0 }
0x1952   :  { %6605 = vmatpush3.msra.mxu1 %v9386_v38 }
0x1953   :  { %6606 = vmatprep.subr.mxu1 %v10458_v0 }
0x1954   :  { %6607 = vmatpush3.msra.mxu1 %v9390_v33 }
0x1955   :  { %6608 = vmatprep.subr.mxu1 %v10458_v0 }
0x1956   :  { %6609 = vmatpush3.msra.mxu1 %v9394_v43 }
0x1957   :  { %6610 = vmatprep.subr.mxu1 %v10458_v0 }
0x1958   :  { %6611 = vmatpush3.msra.mxu1 %v9396_v16 }
0x1959   :  { %6612 = vmatprep.subr.mxu1 %v10458_v0 }
0x195a   :  { %6613 = vmatpush3.msra.mxu1 %v9400_v27 }
0x195b   :  { %6614 = vmatprep.subr.mxu1 %v10458_v0 }
0x195c   :  { %6615 = vmatpush3.msra.mxu1 %v9404_v24 }
0x195d   :  { %6616 = vmatprep.subr.mxu1 %v10458_v0 }
0x195e   :  { %6617 = vmatpush3.msra.mxu1 %v9408_v63 }
0x195f   :  { %6618 = vmatprep.subr.mxu1 %v10458_v0 }
0x1960   :  { %6619 = vmatpush3.msra.mxu1 %v10739_v56  ;;  %v9670_v56 = vld [vmem:[#allocation2 + $0xc8] sm:$0xff] }
0x1961   :  { %6620 = vmatprep.subr.mxu1 %v10458_v0 }
0x1962   :  { %6621 = vmatpush3.msra.mxu1 %v10740_v20  ;;  %v9672_v20 = vld [vmem:[#allocation2 + $0xd0] sm:$0xff] }
0x1963   :  { %6622 = vmatprep.subr.mxu1 %v10458_v0 }
0x1964   :  { %6623 = vmatpush3.msra.mxu1 %v10741_v62  ;;  %v9676_v62 = vld [vmem:[#allocation2 + $0xc0] sm:$0xff] }
0x1965   :  { %6624 = vmatprep.subr.mxu1 %v10458_v0 }
0x1966   :  { %6625 = vmatpush3.msra.mxu1 %v10742_v30  ;;  %v9680_v30 = vld [vmem:[#allocation2 + $0xb0] sm:$0xff] }
0x1967   :  { %6629 = vmatprep.subr.mxu1 %v10458_v0 }
0x19e5   :  { %v3865_v44 = vpop.f32.mrf.mxu0  ;;  %v3794_v18 = vpop.f32.mrf.mxu1 }
0x19e7   :  { %v6558_v59 = vpop.f32.mrf.mxu0  ;;  %v3796_v15 = vpop.f32.mrf.mxu1 }
0x19e8   :  { %v9686_v59 = vld [vmem:[#allocation2 + $0xa8] sm:$0xff] }
0x1a06   :  { %v3986_v21 = vpop.f32.mrf.mxu1  ;;  %v4057_v28 = vpop.f32.mrf.mxu0 }
0x1a07   :  { %v3987_v47 = vadd.f32 %v3986_v21, %v10743_v50  ;;  %v4058_v61 = vadd.f32 %v4057_v28, %v9436_v45  ;;  %v9696_v21 = vld [vmem:[#allocation2 + $0x90] sm:$0xff]  ;;  %v9700_v28 = vld [vmem:[#allocation2 + $0x80] sm:$0xff]  ;;  %v9702_v50 = vld [vmem:[#allocation2 + $0x88] sm:$0xff] }
0x1a08   :  { %v3988_v42 = vpop.f32.mrf.mxu1  ;;  %v6593_v34 = vpop.f32.mrf.mxu0 }
0x1a09   :  { %v4061_v38 = vadd.f32 %v3987_v47, %v3794_v18  ;;  %v3989_v43 = vadd.f32 %v3988_v42, %v9433_v31  ;;  %v9690_v18 = vld [vmem:[#allocation2 + $0x98] sm:$0xff]  ;;  %v9710_v42 = vld [vmem:[#allocation2 + $0x68] sm:$0xff]  ;;  %v9712_v34 = vld [vmem:[#allocation2 + $0x70] sm:$0xff] }
0x1a0a   :  { %v9706_v47 = vld [vmem:[#allocation2 + $0x78] sm:$0xff] }
0x1a0b   :  { %v5267_v33 = vmul.f32 -1.442695, %v4061_v38  ;;  %v4068_v16 = vadd.f32 %v3989_v43, %v3796_v15  ;;  %v9692_v15 = vld [vmem:[#allocation2 + $0xa0] sm:$0xff]  ;;  %v9722_v43 = vld [vmem:[#allocation2 + $0x58] sm:$0xff] }
0x1a0c   :  { %v9716_v38 = vld [vmem:[#allocation2 + $0x60] sm:$0xff] }
0x1a0d   :  { %6923 = vpow2.f32 %v5267_v33  ;;  %v5268_v27 = vmul.f32 -1.442695, %v4068_v16  ;;  %v9720_v33 = vld [vmem:[#allocation2 + $0x50] sm:$0xff]  ;;  %v9726_v16 = vld [vmem:[#allocation2 + $0x48] sm:$0xff] }
0x1a0f   :  { %6925 = vpow2.f32 %v5268_v27  ;;  %v9730_v27 = vld [vmem:[#allocation2 + $0x38] sm:$0xff] }
0x1a1a   :  { %v6924_v24 = vpop.eup %6923 }
0x1a1b   :  { %v4065_v63 = vadd.f32 1.0, %v6924_v24  ;;  %v9732_v24 = vld [vmem:[#allocation2 + $0x40] sm:$0xff] }
0x1a1c   :  { %v6926_v35 = vpop.eup %6925 }
0x1a1d   :  { %6927 = vrcp.f32 %v4065_v63  ;;  %v4072_v11 = vadd.f32 1.0, %v6926_v35  ;;  %v9736_v63 = vld [vmem:[#allocation2 + $0x30] sm:$0xff] }
0x1a1f   :  { %6929 = vrcp.f32 %v4072_v11 }
0x1a2a   :  { %v6928_v54 = vpop.eup %6927 }
0x1a2b   :  { %v4075_v13 = vmul.f32 %v6928_v54, %v4058_v61 }
0x1a2c   :  { %v6930_v36 = vpop.eup %6929 }
0x1a2d   :  { %v4076_v57 = vadd.f32 %v4075_v13, %v3865_v44  ;;  %v4078_v5 = vsub.f32 1.0, %v6930_v36  ;;  %v4080_v26 = vmul.f32 %v6930_v36, %v9440_v32  ;;  %v9682_v44 = vld [vmem:[#allocation2 + $0xb8] sm:$0xff]  ;;  %v9746_v13 = vld [vmem:[#allocation2 + $0x20] sm:$0xff]  ;;  %v9751_v36 = vld [vmem:[#allocation2 + $0x28] sm:$0xff] }
0x1a2f   :  { %6931 = vtanh.f32 %v4076_v57  ;;  %v9749_v57 = vld [vmem:[#allocation2 + $0x18] sm:$0xff] }
0x1a3c   :  { %v6932_v51 = vpop.eup %6931 }
0x1a3d   :  { %v4079_v31 = vmul.f32 %v6932_v51, %v4078_v5  ;;  %v9755_v5 = vld [vmem:[#allocation2 + $0x8] sm:$0xff]  ;;  %v9759_v51 = vld [vmem:[#allocation2] sm:$0xff] }
0x1a3f   :  { %v9591_v10 = vadd.f32 %v4080_v26, %v4079_v31  ;;  %v9761_v31 = vld [vmem:[#allocation2 + $0x10] sm:$0xff] }
0x1a40   :  { %v9765_v26 = vld [vmem:[#allocation5 + $0x170] sm:$0xff] }
0x1a41   :  { %6627 = vmatmul.mubr.f32.vlgmr.msra.gmra.mxu1 %v9591_v10 }
0x1a42   :  { %6661 = vmatprep.mubr.msk.f32.mxu1 %vm7113_vm0, %v10458_v0  ;;  %6630 = vmatpush3.msra.mxu1 %v9608_v2 }
0x1a43   :  { %6631 = vmatprep.subr.mxu1 %v10458_v0 }
0x1a44   :  { %6632 = vmatpush3.msra.mxu1 %v9616_v23 }
0x1a45   :  { %6633 = vmatprep.subr.mxu1 %v10458_v0 }
0x1a46   :  { %6634 = vmatpush3.msra.mxu1 %v9622_v19 }
0x1a47   :  { %6635 = vmatprep.subr.mxu1 %v10458_v0 }
0x1a48   :  { %6636 = vmatpush3.msra.mxu1 %v9632_v17 }
0x1a49   :  { %6637 = vmatprep.subr.mxu1 %v10458_v0 }
0x1a4a   :  { %6638 = vmatpush3.msra.mxu1 %v9642_v48 }
0x1a4b   :  { %6639 = vmatprep.subr.mxu1 %v10458_v0 }
0x1a4c   :  { %6640 = vmatpush3.msra.mxu1 %v9652_v37 }
0x1a4d   :  { %6641 = vmatprep.subr.mxu1 %v10458_v0 }
0x1a4e   :  { %6642 = vmatpush3.msra.mxu1 %v9662_v8 }
0x1a4f   :  { %6643 = vmatprep.subr.mxu1 %v10458_v0 }
0x1a50   :  { %6644 = vmatpush3.msra.mxu1 %v9672_v20 }
0x1a51   :  { %6645 = vmatprep.subr.mxu1 %v10458_v0 }
0x1a52   :  { %6646 = vmatpush3.msra.mxu1 %v9682_v44 }
0x1a53   :  { %6647 = vmatprep.subr.mxu1 %v10458_v0 }
0x1a54   :  { %6648 = vmatpush3.msra.mxu1 %v9692_v15 }
0x1a55   :  { %6649 = vmatprep.subr.mxu1 %v10458_v0 }
0x1a56   :  { %6650 = vmatpush3.msra.mxu1 %v9702_v50 }
0x1a57   :  { %6651 = vmatprep.subr.mxu1 %v10458_v0 }
0x1a58   :  { %6652 = vmatpush3.msra.mxu1 %v9712_v34 }
0x1a59   :  { %6653 = vmatprep.subr.mxu1 %v10458_v0 }
0x1a5a   :  { %6654 = vmatpush3.msra.mxu1 %v9722_v43 }
0x1a5b   :  { %6655 = vmatprep.subr.mxu1 %v10458_v0 }
0x1a5c   :  { %6656 = vmatpush3.msra.mxu1 %v9732_v24 }
0x1a5d   :  { %6657 = vmatprep.subr.mxu1 %v10458_v0 }
0x1a5e   :  { %6658 = vmatpush3.msra.mxu1 %v9751_v36 }
0x1a5f   :  { %6659 = vmatprep.subr.mxu1 %v10458_v0 }
0x1a60   :  { %6660 = vmatpush3.msra.mxu1 %v9761_v31 }
0x1a61   :  { %6664 = vmatprep.subr.mxu1 %v10458_v0 }
0x1b01   :  { %v4165_v39 = vpop.f32.mrf.mxu1 }
0x1b02   :  { %v4166_v45 = vadd.f32 %v4165_v39, %v9477_v29  ;;  %v9612_v29 = vld [vmem:[#allocation2 + $0x158] sm:$0xff] }
0x1b03   :  { %v6628_v53 = vpop.f32.mrf.mxu1  ;;  %4242 = vmatprep.subr.mxu0 %v9612_v29 }
0x1b04   :  { %4170 = vst [vmem:[#allocation11 + $0x38] sm:$0xff] %v4166_v45  ;;  %4171 = vmax.xlane.f32.xlu1 %v4166_v45  ;;  %4243 = vmatpush1.msra.mxu0 %v9614_v12 }
0x1b05   :  { %4244 = vmatprep.subr.mxu0 %v9620_v4 }
0x1b06   :  { %4245 = vmatpush1.msra.mxu0 %v9626_v9 }
0x1b07   :  { %4246 = vmatprep.subr.mxu0 %v9630_v46 }
0x1b08   :  { %4247 = vmatpush1.msra.mxu0 %v9636_v41 }
0x1b09   :  { %4248 = vmatprep.subr.mxu0 %v9640_v60 }
0x1b0a   :  { %4249 = vmatpush1.msra.mxu0 %v9646_v7 }
0x1b0b   :  { %4250 = vmatprep.subr.mxu0 %v9650_v14 }
0x1b0c   :  { %4251 = vmatpush1.msra.mxu0 %v9656_v49 }
0x1b0d   :  { %4252 = vmatprep.subr.mxu0 %v9660_v6 }
0x1b0e   :  { %4253 = vmatpush1.msra.mxu0 %v9666_v22 }
0x1b0f   :  { %4254 = vmatprep.subr.mxu0 %v9670_v56 }
0x1b10   :  { %4255 = vmatpush1.msra.mxu0 %v9676_v62 }
0x1b11   :  { %4256 = vmatprep.subr.mxu0 %v9680_v30 }
0x1b12   :  { %4257 = vmatpush1.msra.mxu0 %v9686_v59 }
0x1b13   :  { %4258 = vmatprep.subr.mxu0 %v9690_v18 }
0x1b14   :  { %4259 = vmatpush1.msra.mxu0 %v9696_v21 }
0x1b15   :  { %4260 = vmatprep.subr.mxu0 %v9700_v28 }
0x1b16   :  { %4261 = vmatpush1.msra.mxu0 %v9706_v47 }
0x1b17   :  { %4262 = vmatprep.subr.mxu0 %v9710_v42 }
0x1b18   :  { %4263 = vmatpush1.msra.mxu0 %v9716_v38 }
0x1b19   :  { %4264 = vmatprep.subr.mxu0 %v9720_v33 }
0x1b1a   :  { %4265 = vmatpush1.msra.mxu0 %v9726_v16 }
0x1b1b   :  { %4266 = vmatprep.subr.mxu0 %v9730_v27 }
0x1b1c   :  { %4267 = vmatpush1.msra.mxu0 %v9736_v63 }
0x1b1d   :  { %4268 = vmatprep.subr.mxu0 %v9746_v13 }
0x1b1e   :  { %4269 = vmatpush1.msra.mxu0 %v9749_v57 }
0x1b1f   :  { %4270 = vmatprep.subr.mxu0 %v9755_v5 }
0x1b20   :  { %4271 = vmatpush1.msra.mxu0 %v9759_v51 }
0x1b21   :  { %4432 = vmatprep.subr.mxu0 %v9765_v26 }
0x1b8d   :  { %v4172_v58 = vpop.xlane.xlu1 %4171 }
0x1b8e   :  { %vm4173_vm8 = vcmp.eq.f32.partialorder %v4166_v45, %v4172_v58 }
0x1b8f   :  { %v9598_v1 = vsel %vm4173_vm8, %v7295_v40, 128 }
0x1b90   :  { %v4176_v32 = vshra.s32 %v9598_v1, 16  ;;  %v4175_v35 = vand.u32 65535, %v9598_v1 }
0x1b92   :  { %v9601_v25 = vcvt.s32.f32 %v4176_v32  ;;  %v4177_v61 = vcvt.s32.f32 %v4175_v35  ;;  %v9769_v32 = vld [vmem:[#allocation5 + $0x168] sm:$0xff]  ;;  %v9774_v35 = vld [vmem:[#allocation5 + $0x158] sm:$0xff] }
0x1b93   :  { %10744 = vst [vmem:[#allocation19_spill] sm:$0xff] %v9774_v35 }
0x1b94   :  { %4179 = vmin.xlane.f32.xlu0 %v9601_v25 }
0x1c1d   :  { %v4180_v11 = vpop.xlane.xlu0 %4179 }
0x1c1e   :  { %vm4181_vm9 = vcmp.eq.f32.partialorder %v9601_v25, %v4180_v11  ;;  %v4186_v39 = vcvt.f32.s32 %v4180_v11  ;;  %v9771_v25 = vld [vmem:[#allocation5 + $0x178] sm:$0xff]  ;;  %v9784_v11 = vld [vmem:[#allocation5 + $0x140] sm:$0xff] }
0x1c1f   :  { %v4182_v54 = vsel %vm4181_vm9, %v4177_v61, inf  ;;  %v9778_v61 = vld [vmem:[#allocation5 + $0x150] sm:$0xff]  ;;  %10747 = vst [vmem:[#allocation21_spill] sm:$0xff] %v9784_v11 }
0x1c20   :  { %4183 = vmin.xlane.f32.xlu1 %v4182_v54  ;;  %v4187_v53 = vshll.u32 %v4186_v39, 16  ;;  %10745 = vst [vmem:[#allocation33_spill] sm:$0xff] %v9778_v61  ;;  %v9780_v54 = vld [vmem:[#allocation5 + $0x160] sm:$0xff]  ;;  %v9788_v39 = vld [vmem:[#allocation5 + $0x138] sm:$0xff] }
0x1c21   :  { %10746 = vst [vmem:[#allocation20_spill] sm:$0xff] %v9780_v54  ;;  %10748 = vst [vmem:[#allocation36_spill] sm:$0xff] %v9788_v39 }
0x1ca9   :  { %v4184_v45 = vpop.xlane.xlu1 %4183 }
0x1caa   :  { %v4185_v58 = vcvt.f32.s32 %v4184_v45  ;;  %v9790_v45 = vld [vmem:[#allocation5 + $0x148] sm:$0xff] }
0x1cab   :  { %10749 = vst [vmem:[#allocation22_spill] sm:$0xff] %v9790_v45 }
0x1cac   :  { %v4188_v1 = vadd.s32 %v4187_v53, %v4185_v58  ;;  %v9794_v53 = vld [vmem:[#allocation5 + $0x128] sm:$0xff]  ;;  %v9798_v58 = vld [vmem:[#allocation5 + $0x120] sm:$0xff] }
0x1cad   :  { %10750 = vst [vmem:[#allocation23_spill] sm:$0xff] %v9794_v53  ;;  %10751 = vst [vmem:[#allocation39_spill] sm:$0xff] %v9798_v58 }
0x1cae   :  { %vm4189_vm10 = vcmp.eq.s32.totalorder %v7295_v40, %v4188_v1  ;;  %v9800_v1 = vld [vmem:[#allocation5 + $0x130] sm:$0xff] }
0x1caf   :  { %5270 = vmatmul.mubr.msk.f32.vlgmr.msra.gmra.mxu0 %vm4189_vm10, %v10432_v55  ;;  %6662 = vmatmul.mubr.msk.f32.vlgmr.msra.gmra.mxu1 %vm4189_vm10, %v10432_v55  ;;  %10752 = vst [vmem:[#allocation24_spill] sm:$0xff] %v9800_v1 }
0x1cb0   :  { %4433 = vmatpush1.msra.mxu0 %v9769_v32  ;;  %6665 = vmatpush3.msra.mxu1 %v9771_v25 }
0x1cb1   :  { %4434 = vmatprep.subr.mxu0 %v9774_v35  ;;  %6666 = vmatprep.subr.mxu1 %v10458_v0  ;;  %v9804_v35 = vld [vmem:[#allocation5 + $0x110] sm:$0xff] }
0x1cb2   :  { %4435 = vmatpush1.msra.mxu0 %v9778_v61  ;;  %6667 = vmatpush3.msra.mxu1 %v9780_v54  ;;  %10753 = vst [vmem:[#allocation25_spill] sm:$0xff] %v9804_v35  ;;  %v9808_v54 = vld [vmem:[#allocation5 + $0x108] sm:$0xff]  ;;  %v9810_v61 = vld [vmem:[#allocation5 + $0x118] sm:$0xff] }
0x1cb3   :  { %4436 = vmatprep.subr.mxu0 %v9784_v11  ;;  %6668 = vmatprep.subr.mxu1 %v10458_v0  ;;  %10754 = vst [vmem:[#allocation42_spill] sm:$0xff] %v9808_v54  ;;  %10755 = vst [vmem:[#allocation26_spill] sm:$0xff] %v9810_v61  ;;  %v9814_v11 = vld [vmem:[#allocation5 + $0xf8] sm:$0xff] }
0x1cb4   :  { %4437 = vmatpush1.msra.mxu0 %v9788_v39  ;;  %6669 = vmatpush3.msra.mxu1 %v9790_v45  ;;  %10756 = vst [vmem:[#allocation27_spill] sm:$0xff] %v9814_v11  ;;  %v9818_v45 = vld [vmem:[#allocation5 + $0xf0] sm:$0xff]  ;;  %v9820_v39 = vld [vmem:[#allocation5 + $0x100] sm:$0xff] }
0x1cb5   :  { %4438 = vmatprep.subr.mxu0 %v9794_v53  ;;  %6670 = vmatprep.subr.mxu1 %v10458_v0  ;;  %10757 = vst [vmem:[#allocation45_spill] sm:$0xff] %v9818_v45  ;;  %10758 = vst [vmem:[#allocation28_spill] sm:$0xff] %v9820_v39  ;;  %v9824_v53 = vld [vmem:[#allocation5 + $0xe0] sm:$0xff] }
0x1cb6   :  { %4439 = vmatpush1.msra.mxu0 %v9798_v58  ;;  %6671 = vmatpush3.msra.mxu1 %v9800_v1  ;;  %10759 = vst [vmem:[#allocation29_spill] sm:$0xff] %v9824_v53  ;;  %v9828_v1 = vld [vmem:[#allocation5 + $0xd8] sm:$0xff]  ;;  %v9830_v58 = vld [vmem:[#allocation5 + $0xe8] sm:$0xff] }
0x1cb7   :  { %4440 = vmatprep.subr.mxu0 %v9804_v35  ;;  %6672 = vmatprep.subr.mxu1 %v10458_v0  ;;  %10760 = vst [vmem:[#allocation30_spill] sm:$0xff] %v9828_v1  ;;  %10761 = vst [vmem:[#allocation31_spill] sm:$0xff] %v9830_v58  ;;  %v9834_v35 = vld [vmem:[#allocation5 + $0xc8] sm:$0xff] }
0x1cb8   :  { %4441 = vmatpush1.msra.mxu0 %v9808_v54  ;;  %6673 = vmatpush3.msra.mxu1 %v9810_v61  ;;  %10762 = vst [vmem:[#allocation32_spill] sm:$0xff] %v9834_v35  ;;  %v9838_v61 = vld [vmem:[#allocation5 + $0xc0] sm:$0xff]  ;;  %v9840_v54 = vld [vmem:[#allocation5 + $0xd0] sm:$0xff] }
0x1cb9   :  { %4442 = vmatprep.subr.mxu0 %v9814_v11  ;;  %6674 = vmatprep.subr.mxu1 %v10458_v0  ;;  %10763 = vst [vmem:[#allocation34_spill] sm:$0xff] %v9838_v61  ;;  %10764 = vst [vmem:[#allocation35_spill] sm:$0xff] %v9840_v54  ;;  %v9844_v11 = vld [vmem:[#allocation5 + $0xb0] sm:$0xff] }
0x1cba   :  { %4443 = vmatpush1.msra.mxu0 %v9818_v45  ;;  %6675 = vmatpush3.msra.mxu1 %v9820_v39  ;;  %10765 = vst [vmem:[#allocation37_spill] sm:$0xff] %v9844_v11  ;;  %v9848_v39 = vld [vmem:[#allocation5 + $0xa8] sm:$0xff]  ;;  %v9850_v45 = vld [vmem:[#allocation5 + $0xb8] sm:$0xff] }
0x1cbb   :  { %4444 = vmatprep.subr.mxu0 %v9824_v53  ;;  %6676 = vmatprep.subr.mxu1 %v10458_v0  ;;  %10766 = vst [vmem:[#allocation53_spill] sm:$0xff] %v9848_v39  ;;  %10767 = vst [vmem:[#allocation38_spill] sm:$0xff] %v9850_v45  ;;  %v9854_v53 = vld [vmem:[#allocation5 + $0x98] sm:$0xff] }
0x1cbc   :  { %4445 = vmatpush1.msra.mxu0 %v9828_v1  ;;  %6677 = vmatpush3.msra.mxu1 %v9830_v58  ;;  %10768 = vst [vmem:[#allocation40_spill] sm:$0xff] %v9854_v53  ;;  %v9858_v58 = vld [vmem:[#allocation5 + $0x90] sm:$0xff]  ;;  %v9860_v1 = vld [vmem:[#allocation5 + $0xa0] sm:$0xff] }
0x1cbd   :  { %4446 = vmatprep.subr.mxu0 %v9834_v35  ;;  %6678 = vmatprep.subr.mxu1 %v10458_v0  ;;  %10769 = vst [vmem:[#allocation54_spill] sm:$0xff] %v9858_v58  ;;  %10770 = vst [vmem:[#allocation41_spill] sm:$0xff] %v9860_v1  ;;  %v9864_v35 = vld [vmem:[#allocation5 + $0x80] sm:$0xff] }
0x1cbe   :  { %4447 = vmatpush1.msra.mxu0 %v9838_v61  ;;  %6679 = vmatpush3.msra.mxu1 %v9840_v54  ;;  %10771 = vst [vmem:[#allocation43_spill] sm:$0xff] %v9864_v35  ;;  %v9868_v54 = vld [vmem:[#allocation5 + $0x78] sm:$0xff]  ;;  %v9870_v61 = vld [vmem:[#allocation5 + $0x88] sm:$0xff] }
0x1cbf   :  { %4448 = vmatprep.subr.mxu0 %v9844_v11  ;;  %6680 = vmatprep.subr.mxu1 %v10458_v0  ;;  %10772 = vst [vmem:[#allocation44_spill] sm:$0xff] %v9868_v54  ;;  %10773 = vst [vmem:[#allocation46_spill] sm:$0xff] %v9870_v61  ;;  %v9874_v11 = vld [vmem:[#allocation5 + $0x68] sm:$0xff] }
0x1cc0   :  { %4449 = vmatpush1.msra.mxu0 %v9848_v39  ;;  %6681 = vmatpush3.msra.mxu1 %v9850_v45  ;;  %10774 = vst [vmem:[#allocation47_spill] sm:$0xff] %v9874_v11  ;;  %v9878_v45 = vld [vmem:[#allocation5 + $0x60] sm:$0xff]  ;;  %v9880_v39 = vld [vmem:[#allocation5 + $0x70] sm:$0xff] }
0x1cc1   :  { %4450 = vmatprep.subr.mxu0 %v9854_v53  ;;  %6682 = vmatprep.subr.mxu1 %v10458_v0  ;;  %10775 = vst [vmem:[#allocation48_spill] sm:$0xff] %v9878_v45  ;;  %10776 = vst [vmem:[#allocation49_spill] sm:$0xff] %v9880_v39  ;;  %v9884_v53 = vld [vmem:[#allocation5 + $0x50] sm:$0xff] }
0x1cc2   :  { %4451 = vmatpush1.msra.mxu0 %v9858_v58  ;;  %6683 = vmatpush3.msra.mxu1 %v9860_v1  ;;  %10777 = vst [vmem:[#allocation50_spill] sm:$0xff] %v9884_v53  ;;  %v9888_v1 = vld [vmem:[#allocation5 + $0x48] sm:$0xff]  ;;  %v9890_v58 = vld [vmem:[#allocation5 + $0x58] sm:$0xff] }
0x1cc3   :  { %4452 = vmatprep.subr.mxu0 %v9864_v35  ;;  %6684 = vmatprep.subr.mxu1 %v10458_v0  ;;  %10778 = vst [vmem:[#allocation51_spill] sm:$0xff] %v9890_v58  ;;  %v9894_v35 = vld [vmem:[#allocation5 + $0x38] sm:$0xff] }
0x1cc4   :  { %4453 = vmatpush1.msra.mxu0 %v9868_v54  ;;  %6685 = vmatpush3.msra.mxu1 %v9870_v61  ;;  %10779 = vst [vmem:[#allocation52_spill] sm:$0xff] %v9894_v35  ;;  %v9898_v61 = vld [vmem:[#allocation5 + $0x30] sm:$0xff]  ;;  %v9900_v54 = vld [vmem:[#allocation5 + $0x40] sm:$0xff] }
0x1cc5   :  { %4454 = vmatprep.subr.mxu0 %v9874_v11  ;;  %6686 = vmatprep.subr.mxu1 %v10458_v0  ;;  %v9904_v11 = vld [vmem:[#allocation5 + $0x20] sm:$0xff] }
0x1cc6   :  { %4455 = vmatpush1.msra.mxu0 %v9878_v45  ;;  %6687 = vmatpush3.msra.mxu1 %v9880_v39  ;;  %v9908_v39 = vld [vmem:[#allocation5 + $0x18] sm:$0xff]  ;;  %v9910_v45 = vld [vmem:[#allocation5 + $0x28] sm:$0xff] }
0x1cc7   :  { %4456 = vmatprep.subr.mxu0 %v9884_v53  ;;  %6688 = vmatprep.subr.mxu1 %v10458_v0  ;;  %v9914_v53 = vld [vmem:[#allocation5 + $0x8] sm:$0xff] }
0x1cc8   :  { %4457 = vmatpush1.msra.mxu0 %v9888_v1  ;;  %6689 = vmatpush3.msra.mxu1 %v9890_v58  ;;  %v9918_v58 = vld [vmem:[#allocation5] sm:$0xff] }
0x1cc9   :  { %4458 = vmatprep.subr.mxu0 %v9894_v35  ;;  %6690 = vmatprep.subr.mxu1 %v10458_v0  ;;  %v9922_v35 = vld [vmem:[#allocation5 + $0x10] sm:$0xff] }
0x1cca   :  { %4459 = vmatpush1.msra.mxu0 %v9898_v61  ;;  %6691 = vmatpush3.msra.mxu1 %v9900_v54 }
0x1ccb   :  { %4460 = vmatprep.subr.mxu0 %v9904_v11  ;;  %6692 = vmatprep.subr.mxu1 %v10458_v0 }
0x1ccc   :  { %4461 = vmatpush1.msra.mxu0 %v9908_v39  ;;  %6693 = vmatpush3.msra.mxu1 %v9910_v45 }
0x1ccd   :  { %4462 = vmatprep.subr.mxu0 %v9914_v53  ;;  %6694 = vmatprep.subr.mxu1 %v10458_v0 }
0x1cce   :  { %4463 = vmatpush1.msra.mxu0 %v9918_v58  ;;  %4496 = vmatprep.mubr.f32.mxu0 %v10458_v0 }
0x1ccf   :  { %6695 = vmatpush3.msra.mxu1 %v9922_v35  ;;  %6696 = vmatprep.mubr.msk.f32.mxu1 %vm7113_vm0, %v10458_v0 }
0x1cd0   :  { %4497 = vmatmul.mubr.f32.vlgmr.msra.gmra.mxu0 %v9591_v10  ;;  %6697 = vmatmul.mubr.f32.vlgmr.msra.gmra.mxu1 %v9591_v10 }
0x1cd1   :  { %6699 = vmatprep.subr.mxu0 %v10458_v0  ;;  %6731 = vmatprep.mubr.msk.f32.mxu0 %vm7113_vm0, %v10458_v0 }
0x1cd2   :  { %4752 = vmatprep.subr.mxu1 %v9604_v52  ;;  %4816 = vmatprep.mubr.f32.mxu1 %v10458_v0  ;;  %v9970_v52 = vld [vmem:[#allocation8 + $0x78] sm:$0xff] }
0x1cd3   :  { %4753 = vmatpush1.msra.mxu1 %v9606_v3  ;;  %6700 = vmatpush3.msra.mxu0 %v9970_v52  ;;  %v9974_v3 = vld [vmem:[#allocation8 + $0x70] sm:$0xff] }
0x1cd4   :  { %4754 = vmatprep.subr.mxu1 %v9612_v29  ;;  %6701 = vmatprep.subr.mxu0 %v10458_v0  ;;  %v9978_v29 = vld [vmem:[#allocation8 + $0x68] sm:$0xff] }
0x1cd5   :  { %4755 = vmatpush1.msra.mxu1 %v9614_v12  ;;  %6702 = vmatpush3.msra.mxu0 %v9974_v3  ;;  %v9982_v12 = vld [vmem:[#allocation8 + $0x60] sm:$0xff] }
0x1cd6   :  { %4756 = vmatprep.subr.mxu1 %v9620_v4  ;;  %6703 = vmatprep.subr.mxu0 %v10458_v0  ;;  %v9986_v4 = vld [vmem:[#allocation8 + $0x58] sm:$0xff] }
0x1cd7   :  { %4757 = vmatpush1.msra.mxu1 %v9626_v9  ;;  %6704 = vmatpush3.msra.mxu0 %v9978_v29  ;;  %v9990_v9 = vld [vmem:[#allocation8 + $0x50] sm:$0xff] }
0x1cd8   :  { %4758 = vmatprep.subr.mxu1 %v9630_v46  ;;  %6705 = vmatprep.subr.mxu0 %v10458_v0  ;;  %v9994_v46 = vld [vmem:[#allocation8 + $0x48] sm:$0xff] }
0x1cd9   :  { %4759 = vmatpush1.msra.mxu1 %v9636_v41  ;;  %6706 = vmatpush3.msra.mxu0 %v9982_v12  ;;  %v9998_v41 = vld [vmem:[#allocation8 + $0x40] sm:$0xff] }
0x1cda   :  { %4760 = vmatprep.subr.mxu1 %v9640_v60  ;;  %6707 = vmatprep.subr.mxu0 %v10458_v0  ;;  %v10000_v60 = vld [vmem:[#allocation8 + $0x38] sm:$0xff] }
0x1cdb   :  { %4761 = vmatpush1.msra.mxu1 %v9646_v7  ;;  %6708 = vmatpush3.msra.mxu0 %v9986_v4  ;;  %v10004_v7 = vld [vmem:[#allocation8 + $0x30] sm:$0xff] }
0x1cdc   :  { %4762 = vmatprep.subr.mxu1 %v9650_v14  ;;  %6709 = vmatprep.subr.mxu0 %v10458_v0  ;;  %v10008_v14 = vld [vmem:[#allocation8 + $0x28] sm:$0xff] }
0x1cdd   :  { %4763 = vmatpush1.msra.mxu1 %v9656_v49  ;;  %6710 = vmatpush3.msra.mxu0 %v9990_v9  ;;  %v10012_v49 = vld [vmem:[#allocation8 + $0x20] sm:$0xff] }
0x1cde   :  { %4764 = vmatprep.subr.mxu1 %v9660_v6  ;;  %6711 = vmatprep.subr.mxu0 %v10458_v0  ;;  %v10016_v6 = vld [vmem:[#allocation8 + $0x18] sm:$0xff] }
0x1cdf   :  { %4765 = vmatpush1.msra.mxu1 %v9666_v22  ;;  %6712 = vmatpush3.msra.mxu0 %v9994_v46  ;;  %10780 = vst [vmem:[#allocation55_spill] sm:$0xff] %v10016_v6  ;;  %v10020_v22 = vld [vmem:[#allocation8 + $0x10] sm:$0xff] }
0x1ce0   :  { %4766 = vmatprep.subr.mxu1 %v9670_v56  ;;  %6713 = vmatprep.subr.mxu0 %v10458_v0  ;;  %10781 = vst [vmem:[#allocation56_spill] sm:$0xff] %v10020_v22  ;;  %v10024_v56 = vld [vmem:[#allocation8 + $0x8] sm:$0xff] }
0x1ce1   :  { %4767 = vmatpush1.msra.mxu1 %v9676_v62  ;;  %6714 = vmatpush3.msra.mxu0 %v9998_v41  ;;  %10782 = vst [vmem:[#allocation57_spill] sm:$0xff] %v10024_v56  ;;  %v10028_v62 = vld [vmem:[#allocation8] sm:$0xff] }
0x1ce2   :  { %4768 = vmatprep.subr.mxu1 %v9680_v30  ;;  %6715 = vmatprep.subr.mxu0 %v10458_v0  ;;  %10783 = vst [vmem:[#allocation58_spill] sm:$0xff] %v10028_v62 }
0x1ce3   :  { %4769 = vmatpush1.msra.mxu1 %v9686_v59  ;;  %6716 = vmatpush3.msra.mxu0 %v10000_v60 }
0x1ce4   :  { %4770 = vmatprep.subr.mxu1 %v9690_v18  ;;  %6717 = vmatprep.subr.mxu0 %v10458_v0 }
0x1ce5   :  { %4771 = vmatpush1.msra.mxu1 %v9696_v21  ;;  %6718 = vmatpush3.msra.mxu0 %v10004_v7 }
0x1ce6   :  { %4772 = vmatprep.subr.mxu1 %v9700_v28  ;;  %6719 = vmatprep.subr.mxu0 %v10458_v0  ;;  %v10034_v28 = vld [vmem:[#allocation7] sm:$0xff] }
0x1ce7   :  { %4773 = vmatpush1.msra.mxu1 %v9706_v47  ;;  %6720 = vmatpush3.msra.mxu0 %v10008_v14  ;;  %10784 = vst [vmem:[#allocation59_spill] sm:$0xff] %v10034_v28 }
0x1ce8   :  { %4774 = vmatprep.subr.mxu1 %v9710_v42  ;;  %6721 = vmatprep.subr.mxu0 %v10458_v0 }
0x1ce9   :  { %4775 = vmatpush1.msra.mxu1 %v9716_v38  ;;  %6722 = vmatpush3.msra.mxu0 %v10012_v49 }
0x1cea   :  { %4776 = vmatprep.subr.mxu1 %v9720_v33  ;;  %6723 = vmatprep.subr.mxu0 %v10458_v0  ;;  %v10037_v33 = vld [vmem:[#allocation7 + $0x8] sm:$0xff] }
0x1ceb   :  { %4777 = vmatpush1.msra.mxu1 %v9726_v16  ;;  %6724 = vmatpush3.msra.mxu0 %v10016_v6 }
0x1cec   :  { %4778 = vmatprep.subr.mxu1 %v9730_v27  ;;  %6725 = vmatprep.subr.mxu0 %v10458_v0 }
0x1ced   :  { %4779 = vmatpush1.msra.mxu1 %v9736_v63  ;;  %6726 = vmatpush3.msra.mxu0 %v10020_v22 }
0x1cee   :  { %4780 = vmatprep.subr.mxu1 %v9746_v13  ;;  %6727 = vmatprep.subr.mxu0 %v10458_v0 }
0x1cef   :  { %4781 = vmatpush1.msra.mxu1 %v9749_v57  ;;  %6728 = vmatpush3.msra.mxu0 %v10024_v56  ;;  %v10040_v56 = vld [vmem:[#allocation7 + $0x10] sm:$0xff] }
0x1cf0   :  { %4782 = vmatprep.subr.mxu1 %v9755_v5  ;;  %6729 = vmatprep.subr.mxu0 %v10458_v0 }
0x1cf1   :  { %4783 = vmatpush1.msra.mxu1 %v9759_v51  ;;  %6730 = vmatpush3.msra.mxu0 %v10028_v62 }
0x1cf2   :  { %4944 = vmatprep.subr.mxu1 %v9765_v26  ;;  %6734 = vmatprep.subr.mxu0 %v10458_v0 }
0x1d6f   :  { %v4377_v30 = vpop.f32.mrf.mxu1  ;;  %v4306_v18 = vpop.f32.mrf.mxu0 }
0x1d71   :  { %v6663_v59 = vpop.f32.mrf.mxu1  ;;  %v4308_v21 = vpop.f32.mrf.mxu0 }
0x1d90   :  { %v4498_v47 = vpop.f32.mrf.mxu0  ;;  %v4569_v42 = vpop.f32.mrf.mxu1 }
0x1d91   :  { %v4499_v38 = vadd.f32 %v4498_v47, %v10034_v28  ;;  %v4570_v47 = vadd.f32 %v4569_v42, %v10040_v56  ;;  %v10794_v42 = vld [vmem:[#allocation25_spill] sm:$0xff] }
0x1d92   :  { %v4500_v16 = vpop.f32.mrf.mxu0  ;;  %v6698_v27 = vpop.f32.mrf.mxu1 }
0x1d93   :  { %v4573_v63 = vadd.f32 %v4499_v38, %v4306_v18  ;;  %v4501_v57 = vadd.f32 %v4500_v16, %v10037_v33 }
0x1d95   :  { %v5272_v13 = vmul.f32 -1.442695, %v4573_v63  ;;  %v4580_v5 = vadd.f32 %v4501_v57, %v4308_v21  ;;  %v10795_v57 = vld [vmem:[#allocation42_spill] sm:$0xff] }
0x1d97   :  { %6933 = vpow2.f32 %v5272_v13  ;;  %v5273_v51 = vmul.f32 -1.442695, %v4580_v5  ;;  %v10796_v5 = vld [vmem:[#allocation26_spill] sm:$0xff] }
0x1d99   :  { %6935 = vpow2.f32 %v5273_v51  ;;  %v10797_v51 = vld [vmem:[#allocation27_spill] sm:$0xff] }
0x1da4   :  { %v6934_v26 = vpop.eup %6933 }
0x1da5   :  { %v4577_v59 = vadd.f32 1.0, %v6934_v26  ;;  %v10798_v26 = vld [vmem:[#allocation45_spill] sm:$0xff] }
0x1da6   :  { %v6936_v62 = vpop.eup %6935 }
0x1da7   :  { %6937 = vrcp.f32 %v4577_v59  ;;  %v4584_v22 = vadd.f32 1.0, %v6936_v62  ;;  %v10787_v62 = vld [vmem:[#allocation20_spill] sm:$0xff] }
0x1da8   :  { %v10799_v59 = vld [vmem:[#allocation28_spill] sm:$0xff] }
0x1da9   :  { %6939 = vrcp.f32 %v4584_v22  ;;  %v10786_v22 = vld [vmem:[#allocation33_spill] sm:$0xff] }
0x1db4   :  { %v6938_v28 = vpop.eup %6937 }
0x1db5   :  { %v4587_v6 = vmul.f32 %v6938_v28, %v4570_v47  ;;  %v10790_v28 = vld [vmem:[#allocation22_spill] sm:$0xff]  ;;  %v10800_v47 = vld [vmem:[#allocation29_spill] sm:$0xff] }
0x1db6   :  { %v6940_v38 = vpop.eup %6939 }
0x1db7   :  { %v4588_v18 = vadd.f32 %v4587_v6, %v4377_v30  ;;  %v4590_v16 = vsub.f32 1.0, %v6940_v38  ;;  %v4592_v63 = vmul.f32 %v6940_v38, %v9591_v10  ;;  %v10081_v10 = vld [vmem:[#allocation10] sm:$0xff]  ;;  %v10788_v30 = vld [vmem:[#allocation21_spill] sm:$0xff] }
0x1db8   :  { %v10785_v6 = vld [vmem:[#allocation19_spill] sm:$0xff] }
0x1db9   :  { %6941 = vtanh.f32 %v4588_v18  ;;  %v10801_v18 = vld [vmem:[#allocation30_spill] sm:$0xff]  ;;  %v10802_v38 = vld [vmem:[#allocation31_spill] sm:$0xff] }
0x1dc6   :  { %v6942_v27 = vpop.eup %6941 }
0x1dc7   :  { %v4591_v21 = vmul.f32 %v6942_v27, %v4590_v16  ;;  %v10803_v16 = vld [vmem:[#allocation32_spill] sm:$0xff]  ;;  %v10804_v27 = vld [vmem:[#allocation34_spill] sm:$0xff] }
0x1dc9   :  { %v10044_v13 = vadd.f32 %v4592_v63, %v4591_v21  ;;  %v10805_v21 = vld [vmem:[#allocation35_spill] sm:$0xff]  ;;  %v10806_v63 = vld [vmem:[#allocation37_spill] sm:$0xff] }
0x1dcb   :  { %6732 = vmatmul.mubr.f32.vlgmr.msra.gmra.mxu0 %v10044_v13 }
0x1dcc   :  { %6735 = vmatpush3.msra.mxu0 %v9608_v2  ;;  %6766 = vmatprep.mubr.msk.f32.mxu0 %vm7113_vm0, %v10458_v0 }
0x1dcd   :  { %6736 = vmatprep.subr.mxu0 %v10458_v0 }
0x1dce   :  { %6737 = vmatpush3.msra.mxu0 %v9616_v23 }
0x1dcf   :  { %6738 = vmatprep.subr.mxu0 %v10458_v0 }
0x1dd0   :  { %6739 = vmatpush3.msra.mxu0 %v9622_v19 }
0x1dd1   :  { %6740 = vmatprep.subr.mxu0 %v10458_v0 }
0x1dd2   :  { %6741 = vmatpush3.msra.mxu0 %v9632_v17 }
0x1dd3   :  { %6742 = vmatprep.subr.mxu0 %v10458_v0 }
0x1dd4   :  { %6743 = vmatpush3.msra.mxu0 %v9642_v48 }
0x1dd5   :  { %6744 = vmatprep.subr.mxu0 %v10458_v0 }
0x1dd6   :  { %6745 = vmatpush3.msra.mxu0 %v9652_v37 }
0x1dd7   :  { %6746 = vmatprep.subr.mxu0 %v10458_v0 }
0x1dd8   :  { %6747 = vmatpush3.msra.mxu0 %v9662_v8 }
0x1dd9   :  { %6748 = vmatprep.subr.mxu0 %v10458_v0 }
0x1dda   :  { %6749 = vmatpush3.msra.mxu0 %v9672_v20 }
0x1ddb   :  { %6750 = vmatprep.subr.mxu0 %v10458_v0 }
0x1ddc   :  { %6751 = vmatpush3.msra.mxu0 %v9682_v44 }
0x1ddd   :  { %6752 = vmatprep.subr.mxu0 %v10458_v0 }
0x1dde   :  { %6753 = vmatpush3.msra.mxu0 %v9692_v15 }
0x1ddf   :  { %6754 = vmatprep.subr.mxu0 %v10458_v0 }
0x1de0   :  { %6755 = vmatpush3.msra.mxu0 %v9702_v50 }
0x1de1   :  { %6756 = vmatprep.subr.mxu0 %v10458_v0 }
0x1de2   :  { %6757 = vmatpush3.msra.mxu0 %v9712_v34 }
0x1de3   :  { %6758 = vmatprep.subr.mxu0 %v10458_v0 }
0x1de4   :  { %6759 = vmatpush3.msra.mxu0 %v9722_v43 }
0x1de5   :  { %6760 = vmatprep.subr.mxu0 %v10458_v0 }
0x1de6   :  { %6761 = vmatpush3.msra.mxu0 %v9732_v24 }
0x1de7   :  { %6762 = vmatprep.subr.mxu0 %v10458_v0 }
0x1de8   :  { %6763 = vmatpush3.msra.mxu0 %v9751_v36 }
0x1de9   :  { %6764 = vmatprep.subr.mxu0 %v10458_v0 }
0x1dea   :  { %6765 = vmatpush3.msra.mxu0 %v9761_v31 }
0x1deb   :  { %6769 = vmatprep.subr.mxu0 %v10458_v0 }
0x1e8b   :  { %v4677_v2 = vpop.f32.mrf.mxu0 }
0x1e8c   :  { %v4678_v23 = vadd.f32 %v4677_v2, %v10081_v10  ;;  %v10807_v2 = vld [vmem:[#allocation53_spill] sm:$0xff] }
0x1e8d   :  { %v6733_v19 = vpop.f32.mrf.mxu0 }
0x1e8e   :  { %4682 = vst [vmem:[#allocation11 + $0x40] sm:$0xff] %v4678_v23  ;;  %4683 = vmax.xlane.f32.xlu0 %v4678_v23  ;;  %v10809_v19 = vld [vmem:[#allocation40_spill] sm:$0xff] }
0x1f17   :  { %v4684_v17 = vpop.xlane.xlu0 %4683 }
0x1f18   :  { %vm4685_vm11 = vcmp.eq.f32.partialorder %v4678_v23, %v4684_v17  ;;  %v10808_v23 = vld [vmem:[#allocation38_spill] sm:$0xff] }
0x1f19   :  { %v4686_v48 = vsel %vm4685_vm11, %v7295_v40, 128  ;;  %v10810_v17 = vld [vmem:[#allocation54_spill] sm:$0xff] }
0x1f1a   :  { %v4688_v37 = vshra.s32 %v4686_v48, 16  ;;  %v4687_v20 = vand.u32 65535, %v4686_v48  ;;  %v10811_v48 = vld [vmem:[#allocation41_spill] sm:$0xff] }
0x1f1c   :  { %v4690_v8 = vcvt.s32.f32 %v4688_v37  ;;  %v4689_v15 = vcvt.s32.f32 %v4687_v20  ;;  %v10812_v37 = vld [vmem:[#allocation43_spill] sm:$0xff]  ;;  %v10814_v20 = vld [vmem:[#allocation46_spill] sm:$0xff] }
0x1f1e   :  { %4691 = vmin.xlane.f32.xlu1 %v4690_v8 }
0x1fa7   :  { %v4692_v44 = vpop.xlane.xlu1 %4691 }
0x1fa8   :  { %vm4693_vm12 = vcmp.eq.f32.partialorder %v4690_v8, %v4692_v44  ;;  %v4698_v34 = vcvt.f32.s32 %v4692_v44  ;;  %v10813_v8 = vld [vmem:[#allocation44_spill] sm:$0xff]  ;;  %v10815_v44 = vld [vmem:[#allocation47_spill] sm:$0xff] }
0x1fa9   :  { %v4694_v50 = vsel %vm4693_vm12, %v4689_v15, inf  ;;  %v10816_v15 = vld [vmem:[#allocation48_spill] sm:$0xff] }
0x1faa   :  { %4695 = vmin.xlane.f32.xlu0 %v4694_v50  ;;  %v4699_v24 = vshll.u32 %v4698_v34, 16  ;;  %v10817_v50 = vld [vmem:[#allocation49_spill] sm:$0xff]  ;;  %v10818_v34 = vld [vmem:[#allocation50_spill] sm:$0xff] }
0x2033   :  { %v4696_v43 = vpop.xlane.xlu0 %4695 }
0x2034   :  { %v4697_v36 = vcvt.f32.s32 %v4696_v43  ;;  %v10819_v43 = vld [vmem:[#allocation51_spill] sm:$0xff] }
0x2036   :  { %v4700_v31 = vadd.s32 %v4699_v24, %v4697_v36  ;;  %v10820_v24 = vld [vmem:[#allocation52_spill] sm:$0xff] }
0x2038   :  { %vm4701_vm13 = vcmp.eq.s32.totalorder %v7295_v40, %v4700_v31  ;;  %v10789_v40 = vld [vmem:[#allocation36_spill] sm:$0xff] }
0x2039   :  { %5275 = vmatmul.mubr.msk.f32.vlgmr.msra.gmra.mxu1 %vm4701_vm13, %v10432_v55  ;;  %6767 = vmatmul.mubr.msk.f32.vlgmr.msra.gmra.mxu0 %vm4701_vm13, %v10432_v55  ;;  %v10791_v55 = vld [vmem:[#allocation23_spill] sm:$0xff] }
0x203a   :  { %4945 = vmatpush1.msra.mxu1 %v9769_v32  ;;  %6770 = vmatpush3.msra.mxu0 %v9771_v25  ;;  %v10792_v32 = vld [vmem:[#allocation39_spill] sm:$0xff]  ;;  %v10793_v25 = vld [vmem:[#allocation24_spill] sm:$0xff] }
0x203b   :  { %4946 = vmatprep.subr.mxu1 %v10785_v6  ;;  %6771 = vmatprep.subr.mxu0 %v10458_v0 }
0x203c   :  { %4947 = vmatpush1.msra.mxu1 %v10786_v22  ;;  %6772 = vmatpush3.msra.mxu0 %v10787_v62 }
0x203d   :  { %4948 = vmatprep.subr.mxu1 %v10788_v30  ;;  %6773 = vmatprep.subr.mxu0 %v10458_v0 }
0x203e   :  { %4949 = vmatpush1.msra.mxu1 %v10789_v40  ;;  %6774 = vmatpush3.msra.mxu0 %v10790_v28 }
0x203f   :  { %4950 = vmatprep.subr.mxu1 %v10791_v55  ;;  %6775 = vmatprep.subr.mxu0 %v10458_v0 }
0x2040   :  { %4951 = vmatpush1.msra.mxu1 %v10792_v32  ;;  %6776 = vmatpush3.msra.mxu0 %v10793_v25 }
0x2041   :  { %4952 = vmatprep.subr.mxu1 %v10794_v42  ;;  %6777 = vmatprep.subr.mxu0 %v10458_v0 }
0x2042   :  { %4953 = vmatpush1.msra.mxu1 %v10795_v57  ;;  %6778 = vmatpush3.msra.mxu0 %v10796_v5 }
0x2043   :  { %4954 = vmatprep.subr.mxu1 %v10797_v51  ;;  %6779 = vmatprep.subr.mxu0 %v10458_v0 }
0x2044   :  { %4955 = vmatpush1.msra.mxu1 %v10798_v26  ;;  %6780 = vmatpush3.msra.mxu0 %v10799_v59 }
0x2045   :  { %4956 = vmatprep.subr.mxu1 %v10800_v47  ;;  %6781 = vmatprep.subr.mxu0 %v10458_v0 }
0x2046   :  { %4957 = vmatpush1.msra.mxu1 %v10801_v18  ;;  %6782 = vmatpush3.msra.mxu0 %v10802_v38 }
0x2047   :  { %4958 = vmatprep.subr.mxu1 %v10803_v16  ;;  %6783 = vmatprep.subr.mxu0 %v10458_v0 }
0x2048   :  { %4959 = vmatpush1.msra.mxu1 %v10804_v27  ;;  %6784 = vmatpush3.msra.mxu0 %v10805_v21 }
0x2049   :  { %4960 = vmatprep.subr.mxu1 %v10806_v63  ;;  %6785 = vmatprep.subr.mxu0 %v10458_v0 }
0x204a   :  { %4961 = vmatpush1.msra.mxu1 %v10807_v2  ;;  %6786 = vmatpush3.msra.mxu0 %v10808_v23 }
0x204b   :  { %4962 = vmatprep.subr.mxu1 %v10809_v19  ;;  %6787 = vmatprep.subr.mxu0 %v10458_v0 }
0x204c   :  { %4963 = vmatpush1.msra.mxu1 %v10810_v17  ;;  %6788 = vmatpush3.msra.mxu0 %v10811_v48 }
0x204d   :  { %4964 = vmatprep.subr.mxu1 %v10812_v37  ;;  %6789 = vmatprep.subr.mxu0 %v10458_v0 }
0x204e   :  { %4965 = vmatpush1.msra.mxu1 %v10813_v8  ;;  %6790 = vmatpush3.msra.mxu0 %v10814_v20 }
0x204f   :  { %4966 = vmatprep.subr.mxu1 %v10815_v44  ;;  %6791 = vmatprep.subr.mxu0 %v10458_v0 }
0x2050   :  { %4967 = vmatpush1.msra.mxu1 %v10816_v15  ;;  %6792 = vmatpush3.msra.mxu0 %v10817_v50 }
0x2051   :  { %4968 = vmatprep.subr.mxu1 %v10818_v34  ;;  %6793 = vmatprep.subr.mxu0 %v10458_v0 }
0x2052   :  { %4969 = vmatpush1.msra.mxu1 %v9888_v1  ;;  %6794 = vmatpush3.msra.mxu0 %v10819_v43 }
0x2053   :  { %4970 = vmatprep.subr.mxu1 %v10820_v24  ;;  %6795 = vmatprep.subr.mxu0 %v10458_v0 }
0x2054   :  { %4971 = vmatpush1.msra.mxu1 %v9898_v61  ;;  %6796 = vmatpush3.msra.mxu0 %v9900_v54  ;;  %v10822_v61 = vld [vmem:[#allocation56_spill] sm:$0xff]  ;;  %v10823_v54 = vld [vmem:[#allocation57_spill] sm:$0xff] }
0x2055   :  { %4972 = vmatprep.subr.mxu1 %v9904_v11  ;;  %6797 = vmatprep.subr.mxu0 %v10458_v0  ;;  %v10824_v11 = vld [vmem:[#allocation58_spill] sm:$0xff] }
0x2056   :  { %4973 = vmatpush1.msra.mxu1 %v9908_v39  ;;  %6798 = vmatpush3.msra.mxu0 %v9910_v45 }
0x2057   :  { %4974 = vmatprep.subr.mxu1 %v9914_v53  ;;  %6799 = vmatprep.subr.mxu0 %v10458_v0 }
0x2058   :  { %4975 = vmatpush1.msra.mxu1 %v9918_v58  ;;  %5008 = vmatprep.mubr.f32.mxu1 %v10458_v0 }
0x2059   :  { %6800 = vmatpush3.msra.mxu0 %v9922_v35  ;;  %6801 = vmatprep.mubr.msk.f32.mxu0 %vm7113_vm0, %v10458_v0  ;;  %v10821_v35 = vld [vmem:[#allocation55_spill] sm:$0xff] }
0x205a   :  { %5009 = vmatmul.mubr.f32.vlgmr.msra.gmra.mxu1 %v10044_v13  ;;  %6802 = vmatmul.mubr.f32.vlgmr.msra.gmra.mxu0 %v10044_v13 }
0x205b   :  { %6804 = vmatprep.subr.mxu1 %v10458_v0  ;;  %6836 = vmatprep.mubr.msk.f32.mxu1 %vm7113_vm0, %v10458_v0 }
0x205c   :  { %6805 = vmatpush3.msra.mxu1 %v9970_v52 }
0x205d   :  { %6806 = vmatprep.subr.mxu1 %v10458_v0 }
0x205e   :  { %6807 = vmatpush3.msra.mxu1 %v9974_v3  ;;  %v10825_v3 = vld [vmem:[#allocation59_spill] sm:$0xff] }
0x205f   :  { %6808 = vmatprep.subr.mxu1 %v10458_v0 }
0x2060   :  { %6809 = vmatpush3.msra.mxu1 %v9978_v29 }
0x2061   :  { %6810 = vmatprep.subr.mxu1 %v10458_v0 }
0x2062   :  { %6811 = vmatpush3.msra.mxu1 %v9982_v12 }
0x2063   :  { %6812 = vmatprep.subr.mxu1 %v10458_v0 }
0x2064   :  { %6813 = vmatpush3.msra.mxu1 %v9986_v4 }
0x2065   :  { %6814 = vmatprep.subr.mxu1 %v10458_v0 }
0x2066   :  { %6815 = vmatpush3.msra.mxu1 %v9990_v9 }
0x2067   :  { %6816 = vmatprep.subr.mxu1 %v10458_v0 }
0x2068   :  { %6817 = vmatpush3.msra.mxu1 %v9994_v46 }
0x2069   :  { %6818 = vmatprep.subr.mxu1 %v10458_v0 }
0x206a   :  { %6819 = vmatpush3.msra.mxu1 %v9998_v41 }
0x206b   :  { %6820 = vmatprep.subr.mxu1 %v10458_v0 }
0x206c   :  { %6821 = vmatpush3.msra.mxu1 %v10000_v60 }
0x206d   :  { %6822 = vmatprep.subr.mxu1 %v10458_v0 }
0x206e   :  { %6823 = vmatpush3.msra.mxu1 %v10004_v7 }
0x206f   :  { %6824 = vmatprep.subr.mxu1 %v10458_v0 }
0x2070   :  { %6825 = vmatpush3.msra.mxu1 %v10008_v14 }
0x2071   :  { %6826 = vmatprep.subr.mxu1 %v10458_v0 }
0x2072   :  { %6827 = vmatpush3.msra.mxu1 %v10012_v49 }
0x2073   :  { %6828 = vmatprep.subr.mxu1 %v10458_v0 }
0x2074   :  { %6829 = vmatpush3.msra.mxu1 %v10821_v35 }
0x2075   :  { %6830 = vmatprep.subr.mxu1 %v10458_v0 }
0x2076   :  { %6831 = vmatpush3.msra.mxu1 %v10822_v61 }
0x2077   :  { %6832 = vmatprep.subr.mxu1 %v10458_v0 }
0x2078   :  { %6833 = vmatpush3.msra.mxu1 %v10823_v54 }
0x2079   :  { %6834 = vmatprep.subr.mxu1 %v10458_v0 }
0x207a   :  { %6835 = vmatpush3.msra.mxu1 %v10824_v11 }
0x20f9   :  { %v4889_v39 = vpop.f32.mrf.mxu0  ;;  %v4818_v53 = vpop.f32.mrf.mxu1 }
0x20fb   :  { %v6768_v45 = vpop.f32.mrf.mxu0  ;;  %v4820_v58 = vpop.f32.mrf.mxu1 }
0x211a   :  { %v5010_v1 = vpop.f32.mrf.mxu1  ;;  %v5081_v52 = vpop.f32.mrf.mxu0 }
0x211b   :  { %v5011_v29 = vadd.f32 %v5010_v1, %v10825_v3  ;;  %v5082_v31 = vadd.f32 %v5081_v52, %v10040_v56 }
0x211c   :  { %v5012_v12 = vpop.f32.mrf.mxu1  ;;  %v6803_v4 = vpop.f32.mrf.mxu0 }
0x211d   :  { %v5085_v9 = vadd.f32 %v5011_v29, %v4818_v53  ;;  %v5013_v41 = vadd.f32 %v5012_v12, %v10037_v33 }
0x211f   :  { %v5277_v46 = vmul.f32 -1.442695, %v5085_v9  ;;  %v5092_v60 = vadd.f32 %v5013_v41, %v4820_v58 }
0x2121   :  { %6943 = vpow2.f32 %v5277_v46  ;;  %v5278_v7 = vmul.f32 -1.442695, %v5092_v60 }
0x2123   :  { %6945 = vpow2.f32 %v5278_v7 }
0x212e   :  { %v6944_v0 = vpop.eup %6943 }
0x212f   :  { %v5089_v14 = vadd.f32 1.0, %v6944_v0 }
0x2130   :  { %v6946_v49 = vpop.eup %6945 }
0x2131   :  { %6947 = vrcp.f32 %v5089_v14  ;;  %v5096_v36 = vadd.f32 1.0, %v6946_v49 }
0x2133   :  { %6949 = vrcp.f32 %v5096_v36 }
0x213e   :  { %v6948_v6 = vpop.eup %6947 }
0x213f   :  { %v5099_v22 = vmul.f32 %v6948_v6, %v5082_v31 }
0x2140   :  { %v6950_v30 = vpop.eup %6949 }
0x2141   :  { %v5100_v62 = vadd.f32 %v5099_v22, %v4889_v39  ;;  %v5102_v40 = vsub.f32 1.0, %v6950_v30  ;;  %v5104_v55 = vmul.f32 %v6950_v30, %v10044_v13 }
0x2143   :  { %6951 = vtanh.f32 %v5100_v62 }
0x2150   :  { %v6952_v28 = vpop.eup %6951 }
0x2151   :  { %v5103_v33 = vmul.f32 %v6952_v28, %v5102_v40 }
0x2153   :  { %v5105_v32 = vadd.f32 %v5104_v55, %v5103_v33 }
0x2155   :  { %6837 = vmatmul.mubr.f32.vlgmr.msra.gmra.mxu1 %v5105_v32  ;;  %5195 = vst [vmem:[#allocation12] sm:$0xff] %v5105_v32 }
0x2156   :  { %7064 = shalt.err (!%p7061_p1)
}
0x2157   :  { %5217 = dma.vmem_to_hbm [thread:$0]  %s5215_s27, 128, %s10210_s7, [#allocation13]  }
0x2158   :  { %s7116_s8 = smov [#allocation11]  }
0x2159   :  { %s5201_s9 = sshll.u32 %s7116_s8, 4  ;;  %s5202_s9 = int_to_ptr.vmem [resolvable:$true] %s5201_s9 }
0x215a   :  { %s7073_s10 = scalar_lea.vmem %s5202_s9, 1280  ;;  %p7078_p3 = scmp.lt.s32.totalorder %s5202_s9, %s5202_s9 }
0x215b   :  { %p7074_p2 = scmp.ne.s32.totalorder %s5202_s9, %s7073_s10  ;;  %p7079_p4 = scmp.lt.s32.totalorder %s7073_s10, %s7073_s10 }
0x215d   :  { %p7080_p5 = por %p7079_p4, %p7078_p3 }
0x215f   :  { %p7081_p6 = pnand %p7080_p5, %p7074_p2 }
0x2215   :  { %v5189_v56 = vpop.f32.mrf.mxu1 }
0x2216   :  { %v5190_v13 = vadd.f32 %v5189_v56, %v10081_v10 }
0x2217   :  { %v6838_v25 = vpop.f32.mrf.mxu1 }
0x2218   :  { %5194 = vst [vmem:[#allocation11 + $0x48] sm:$0xff] %v5190_v13 }
0x2219   :  { %7084 = shalt.err (!%p7081_p6)
}
0x221a   :  { %5207 = dma.vmem_to_hbm [thread:$0]  %s5202_s9, 1280, %s10209_s6, [#allocation4], %s7107_s11, %s7107_s11, %s7108_s12  }
0x221b   :  { %7099 = dma.done.wait [#allocation4], 1280  }
0x221c   :  { %7100 = vsyncadd [#allocation4], 4294966016 }
0x221d   :  { %7101 = dma.done.wait [#allocation13], 128  }
0x221e   :  { %7102 = vsyncadd [#allocation13], 4294967168 }
0x221f   :  { %5224 = vsyncpa [#allocation3], 1 }
0x2220   :  { %5225 = vsyncpa [#allocation6], 1 }
0x2221   :  { %5226 = vsyncpa [#allocation9], 1 }
0x2222   :  { %5227 = vsyncpa [#allocation4], 1 }
0x2223   :  { %5228 = vsyncpa [#allocation13], 1 }

</bundles_post_ra>
